<compile_context>
chip_gen: v6e
topology: v6e:2x2x1
jax: 0.10.0
libtpu: 0.0.40
codegen_flags: <defaults>
</compile_context>

<pallas_src>
import math

import jax
import jax.numpy as jnp
from jax.experimental import pallas as pl
from jax.experimental.pallas import tpu as pltpu

LN_EPS = 1e-5
NEG_INF = -1e9


def _round_up(a, b):
    return ((a + b - 1) // b) * b


def _layer_norm(x, gamma, beta):
    # LayerNorm over last dim, biased variance (matches torch.nn.LayerNorm).
    mean = jnp.mean(x, axis=-1, keepdims=True)
    var = jnp.mean((x - mean) ** 2, axis=-1, keepdims=True)
    return (x - mean) * jax.lax.rsqrt(var + LN_EPS) * gamma + beta


def _resident(shape, index_map, single_buffer):
    """BlockSpec for an operand whose block index never changes (weights)."""
    if single_buffer:
        # Constant-index operand: one VMEM buffer is enough.
        return pl.BlockSpec(shape, index_map, pipeline_mode=pl.Buffered(1))
    return pl.BlockSpec(shape, index_map)


def _default_vmem_limit():
    try:
        kind = jax.devices()[0].device_kind.lower()
    except Exception:  # pragma: no cover - defensive
        kind = ""
    if "v7" in kind:
        return 48 * 1024 * 1024    # v7x: 64 MiB physical per TC
    return 96 * 1024 * 1024        # v5e / v6e: 128 MiB physical


# --------------- kernel 1: K/V projection (once per batch / row tile) --------

def kv_proj_kernel(x_ref, wk_ref, bk_ref, wv_ref, bv_ref, k_ref, v_ref):
    cdt = wk_ref.dtype
    f32 = jnp.float32
    x = x_ref[...].astype(cdt)
    # wk/wv pre-split to (H, D, d_k): each head is a full-contraction matmul
    # written straight to k_ref[h]/v_ref[h] -> no slices, concats or transposes.
    for h in range(wk_ref.shape[0]):
        k_ref[h] = (jnp.dot(x, wk_ref[h], preferred_element_type=f32)
                    + bk_ref[h]).astype(k_ref.dtype)
        v_ref[h] = (jnp.dot(x, wv_ref[h], preferred_element_type=f32)
                    + bv_ref[h]).astype(v_ref.dtype)


# --------------- kernel 2: flash attention + Wo + residual + LN1 -------------

def attn_kernel(x_q_ref, k_ref, v_ref, bias_ref,
                wq_ref, bq_ref, wo_ref, bo_ref, g1_ref, be1_ref,
                o_ref,
                q_sc, m_sc, l_sc, acc_sc):
    ki = pl.program_id(2)
    nk = pl.num_programs(2)
    cdt = wq_ref.dtype            # MXU-input dtype (bf16 recommended)
    f32 = jnp.float32
    num_heads = wq_ref.shape[0]

    # ---- first KV step for this (batch, q-tile): project Q, reset state ----
    @pl.when(ki == 0)
    def _init():
        xq = x_q_ref[...].astype(cdt)
        # Per-head Q projection (1/sqrt(d_k) folded into wq/bq in the wrapper);
        # writes go to leading-axis slots of q_sc -> no relayout / concat.
        for h in range(num_heads):
            q_sc[h] = (jnp.dot(xq, wq_ref[h], preferred_element_type=f32)
                       + bq_ref[h]).astype(q_sc.dtype)
        m_sc[...] = jnp.full_like(m_sc, -jnp.inf)
        l_sc[...] = jnp.zeros_like(l_sc)
        acc_sc[...] = jnp.zeros_like(acc_sc)

    # ---- scores for this KV tile: one head-batched MXU matmul + bf16 bias ---
    k3 = k_ref[...]                                     # (H, TKV, d_k) cdt
    v3 = v_ref[...]                                     # (H, TKV, d_k) cdt
    s = jnp.einsum("hqd,hkd->hqk", q_sc[...], k3,
                   preferred_element_type=f32)          # (H, TQ, TKV) f32
    s = s + bias_ref[...].astype(f32)[None, :, :]

    # ---- online softmax update (all elementwise math in f32) ----
    m_prev = m_sc[...]
    m_new = jnp.maximum(m_prev, jnp.max(s, axis=-1, keepdims=True))
    alpha = jnp.exp(m_prev - m_new)
    p = jnp.exp(s - m_new)
    l_sc[...] = alpha * l_sc[...] + jnp.sum(p, axis=-1, keepdims=True)
    acc_sc[...] = alpha * acc_sc[...] + jnp.einsum(
        "hqk,hkd->hqd", p.astype(cdt), v3, preferred_element_type=f32)
    m_sc[...] = m_new

    # ---- last KV step: Wo projection, residual + LayerNorm1 ----
    @pl.when(ki == nk - 1)
    def _finalize():
        inv_l = pl.reciprocal(l_sc[...], approx=True)   # EUP slot, ~free
        o3 = (acc_sc[...] * inv_l).astype(cdt)          # (H, TQ, d_k)
        # W_o pre-split to (H, d_k, D): per-head matmul accumulated in f32
        # replaces the combine-heads concat entirely.
        attn = jnp.zeros(x_q_ref.shape, f32)            # (TQ, D)
        for h in range(num_heads):
            attn = attn + jnp.dot(o3[h], wo_ref[h], preferred_element_type=f32)
        attn = attn + bo_ref[...]
        # TODO(synk): dropout treated as identity (eval mode).
        xq = x_q_ref[...].astype(f32)
        o_ref[...] = _layer_norm(xq + attn, g1_ref[...],
                                 be1_ref[...]).astype(o_ref.dtype)


# --------------- kernel 3: FFN (tiled over d_ff) + residual + LN2 ------------

def ffn_kernel(x1_ref, w1_ref, b1_ref, w2_ref, b2_ref, g2_ref, be2_ref,
               o_ref, acc_sc):
    fi = pl.program_id(2)
    nf = pl.num_programs(2)
    cdt = w1_ref.dtype
    f32 = jnp.float32

    @pl.when(fi == 0)
    def _init():
        acc_sc[...] = jnp.zeros_like(acc_sc)

    x1c = x1_ref[...].astype(cdt)
    h = jnp.dot(x1c, w1_ref[...], preferred_element_type=f32) + b1_ref[...]
    h = jnp.maximum(h, 0.0).astype(cdt)                 # ReLU
    acc_sc[...] += jnp.dot(h, w2_ref[...], preferred_element_type=f32)

    @pl.when(fi == nf - 1)
    def _finalize():
        x1 = x1_ref[...].astype(f32)
        ff = acc_sc[...] + b2_ref[...]
        # TODO(synk): dropout treated as identity (eval mode).
        o_ref[...] = _layer_norm(x1 + ff, g2_ref[...],
                                 be2_ref[...]).astype(o_ref.dtype)


# ------------------------------ wrapper ---------------------------------------

def _forward(x, mask, params, *, num_heads, compute_dtype, q_tile, kv_tile,
             ff_tile, vmem_limit_bytes, single_buffer_weights):
    B, S, D = x.shape
    assert D % num_heads == 0
    assert mask.shape == (S, S)
    d_k = D // num_heads
    d_ff = params["w1"].shape[1]
    f32 = jnp.float32
    cdt = compute_dtype
    sb = single_buffer_weights

    # ---- tiling / padding (pad S up to a tile multiple; pad keys masked) ----
    S_align = _round_up(S, 128)
    TQ = min(_round_up(q_tile, 8), S_align)
    TKV = min(_round_up(kv_tile, 128), S_align)
    S_pad = _round_up(S, math.lcm(TQ, TKV))
    n_q, n_kv = S_pad // TQ, S_pad // TKV
    TM = TQ
    TF = min(ff_tile, d_ff)
    if d_ff % TF or (TF != d_ff and TF % 128):
        TF = d_ff
    n_f = d_ff // TF

    if vmem_limit_bytes is None:
        vmem_limit_bytes = _default_vmem_limit()

    xp = jnp.pad(x, ((0, 0), (0, S_pad - S), (0, 0))) if S_pad != S else x
    maskp = mask.astype(jnp.int32)
    if S_pad != S:
        maskp = jnp.pad(maskp, ((0, S_pad - S), (0, S_pad - S)))
    # Mask -> additive bias, stored bf16 (halves the S^2 bias DMA vs f32).
    bias = jnp.where(maskp == 0, jnp.float32(NEG_INF),
                     jnp.float32(0.0)).astype(jnp.bfloat16)

    # ---- weight prep: head-split, scale folded into Wq/bq, cdt MXU inputs ----
    scale = 1.0 / math.sqrt(d_k)

    def head_split_w(w):      # (D, D) -> (H, D, d_k)
        return w.reshape(D, num_heads, d_k).transpose(1, 0, 2)

    def head_split_b(b):      # (1, D) -> (H, 1, d_k)
        return b.reshape(num_heads, d_k)[:, None, :]

    wq = head_split_w(params["wq"] * scale).astype(cdt)
    bq = (head_split_b(params["bq"]) * scale).astype(f32)
    wk = head_split_w(params["wk"]).astype(cdt)
    bk = head_split_b(params["bk"]).astype(f32)
    wv = head_split_w(params["wv"]).astype(cdt)
    bv = head_split_b(params["bv"]).astype(f32)
    wo = params["wo"].reshape(num_heads, d_k, D).astype(cdt)
    bo = params["bo"].astype(f32)
    w1 = params["w1"].astype(cdt)
    bf1 = params["bf1"].astype(f32)
    w2 = params["w2"].astype(cdt)
    bf2 = params["bf2"].astype(f32)
    g1, be1 = params["g1"].astype(f32), params["be1"].astype(f32)
    g2, be2 = params["g2"].astype(f32), params["be2"].astype(f32)

    cp2 = pltpu.CompilerParams(dimension_semantics=("parallel", "parallel"),
                               vmem_limit_bytes=vmem_limit_bytes)
    cp3 = pltpu.CompilerParams(
        dimension_semantics=("parallel", "parallel", "arbitrary"),
        vmem_limit_bytes=vmem_limit_bytes)

    # ---- kernel 1: K/V projected once per batch (not once per q-tile) -------
    TS = TKV
    kv_shape = jax.ShapeDtypeStruct((B, num_heads, S_pad, d_k), cdt)
    k3, v3 = pl.pallas_call(
        kv_proj_kernel,
        out_shape=(kv_shape, kv_shape),
        grid_spec=pltpu.PrefetchScalarGridSpec(
            num_scalar_prefetch=0,
            grid=(B, S_pad // TS),
            in_specs=[
                pl.BlockSpec((None, TS, D), lambda b, si: (b, si, 0)),
                _resident((num_heads, D, d_k), lambda b, si: (0, 0, 0), sb),
                _resident((num_heads, 1, d_k), lambda b, si: (0, 0, 0), sb),
                _resident((num_heads, D, d_k), lambda b, si: (0, 0, 0), sb),
                _resident((num_heads, 1, d_k), lambda b, si: (0, 0, 0), sb),
            ],
            out_specs=(
                pl.BlockSpec((None, num_heads, TS, d_k),
                             lambda b, si: (b, 0, si, 0)),
                pl.BlockSpec((None, num_heads, TS, d_k),
                             lambda b, si: (b, 0, si, 0)),
            )),
        compiler_params=cp2,
    )(xp, wk, bk, wv, bv)

    # ---- kernel 2: flash attention + Wo + residual + LN1 --------------------
    x1 = pl.pallas_call(
        attn_kernel,
        out_shape=jax.ShapeDtypeStruct((B, S_pad, D), jnp.float32),
        grid_spec=pltpu.PrefetchScalarGridSpec(
            num_scalar_prefetch=0,
            grid=(B, n_q, n_kv),
            in_specs=[
                pl.BlockSpec((None, TQ, D), lambda b, qi, ki: (b, qi, 0)),
                pl.BlockSpec((None, num_heads, TKV, d_k),
                             lambda b, qi, ki: (b, 0, ki, 0)),
                pl.BlockSpec((None, num_heads, TKV, d_k),
                             lambda b, qi, ki: (b, 0, ki, 0)),
                pl.BlockSpec((TQ, TKV), lambda b, qi, ki: (qi, ki)),
                _resident((num_heads, D, d_k), lambda b, qi, ki: (0, 0, 0), sb),
                _resident((num_heads, 1, d_k), lambda b, qi, ki: (0, 0, 0), sb),
                _resident((num_heads, d_k, D), lambda b, qi, ki: (0, 0, 0), sb),
                _resident((1, D), lambda b, qi, ki: (0, 0), sb),
                _resident((1, D), lambda b, qi, ki: (0, 0), sb),
                _resident((1, D), lambda b, qi, ki: (0, 0), sb),
            ],
            out_specs=pl.BlockSpec((None, TQ, D), lambda b, qi, ki: (b, qi, 0)),
            scratch_shapes=[
                pltpu.VMEM((num_heads, TQ, d_k), cdt),   # scaled head-split Q
                pltpu.VMEM((num_heads, TQ, 1), f32),     # running max
                pltpu.VMEM((num_heads, TQ, 1), f32),     # running denominator
                pltpu.VMEM((num_heads, TQ, d_k), f32),   # un-normalized out acc
            ]),
        compiler_params=cp3,
    )(xp, k3, v3, bias, wq, bq, wo, bo, g1, be1)

    # ---- kernel 3: FFN + residual + LN2 (W1/W2 out of the attention loop) ---
    sbw = sb and n_f == 1   # only resident when d_ff isn't tiled
    out_p = pl.pallas_call(
        ffn_kernel,
        out_shape=jax.ShapeDtypeStruct((B, S_pad, D), x.dtype),
        grid_spec=pltpu.PrefetchScalarGridSpec(
            num_scalar_prefetch=0,
            grid=(B, S_pad // TM, n_f),
            in_specs=[
                pl.BlockSpec((None, TM, D), lambda b, mi, fi: (b, mi, 0)),
                _resident((D, TF), lambda b, mi, fi: (0, fi), sbw),
                _resident((1, TF), lambda b, mi, fi: (0, fi), sbw),
                _resident((TF, D), lambda b, mi, fi: (fi, 0), sbw),
                _resident((1, D), lambda b, mi, fi: (0, 0), sb),
                _resident((1, D), lambda b, mi, fi: (0, 0), sb),
                _resident((1, D), lambda b, mi, fi: (0, 0), sb),
            ],
            out_specs=pl.BlockSpec((None, TM, D), lambda b, mi, fi: (b, mi, 0)),
            scratch_shapes=[pltpu.VMEM((TM, D), f32)]),
        compiler_params=cp3,
    )(x1, w1, bf1, w2, bf2, g2, be2)

    return out_p[:, :S, :] if S_pad != S else out_p


def encoder_layer(x, mask, params, *, num_heads, compute_dtype=jnp.bfloat16,
                  q_tile=256, kv_tile=512, ff_tile=2048, vmem_limit_bytes=None):
    """EncoderLayer forward.

    x: (B, S, D); mask: (S, S) with 0 = masked.  params hold pre-transposed
    nn.Linear weights (in, out), biases (1, out) and LN gamma/beta (1, D).
    compute_dtype: dtype fed to the MXU.  bfloat16 is recommended on ALL TPU
    generations (v5e/v6e/v7x: bf16-native MXU); accumulation, softmax,
    LayerNorm and residual math are float32 regardless.  On v7x prefer
    kv_tile=256 for large head counts; on v5e/v6e larger kv_tile is fine.
    """
    kwargs = dict(num_heads=num_heads, compute_dtype=compute_dtype,
                  q_tile=q_tile, kv_tile=kv_tile, ff_tile=ff_tile,
                  vmem_limit_bytes=vmem_limit_bytes)
    try:
        return _forward(x, mask, params, single_buffer_weights=True, **kwargs)
    except Exception:
        # pl.Buffered(1) (single-buffered resident weights) not supported by
        # this JAX version -- fall back to default double buffering.
        return _forward(x, mask, params, single_buffer_weights=False, **kwargs)


# ------------------------------ reference -------------------------------------

def reference_encoder_layer(x, mask, params, *, num_heads):
    B, S, D = x.shape
    d_k = D // num_heads
    q = x @ params["wq"] + params["bq"][0]
    k = x @ params["wk"] + params["bk"][0]
    v = x @ params["wv"] + params["bv"][0]

    def split(t):  # (B,S,D) -> (B,H,S,dk)
        return t.reshape(B, S, num_heads, d_k).transpose(0, 2, 1, 3)

    qh, kh, vh = split(q), split(k), split(v)
    s = jnp.einsum("bhqd,bhkd->bhqk", qh, kh) / math.sqrt(d_k)
    s = jnp.where(mask[None, None] == 0, NEG_INF, s)
    p = jax.nn.softmax(s, axis=-1)
    o = jnp.einsum("bhqk,bhkd->bhqd", p, vh)
    o = o.transpose(0, 2, 1, 3).reshape(B, S, D)
    attn = o @ params["wo"] + params["bo"][0]
    x1 = _layer_norm(x + attn, params["g1"][0], params["be1"][0])
    h1 = jax.nn.relu(x1 @ params["w1"] + params["bf1"][0])
    ff = h1 @ params["w2"] + params["bf2"][0]
    return _layer_norm(x1 + ff, params["g2"][0], params["be2"][0])


if __name__ == "__main__":
    B, S, D, H, DFF = 2, 8, 32, 4, 256
    key = jax.random.PRNGKey(0)
    ks = jax.random.split(key, 16)

    def lin(k, din, dout):
        # torch Linear weight (dout, din) ~ U(-1/sqrt(din), 1/sqrt(din)); pre-transposed.
        lim = 1.0 / math.sqrt(din)
        w = jax.random.uniform(k, (din, dout), jnp.float32, -lim, lim)
        b = jax.random.uniform(jax.random.fold_in(k, 1), (1, dout),
                               jnp.float32, -lim, lim)
        return w, b

    wq, bq = lin(ks[0], D, D)
    wk, bk = lin(ks[1], D, D)
    wv, bv = lin(ks[2], D, D)
    wo, bo = lin(ks[3], D, D)
    w1, bf1 = lin(ks[4], D, DFF)
    w2, bf2 = lin(ks[5], DFF, D)
    params = dict(
        wq=wq, bq=bq, wk=wk, bk=bk, wv=wv, bv=bv, wo=wo, bo=bo,
        w1=w1, bf1=bf1, w2=w2, bf2=bf2,
        g1=jnp.ones((1, D), jnp.float32), be1=jnp.zeros((1, D), jnp.float32),
        g2=jnp.ones((1, D), jnp.float32), be2=jnp.zeros((1, D), jnp.float32),
    )

    # --- small single-tile case (encoder self-attention, all-ones mask) ---
    x = jax.random.normal(ks[6], (B, S, D), jnp.float32)
    mask = jnp.ones((S, S), jnp.int32)
    ref = reference_encoder_layer(x, mask, params, num_heads=H)

    out_f32 = jax.block_until_ready(
        encoder_layer(x, mask, params, num_heads=H, compute_dtype=jnp.float32))
    assert out_f32.shape == (B, S, D)
    assert jnp.allclose(out_f32, ref, atol=1e-2, rtol=1e-2), \
        float(jnp.max(jnp.abs(out_f32 - ref)))

    # --- default bf16 MXU-input path (recommended on v5e/v6e/v7x) ---
    out_bf16 = jax.block_until_ready(encoder_layer(x, mask, params, num_heads=H))
    assert jnp.allclose(out_bf16, ref, atol=5e-2, rtol=5e-2), \
        float(jnp.max(jnp.abs(out_bf16 - ref)))

    # --- multi-tile, non-divisible S: exercises padding + masked pad keys,
    #     q-tiling, online softmax over KV tiles and the d_ff reduction axis ---
    S2 = 200
    x2 = jax.random.normal(ks[7], (B, S2, D), jnp.float32)
    mask2 = (jax.random.uniform(ks[8], (S2, S2)) > 0.1).astype(jnp.int32)
    ref2 = reference_encoder_layer(x2, mask2, params, num_heads=H)
    out2 = jax.block_until_ready(
        encoder_layer(x2, mask2, params, num_heads=H, compute_dtype=jnp.float32,
                      q_tile=64, kv_tile=128, ff_tile=128))
    assert out2.shape == (B, S2, D)
    assert jnp.allclose(out2, ref2, atol=1e-2, rtol=1e-2), \
        float(jnp.max(jnp.abs(out2 - ref2)))

    print("KERNEL_OK")
</pallas_src>

<mosaic_0001>
module attributes {stable_mosaic.version = 11 : i64} {
  func.func @kv_proj_kernel(%arg0: i32, %arg1: i32, %arg2: memref<1x128x32xf32, #tpu.memory_space<vmem>>, %arg3: memref<4x32x8xf32, #tpu.memory_space<vmem>>, %arg4: memref<4x1x8xf32, #tpu.memory_space<vmem>>, %arg5: memref<4x32x8xf32, #tpu.memory_space<vmem>>, %arg6: memref<4x1x8xf32, #tpu.memory_space<vmem>>, %arg7: memref<1x4x128x8xf32, #tpu.memory_space<vmem>>, %arg8: memref<1x4x128x8xf32, #tpu.memory_space<vmem>>) attributes {dimension_semantics = [#tpu.dimension_semantics<parallel>, #tpu.dimension_semantics<parallel>], iteration_bounds = array<i64: 2, 1>, scalar_prefetch = 0 : i64, scratch_operands = 0 : i64, tpu.core_type = #tpu.core_type<tc>, window_params = [{transform_indices = @transform_0, window_bounds = array<i64: 1, 128, 32>}, {pipeline_mode = #tpu.pipeline_mode<synchronous>, transform_indices = @transform_1, window_bounds = array<i64: 4, 32, 8>}, {pipeline_mode = #tpu.pipeline_mode<synchronous>, transform_indices = @transform_2, window_bounds = array<i64: 4, 1, 8>}, {pipeline_mode = #tpu.pipeline_mode<synchronous>, transform_indices = @transform_3, window_bounds = array<i64: 4, 32, 8>}, {pipeline_mode = #tpu.pipeline_mode<synchronous>, transform_indices = @transform_4, window_bounds = array<i64: 4, 1, 8>}, {transform_indices = @transform_5, window_bounds = array<i64: 1, 4, 128, 8>}, {transform_indices = @transform_6, window_bounds = array<i64: 1, 4, 128, 8>}]} {
    %c0 = arith.constant 0 : index
    %c0_0 = arith.constant 0 : index
    %c0_1 = arith.constant 0 : index
    %0 = vector.load %arg2[%c0, %c0_0, %c0_1] : memref<1x128x32xf32, #tpu.memory_space<vmem>>, vector<1x128x32xf32>
    %1 = vector.shape_cast %0 : vector<1x128x32xf32> to vector<128x32xf32>
    %c0_2 = arith.constant 0 : index
    %c0_3 = arith.constant 0 : index
    %c0_4 = arith.constant 0 : index
    %2 = vector.load %arg3[%c0_2, %c0_3, %c0_4] : memref<4x32x8xf32, #tpu.memory_space<vmem>>, vector<1x32x8xf32>
    %3 = vector.shape_cast %2 : vector<1x32x8xf32> to vector<32x8xf32>
    %cst = arith.constant dense<0.000000e+00> : vector<128x8xf32>
    %4 = tpu.matmul %1, %3, %cst {dimension_numbers = #tpu.dot_dimension_numbers<[1], [0], [0], [1], [0, 0, 1, 1], [], []>} : vector<128x32xf32>, vector<32x8xf32>, vector<128x8xf32> -> vector<128x8xf32>
    %c0_5 = arith.constant 0 : index
    %c0_6 = arith.constant 0 : index
    %c0_7 = arith.constant 0 : index
    %5 = vector.load %arg4[%c0_5, %c0_6, %c0_7] : memref<4x1x8xf32, #tpu.memory_space<vmem>>, vector<1x1x8xf32>
    %6 = vector.shape_cast %5 : vector<1x1x8xf32> to vector<1x8xf32>
    %7 = vector.broadcast %6 : vector<1x8xf32> to vector<128x8xf32>
    %8 = arith.addf %4, %7 : vector<128x8xf32>
    %c0_8 = arith.constant 0 : index
    %c0_9 = arith.constant 0 : index
    %c0_10 = arith.constant 0 : index
    %c0_11 = arith.constant 0 : index
    %9 = vector.load %arg7[%c0_8, %c0_9, %c0_10, %c0_11] : memref<1x4x128x8xf32, #tpu.memory_space<vmem>>, vector<1x1x128x8xf32>
    %10 = vector.shape_cast %9 : vector<1x1x128x8xf32> to vector<128x8xf32>
    %11 = vector.shape_cast %8 : vector<128x8xf32> to vector<1x1x128x8xf32>
    tpu.vector_store %arg7[%c0_8, %c0_9, %c0_10, %c0_11], %11 {strides = array<i32>} : memref<1x4x128x8xf32, #tpu.memory_space<vmem>>, vector<1x1x128x8xf32>,
    %c0_12 = arith.constant 0 : index
    %c0_13 = arith.constant 0 : index
    %c0_14 = arith.constant 0 : index
    %12 = vector.load %arg5[%c0_12, %c0_13, %c0_14] : memref<4x32x8xf32, #tpu.memory_space<vmem>>, vector<1x32x8xf32>
    %13 = vector.shape_cast %12 : vector<1x32x8xf32> to vector<32x8xf32>
    %cst_15 = arith.constant dense<0.000000e+00> : vector<128x8xf32>
    %14 = tpu.matmul %1, %13, %cst_15 {dimension_numbers = #tpu.dot_dimension_numbers<[1], [0], [0], [1], [0, 0, 1, 1], [], []>} : vector<128x32xf32>, vector<32x8xf32>, vector<128x8xf32> -> vector<128x8xf32>
    %c0_16 = arith.constant 0 : index
    %c0_17 = arith.constant 0 : index
    %c0_18 = arith.constant 0 : index
    %15 = vector.load %arg6[%c0_16, %c0_17, %c0_18] : memref<4x1x8xf32, #tpu.memory_space<vmem>>, vector<1x1x8xf32>
    %16 = vector.shape_cast %15 : vector<1x1x8xf32> to vector<1x8xf32>
    %17 = vector.broadcast %16 : vector<1x8xf32> to vector<128x8xf32>
    %18 = arith.addf %14, %17 : vector<128x8xf32>
    %c0_19 = arith.constant 0 : index
    %c0_20 = arith.constant 0 : index
    %c0_21 = arith.constant 0 : index
    %c0_22 = arith.constant 0 : index
    %19 = vector.load %arg8[%c0_19, %c0_20, %c0_21, %c0_22] : memref<1x4x128x8xf32, #tpu.memory_space<vmem>>, vector<1x1x128x8xf32>
    %20 = vector.shape_cast %19 : vector<1x1x128x8xf32> to vector<128x8xf32>
    %21 = vector.shape_cast %18 : vector<128x8xf32> to vector<1x1x128x8xf32>
    tpu.vector_store %arg8[%c0_19, %c0_20, %c0_21, %c0_22], %21 {strides = array<i32>} : memref<1x4x128x8xf32, #tpu.memory_space<vmem>>, vector<1x1x128x8xf32>,
    %c1 = arith.constant 1 : index
    %c0_23 = arith.constant 0 : index
    %c0_24 = arith.constant 0 : index
    %22 = vector.load %arg3[%c1, %c0_23, %c0_24] : memref<4x32x8xf32, #tpu.memory_space<vmem>>, vector<1x32x8xf32>
    %23 = vector.shape_cast %22 : vector<1x32x8xf32> to vector<32x8xf32>
    %cst_25 = arith.constant dense<0.000000e+00> : vector<128x8xf32>
    %24 = tpu.matmul %1, %23, %cst_25 {dimension_numbers = #tpu.dot_dimension_numbers<[1], [0], [0], [1], [0, 0, 1, 1], [], []>} : vector<128x32xf32>, vector<32x8xf32>, vector<128x8xf32> -> vector<128x8xf32>
    %c1_26 = arith.constant 1 : index
    %c0_27 = arith.constant 0 : index
    %c0_28 = arith.constant 0 : index
    %25 = vector.load %arg4[%c1_26, %c0_27, %c0_28] : memref<4x1x8xf32, #tpu.memory_space<vmem>>, vector<1x1x8xf32>
    %26 = vector.shape_cast %25 : vector<1x1x8xf32> to vector<1x8xf32>
    %27 = vector.broadcast %26 : vector<1x8xf32> to vector<128x8xf32>
    %28 = arith.addf %24, %27 : vector<128x8xf32>
    %c0_29 = arith.constant 0 : index
    %c1_30 = arith.constant 1 : index
    %c0_31 = arith.constant 0 : index
    %c0_32 = arith.constant 0 : index
    %29 = vector.load %arg7[%c0_29, %c1_30, %c0_31, %c0_32] : memref<1x4x128x8xf32, #tpu.memory_space<vmem>>, vector<1x1x128x8xf32>
    %30 = vector.shape_cast %29 : vector<1x1x128x8xf32> to vector<128x8xf32>
    %31 = vector.shape_cast %28 : vector<128x8xf32> to vector<1x1x128x8xf32>
    tpu.vector_store %arg7[%c0_29, %c1_30, %c0_31, %c0_32], %31 {strides = array<i32>} : memref<1x4x128x8xf32, #tpu.memory_space<vmem>>, vector<1x1x128x8xf32>,
    %c1_33 = arith.constant 1 : index
    %c0_34 = arith.constant 0 : index
    %c0_35 = arith.constant 0 : index
    %32 = vector.load %arg5[%c1_33, %c0_34, %c0_35] : memref<4x32x8xf32, #tpu.memory_space<vmem>>, vector<1x32x8xf32>
    %33 = vector.shape_cast %32 : vector<1x32x8xf32> to vector<32x8xf32>
    %cst_36 = arith.constant dense<0.000000e+00> : vector<128x8xf32>
    %34 = tpu.matmul %1, %33, %cst_36 {dimension_numbers = #tpu.dot_dimension_numbers<[1], [0], [0], [1], [0, 0, 1, 1], [], []>} : vector<128x32xf32>, vector<32x8xf32>, vector<128x8xf32> -> vector<128x8xf32>
    %c1_37 = arith.constant 1 : index
    %c0_38 = arith.constant 0 : index
    %c0_39 = arith.constant 0 : index
    %35 = vector.load %arg6[%c1_37, %c0_38, %c0_39] : memref<4x1x8xf32, #tpu.memory_space<vmem>>, vector<1x1x8xf32>
    %36 = vector.shape_cast %35 : vector<1x1x8xf32> to vector<1x8xf32>
    %37 = vector.broadcast %36 : vector<1x8xf32> to vector<128x8xf32>
    %38 = arith.addf %34, %37 : vector<128x8xf32>
    %c0_40 = arith.constant 0 : index
    %c1_41 = arith.constant 1 : index
    %c0_42 = arith.constant 0 : index
    %c0_43 = arith.constant 0 : index
    %39 = vector.load %arg8[%c0_40, %c1_41, %c0_42, %c0_43] : memref<1x4x128x8xf32, #tpu.memory_space<vmem>>, vector<1x1x128x8xf32>
    %40 = vector.shape_cast %39 : vector<1x1x128x8xf32> to vector<128x8xf32>
    %41 = vector.shape_cast %38 : vector<128x8xf32> to vector<1x1x128x8xf32>
    tpu.vector_store %arg8[%c0_40, %c1_41, %c0_42, %c0_43], %41 {strides = array<i32>} : memref<1x4x128x8xf32, #tpu.memory_space<vmem>>, vector<1x1x128x8xf32>,
    %c2 = arith.constant 2 : index
    %c0_44 = arith.constant 0 : index
    %c0_45 = arith.constant 0 : index
    %42 = vector.load %arg3[%c2, %c0_44, %c0_45] : memref<4x32x8xf32, #tpu.memory_space<vmem>>, vector<1x32x8xf32>
    %43 = vector.shape_cast %42 : vector<1x32x8xf32> to vector<32x8xf32>
    %cst_46 = arith.constant dense<0.000000e+00> : vector<128x8xf32>
    %44 = tpu.matmul %1, %43, %cst_46 {dimension_numbers = #tpu.dot_dimension_numbers<[1], [0], [0], [1], [0, 0, 1, 1], [], []>} : vector<128x32xf32>, vector<32x8xf32>, vector<128x8xf32> -> vector<128x8xf32>
    %c2_47 = arith.constant 2 : index
    %c0_48 = arith.constant 0 : index
    %c0_49 = arith.constant 0 : index
    %45 = vector.load %arg4[%c2_47, %c0_48, %c0_49] : memref<4x1x8xf32, #tpu.memory_space<vmem>>, vector<1x1x8xf32>
    %46 = vector.shape_cast %45 : vector<1x1x8xf32> to vector<1x8xf32>
    %47 = vector.broadcast %46 : vector<1x8xf32> to vector<128x8xf32>
    %48 = arith.addf %44, %47 : vector<128x8xf32>
    %c0_50 = arith.constant 0 : index
    %c2_51 = arith.constant 2 : index
    %c0_52 = arith.constant 0 : index
    %c0_53 = arith.constant 0 : index
    %49 = vector.load %arg7[%c0_50, %c2_51, %c0_52, %c0_53] : memref<1x4x128x8xf32, #tpu.memory_space<vmem>>, vector<1x1x128x8xf32>
    %50 = vector.shape_cast %49 : vector<1x1x128x8xf32> to vector<128x8xf32>
    %51 = vector.shape_cast %48 : vector<128x8xf32> to vector<1x1x128x8xf32>
    tpu.vector_store %arg7[%c0_50, %c2_51, %c0_52, %c0_53], %51 {strides = array<i32>} : memref<1x4x128x8xf32, #tpu.memory_space<vmem>>, vector<1x1x128x8xf32>,
    %c2_54 = arith.constant 2 : index
    %c0_55 = arith.constant 0 : index
    %c0_56 = arith.constant 0 : index
    %52 = vector.load %arg5[%c2_54, %c0_55, %c0_56] : memref<4x32x8xf32, #tpu.memory_space<vmem>>, vector<1x32x8xf32>
    %53 = vector.shape_cast %52 : vector<1x32x8xf32> to vector<32x8xf32>
    %cst_57 = arith.constant dense<0.000000e+00> : vector<128x8xf32>
    %54 = tpu.matmul %1, %53, %cst_57 {dimension_numbers = #tpu.dot_dimension_numbers<[1], [0], [0], [1], [0, 0, 1, 1], [], []>} : vector<128x32xf32>, vector<32x8xf32>, vector<128x8xf32> -> vector<128x8xf32>
    %c2_58 = arith.constant 2 : index
    %c0_59 = arith.constant 0 : index
    %c0_60 = arith.constant 0 : index
    %55 = vector.load %arg6[%c2_58, %c0_59, %c0_60] : memref<4x1x8xf32, #tpu.memory_space<vmem>>, vector<1x1x8xf32>
    %56 = vector.shape_cast %55 : vector<1x1x8xf32> to vector<1x8xf32>
    %57 = vector.broadcast %56 : vector<1x8xf32> to vector<128x8xf32>
    %58 = arith.addf %54, %57 : vector<128x8xf32>
    %c0_61 = arith.constant 0 : index
    %c2_62 = arith.constant 2 : index
    %c0_63 = arith.constant 0 : index
    %c0_64 = arith.constant 0 : index
    %59 = vector.load %arg8[%c0_61, %c2_62, %c0_63, %c0_64] : memref<1x4x128x8xf32, #tpu.memory_space<vmem>>, vector<1x1x128x8xf32>
    %60 = vector.shape_cast %59 : vector<1x1x128x8xf32> to vector<128x8xf32>
    %61 = vector.shape_cast %58 : vector<128x8xf32> to vector<1x1x128x8xf32>
    tpu.vector_store %arg8[%c0_61, %c2_62, %c0_63, %c0_64], %61 {strides = array<i32>} : memref<1x4x128x8xf32, #tpu.memory_space<vmem>>, vector<1x1x128x8xf32>,
    %c3 = arith.constant 3 : index
    %c0_65 = arith.constant 0 : index
    %c0_66 = arith.constant 0 : index
    %62 = vector.load %arg3[%c3, %c0_65, %c0_66] : memref<4x32x8xf32, #tpu.memory_space<vmem>>, vector<1x32x8xf32>
    %63 = vector.shape_cast %62 : vector<1x32x8xf32> to vector<32x8xf32>
    %cst_67 = arith.constant dense<0.000000e+00> : vector<128x8xf32>
    %64 = tpu.matmul %1, %63, %cst_67 {dimension_numbers = #tpu.dot_dimension_numbers<[1], [0], [0], [1], [0, 0, 1, 1], [], []>} : vector<128x32xf32>, vector<32x8xf32>, vector<128x8xf32> -> vector<128x8xf32>
    %c3_68 = arith.constant 3 : index
    %c0_69 = arith.constant 0 : index
    %c0_70 = arith.constant 0 : index
    %65 = vector.load %arg4[%c3_68, %c0_69, %c0_70] : memref<4x1x8xf32, #tpu.memory_space<vmem>>, vector<1x1x8xf32>
    %66 = vector.shape_cast %65 : vector<1x1x8xf32> to vector<1x8xf32>
    %67 = vector.broadcast %66 : vector<1x8xf32> to vector<128x8xf32>
    %68 = arith.addf %64, %67 : vector<128x8xf32>
    %c0_71 = arith.constant 0 : index
    %c3_72 = arith.constant 3 : index
    %c0_73 = arith.constant 0 : index
    %c0_74 = arith.constant 0 : index
    %69 = vector.load %arg7[%c0_71, %c3_72, %c0_73, %c0_74] : memref<1x4x128x8xf32, #tpu.memory_space<vmem>>, vector<1x1x128x8xf32>
    %70 = vector.shape_cast %69 : vector<1x1x128x8xf32> to vector<128x8xf32>
    %71 = vector.shape_cast %68 : vector<128x8xf32> to vector<1x1x128x8xf32>
    tpu.vector_store %arg7[%c0_71, %c3_72, %c0_73, %c0_74], %71 {strides = array<i32>} : memref<1x4x128x8xf32, #tpu.memory_space<vmem>>, vector<1x1x128x8xf32>,
    %c3_75 = arith.constant 3 : index
    %c0_76 = arith.constant 0 : index
    %c0_77 = arith.constant 0 : index
    %72 = vector.load %arg5[%c3_75, %c0_76, %c0_77] : memref<4x32x8xf32, #tpu.memory_space<vmem>>, vector<1x32x8xf32>
    %73 = vector.shape_cast %72 : vector<1x32x8xf32> to vector<32x8xf32>
    %cst_78 = arith.constant dense<0.000000e+00> : vector<128x8xf32>
    %74 = tpu.matmul %1, %73, %cst_78 {dimension_numbers = #tpu.dot_dimension_numbers<[1], [0], [0], [1], [0, 0, 1, 1], [], []>} : vector<128x32xf32>, vector<32x8xf32>, vector<128x8xf32> -> vector<128x8xf32>
    %c3_79 = arith.constant 3 : index
    %c0_80 = arith.constant 0 : index
    %c0_81 = arith.constant 0 : index
    %75 = vector.load %arg6[%c3_79, %c0_80, %c0_81] : memref<4x1x8xf32, #tpu.memory_space<vmem>>, vector<1x1x8xf32>
    %76 = vector.shape_cast %75 : vector<1x1x8xf32> to vector<1x8xf32>
    %77 = vector.broadcast %76 : vector<1x8xf32> to vector<128x8xf32>
    %78 = arith.addf %74, %77 : vector<128x8xf32>
    %c0_82 = arith.constant 0 : index
    %c3_83 = arith.constant 3 : index
    %c0_84 = arith.constant 0 : index
    %c0_85 = arith.constant 0 : index
    %79 = vector.load %arg8[%c0_82, %c3_83, %c0_84, %c0_85] : memref<1x4x128x8xf32, #tpu.memory_space<vmem>>, vector<1x1x128x8xf32>
    %80 = vector.shape_cast %79 : vector<1x1x128x8xf32> to vector<128x8xf32>
    %81 = vector.shape_cast %78 : vector<128x8xf32> to vector<1x1x128x8xf32>
    tpu.vector_store %arg8[%c0_82, %c3_83, %c0_84, %c0_85], %81 {strides = array<i32>} : memref<1x4x128x8xf32, #tpu.memory_space<vmem>>, vector<1x1x128x8xf32>,
    return
  }
  func.func @transform_0(%arg0: i32, %arg1: i32) -> (i32, i32, i32) {
    %c0_i32 = arith.constant 0 : i32
    %c0_i32_0 = arith.constant 0 : i32
    return %arg0, %arg1, %c0_i32 : i32, i32, i32
  }
  func.func @transform_1(%arg0: i32, %arg1: i32) -> (i32, i32, i32) {
    %c0_i32 = arith.constant 0 : i32
    %c0_i32_0 = arith.constant 0 : i32
    %c0_i32_1 = arith.constant 0 : i32
    %c0_i32_2 = arith.constant 0 : i32
    return %c0_i32, %c0_i32_0, %c0_i32_1 : i32, i32, i32
  }
  func.func @transform_2(%arg0: i32, %arg1: i32) -> (i32, i32, i32) {
    %c0_i32 = arith.constant 0 : i32
    %c0_i32_0 = arith.constant 0 : i32
    %c0_i32_1 = arith.constant 0 : i32
    %c0_i32_2 = arith.constant 0 : i32
    return %c0_i32, %c0_i32_0, %c0_i32_1 : i32, i32, i32
  }
  func.func @transform_3(%arg0: i32, %arg1: i32) -> (i32, i32, i32) {
    %c0_i32 = arith.constant 0 : i32
    %c0_i32_0 = arith.constant 0 : i32
    %c0_i32_1 = arith.constant 0 : i32
    %c0_i32_2 = arith.constant 0 : i32
    return %c0_i32, %c0_i32_0, %c0_i32_1 : i32, i32, i32
  }
  func.func @transform_4(%arg0: i32, %arg1: i32) -> (i32, i32, i32) {
    %c0_i32 = arith.constant 0 : i32
    %c0_i32_0 = arith.constant 0 : i32
    %c0_i32_1 = arith.constant 0 : i32
    %c0_i32_2 = arith.constant 0 : i32
    return %c0_i32, %c0_i32_0, %c0_i32_1 : i32, i32, i32
  }
  func.func @transform_5(%arg0: i32, %arg1: i32) -> (i32, i32, i32, i32) {
    %c0_i32 = arith.constant 0 : i32
    %c0_i32_0 = arith.constant 0 : i32
    %c0_i32_1 = arith.constant 0 : i32
    return %arg0, %c0_i32, %arg1, %c0_i32_0 : i32, i32, i32, i32
  }
  func.func @transform_6(%arg0: i32, %arg1: i32) -> (i32, i32, i32, i32) {
    %c0_i32 = arith.constant 0 : i32
    %c0_i32_0 = arith.constant 0 : i32
    %c0_i32_1 = arith.constant 0 : i32
    return %arg0, %c0_i32, %arg1, %c0_i32_0 : i32, i32, i32, i32
  }
}

module attributes {stable_mosaic.version = 11 : i64} {
  func.func @kv_proj_kernel(%arg0: i32, %arg1: i32, %arg2: memref<1x128x32xf32, #tpu.memory_space<vmem>>, %arg3: memref<4x32x8xf32, #tpu.memory_space<vmem>>, %arg4: memref<4x1x8xf32, #tpu.memory_space<vmem>>, %arg5: memref<4x32x8xf32, #tpu.memory_space<vmem>>, %arg6: memref<4x1x8xf32, #tpu.memory_space<vmem>>, %arg7: memref<1x4x128x8xf32, #tpu.memory_space<vmem>>, %arg8: memref<1x4x128x8xf32, #tpu.memory_space<vmem>>) attributes {dimension_semantics = [#tpu.dimension_semantics<parallel>, #tpu.dimension_semantics<parallel>], iteration_bounds = array<i64: 2, 1>, scalar_prefetch = 0 : i64, scratch_operands = 0 : i64, tpu.core_type = #tpu.core_type<tc>, window_params = [{transform_indices = @transform_0, window_bounds = array<i64: 1, 128, 32>}, {pipeline_mode = #tpu.pipeline_mode<synchronous>, transform_indices = @transform_1, window_bounds = array<i64: 4, 32, 8>}, {pipeline_mode = #tpu.pipeline_mode<synchronous>, transform_indices = @transform_2, window_bounds = array<i64: 4, 1, 8>}, {pipeline_mode = #tpu.pipeline_mode<synchronous>, transform_indices = @transform_3, window_bounds = array<i64: 4, 32, 8>}, {pipeline_mode = #tpu.pipeline_mode<synchronous>, transform_indices = @transform_4, window_bounds = array<i64: 4, 1, 8>}, {transform_indices = @transform_5, window_bounds = array<i64: 1, 4, 128, 8>}, {transform_indices = @transform_6, window_bounds = array<i64: 1, 4, 128, 8>}]} {
    %c0 = arith.constant 0 : index
    %c0_0 = arith.constant 0 : index
    %c0_1 = arith.constant 0 : index
    %0 = vector.load %arg2[%c0, %c0_0, %c0_1] : memref<1x128x32xf32, #tpu.memory_space<vmem>>, vector<1x128x32xf32>
    %1 = vector.shape_cast %0 : vector<1x128x32xf32> to vector<128x32xf32>
    %c0_2 = arith.constant 0 : index
    %c0_3 = arith.constant 0 : index
    %c0_4 = arith.constant 0 : index
    %2 = vector.load %arg3[%c0_2, %c0_3, %c0_4] : memref<4x32x8xf32, #tpu.memory_space<vmem>>, vector<1x32x8xf32>
    %3 = vector.shape_cast %2 : vector<1x32x8xf32> to vector<32x8xf32>
    %cst = arith.constant dense<0.000000e+00> : vector<128x8xf32>
    %4 = tpu.matmul %1, %3, %cst {dimension_numbers = #tpu.dot_dimension_numbers<[1], [0], [0], [1], [0, 0, 1, 1], [], []>} : vector<128x32xf32>, vector<32x8xf32>, vector<128x8xf32> -> vector<128x8xf32>
    %c0_5 = arith.constant 0 : index
    %c0_6 = arith.constant 0 : index
    %c0_7 = arith.constant 0 : index
    %5 = vector.load %arg4[%c0_5, %c0_6, %c0_7] : memref<4x1x8xf32, #tpu.memory_space<vmem>>, vector<1x1x8xf32>
    %6 = vector.shape_cast %5 : vector<1x1x8xf32> to vector<1x8xf32>
    %7 = vector.broadcast %6 : vector<1x8xf32> to vector<128x8xf32>
    %8 = arith.addf %4, %7 : vector<128x8xf32>
    %c0_8 = arith.constant 0 : index
    %c0_9 = arith.constant 0 : index
    %c0_10 = arith.constant 0 : index
    %c0_11 = arith.constant 0 : index
    %9 = vector.load %arg7[%c0_8, %c0_9, %c0_10, %c0_11] : memref<1x4x128x8xf32, #tpu.memory_space<vmem>>, vector<1x1x128x8xf32>
    %10 = vector.shape_cast %9 : vector<1x1x128x8xf32> to vector<128x8xf32>
    %11 = vector.shape_cast %8 : vector<128x8xf32> to vector<1x1x128x8xf32>
    tpu.vector_store %arg7[%c0_8, %c0_9, %c0_10, %c0_11], %11 {strides = array<i32>} : memref<1x4x128x8xf32, #tpu.memory_space<vmem>>, vector<1x1x128x8xf32>,
    %c0_12 = arith.constant 0 : index
    %c0_13 = arith.constant 0 : index
    %c0_14 = arith.constant 0 : index
    %12 = vector.load %arg5[%c0_12, %c0_13, %c0_14] : memref<4x32x8xf32, #tpu.memory_space<vmem>>, vector<1x32x8xf32>
    %13 = vector.shape_cast %12 : vector<1x32x8xf32> to vector<32x8xf32>
    %cst_15 = arith.constant dense<0.000000e+00> : vector<128x8xf32>
    %14 = tpu.matmul %1, %13, %cst_15 {dimension_numbers = #tpu.dot_dimension_numbers<[1], [0], [0], [1], [0, 0, 1, 1], [], []>} : vector<128x32xf32>, vector<32x8xf32>, vector<128x8xf32> -> vector<128x8xf32>
    %c0_16 = arith.constant 0 : index
    %c0_17 = arith.constant 0 : index
    %c0_18 = arith.constant 0 : index
    %15 = vector.load %arg6[%c0_16, %c0_17, %c0_18] : memref<4x1x8xf32, #tpu.memory_space<vmem>>, vector<1x1x8xf32>
    %16 = vector.shape_cast %15 : vector<1x1x8xf32> to vector<1x8xf32>
    %17 = vector.broadcast %16 : vector<1x8xf32> to vector<128x8xf32>
    %18 = arith.addf %14, %17 : vector<128x8xf32>
    %c0_19 = arith.constant 0 : index
    %c0_20 = arith.constant 0 : index
    %c0_21 = arith.constant 0 : index
    %c0_22 = arith.constant 0 : index
    %19 = vector.load %arg8[%c0_19, %c0_20, %c0_21, %c0_22] : memref<1x4x128x8xf32, #tpu.memory_space<vmem>>, vector<1x1x128x8xf32>
    %20 = vector.shape_cast %19 : vector<1x1x128x8xf32> to vector<128x8xf32>
    %21 = vector.shape_cast %18 : vector<128x8xf32> to vector<1x1x128x8xf32>
    tpu.vector_store %arg8[%c0_19, %c0_20, %c0_21, %c0_22], %21 {strides = array<i32>} : memref<1x4x128x8xf32, #tpu.memory_space<vmem>>, vector<1x1x128x8xf32>,
    %c1 = arith.constant 1 : index
    %c0_23 = arith.constant 0 : index
    %c0_24 = arith.constant 0 : index
    %22 = vector.load %arg3[%c1, %c0_23, %c0_24] : memref<4x32x8xf32, #tpu.memory_space<vmem>>, vector<1x32x8xf32>
    %23 = vector.shape_cast %22 : vector<1x32x8xf32> to vector<32x8xf32>
    %cst_25 = arith.constant dense<0.000000e+00> : vector<128x8xf32>
    %24 = tpu.matmul %1, %23, %cst_25 {dimension_numbers = #tpu.dot_dimension_numbers<[1], [0], [0], [1], [0, 0, 1, 1], [], []>} : vector<128x32xf32>, vector<32x8xf32>, vector<128x8xf32> -> vector<128x8xf32>
    %c1_26 = arith.constant 1 : index
    %c0_27 = arith.constant 0 : index
    %c0_28 = arith.constant 0 : index
    %25 = vector.load %arg4[%c1_26, %c0_27, %c0_28] : memref<4x1x8xf32, #tpu.memory_space<vmem>>, vector<1x1x8xf32>
    %26 = vector.shape_cast %25 : vector<1x1x8xf32> to vector<1x8xf32>
    %27 = vector.broadcast %26 : vector<1x8xf32> to vector<128x8xf32>
    %28 = arith.addf %24, %27 : vector<128x8xf32>
    %c0_29 = arith.constant 0 : index
    %c1_30 = arith.constant 1 : index
    %c0_31 = arith.constant 0 : index
    %c0_32 = arith.constant 0 : index
    %29 = vector.load %arg7[%c0_29, %c1_30, %c0_31, %c0_32] : memref<1x4x128x8xf32, #tpu.memory_space<vmem>>, vector<1x1x128x8xf32>
    %30 = vector.shape_cast %29 : vector<1x1x128x8xf32> to vector<128x8xf32>
    %31 = vector.shape_cast %28 : vector<128x8xf32> to vector<1x1x128x8xf32>
    tpu.vector_store %arg7[%c0_29, %c1_30, %c0_31, %c0_32], %31 {strides = array<i32>} : memref<1x4x128x8xf32, #tpu.memory_space<vmem>>, vector<1x1x128x8xf32>,
    %c1_33 = arith.constant 1 : index
    %c0_34 = arith.constant 0 : index
    %c0_35 = arith.constant 0 : index
    %32 = vector.load %arg5[%c1_33, %c0_34, %c0_35] : memref<4x32x8xf32, #tpu.memory_space<vmem>>, vector<1x32x8xf32>
    %33 = vector.shape_cast %32 : vector<1x32x8xf32> to vector<32x8xf32>
    %cst_36 = arith.constant dense<0.000000e+00> : vector<128x8xf32>
    %34 = tpu.matmul %1, %33, %cst_36 {dimension_numbers = #tpu.dot_dimension_numbers<[1], [0], [0], [1], [0, 0, 1, 1], [], []>} : vector<128x32xf32>, vector<32x8xf32>, vector<128x8xf32> -> vector<128x8xf32>
    %c1_37 = arith.constant 1 : index
    %c0_38 = arith.constant 0 : index
    %c0_39 = arith.constant 0 : index
    %35 = vector.load %arg6[%c1_37, %c0_38, %c0_39] : memref<4x1x8xf32, #tpu.memory_space<vmem>>, vector<1x1x8xf32>
    %36 = vector.shape_cast %35 : vector<1x1x8xf32> to vector<1x8xf32>
    %37 = vector.broadcast %36 : vector<1x8xf32> to vector<128x8xf32>
    %38 = arith.addf %34, %37 : vector<128x8xf32>
    %c0_40 = arith.constant 0 : index
    %c1_41 = arith.constant 1 : index
    %c0_42 = arith.constant 0 : index
    %c0_43 = arith.constant 0 : index
    %39 = vector.load %arg8[%c0_40, %c1_41, %c0_42, %c0_43] : memref<1x4x128x8xf32, #tpu.memory_space<vmem>>, vector<1x1x128x8xf32>
    %40 = vector.shape_cast %39 : vector<1x1x128x8xf32> to vector<128x8xf32>
    %41 = vector.shape_cast %38 : vector<128x8xf32> to vector<1x1x128x8xf32>
    tpu.vector_store %arg8[%c0_40, %c1_41, %c0_42, %c0_43], %41 {strides = array<i32>} : memref<1x4x128x8xf32, #tpu.memory_space<vmem>>, vector<1x1x128x8xf32>,
    %c2 = arith.constant 2 : index
    %c0_44 = arith.constant 0 : index
    %c0_45 = arith.constant 0 : index
    %42 = vector.load %arg3[%c2, %c0_44, %c0_45] : memref<4x32x8xf32, #tpu.memory_space<vmem>>, vector<1x32x8xf32>
    %43 = vector.shape_cast %42 : vector<1x32x8xf32> to vector<32x8xf32>
    %cst_46 = arith.constant dense<0.000000e+00> : vector<128x8xf32>
    %44 = tpu.matmul %1, %43, %cst_46 {dimension_numbers = #tpu.dot_dimension_numbers<[1], [0], [0], [1], [0, 0, 1, 1], [], []>} : vector<128x32xf32>, vector<32x8xf32>, vector<128x8xf32> -> vector<128x8xf32>
    %c2_47 = arith.constant 2 : index
    %c0_48 = arith.constant 0 : index
    %c0_49 = arith.constant 0 : index
    %45 = vector.load %arg4[%c2_47, %c0_48, %c0_49] : memref<4x1x8xf32, #tpu.memory_space<vmem>>, vector<1x1x8xf32>
    %46 = vector.shape_cast %45 : vector<1x1x8xf32> to vector<1x8xf32>
    %47 = vector.broadcast %46 : vector<1x8xf32> to vector<128x8xf32>
    %48 = arith.addf %44, %47 : vector<128x8xf32>
    %c0_50 = arith.constant 0 : index
    %c2_51 = arith.constant 2 : index
    %c0_52 = arith.constant 0 : index
    %c0_53 = arith.constant 0 : index
    %49 = vector.load %arg7[%c0_50, %c2_51, %c0_52, %c0_53] : memref<1x4x128x8xf32, #tpu.memory_space<vmem>>, vector<1x1x128x8xf32>
    %50 = vector.shape_cast %49 : vector<1x1x128x8xf32> to vector<128x8xf32>
    %51 = vector.shape_cast %48 : vector<128x8xf32> to vector<1x1x128x8xf32>
    tpu.vector_store %arg7[%c0_50, %c2_51, %c0_52, %c0_53], %51 {strides = array<i32>} : memref<1x4x128x8xf32, #tpu.memory_space<vmem>>, vector<1x1x128x8xf32>,
    %c2_54 = arith.constant 2 : index
    %c0_55 = arith.constant 0 : index
    %c0_56 = arith.constant 0 : index
    %52 = vector.load %arg5[%c2_54, %c0_55, %c0_56] : memref<4x32x8xf32, #tpu.memory_space<vmem>>, vector<1x32x8xf32>
    %53 = vector.shape_cast %52 : vector<1x32x8xf32> to vector<32x8xf32>
    %cst_57 = arith.constant dense<0.000000e+00> : vector<128x8xf32>
    %54 = tpu.matmul %1, %53, %cst_57 {dimension_numbers = #tpu.dot_dimension_numbers<[1], [0], [0], [1], [0, 0, 1, 1], [], []>} : vector<128x32xf32>, vector<32x8xf32>, vector<128x8xf32> -> vector<128x8xf32>
    %c2_58 = arith.constant 2 : index
    %c0_59 = arith.constant 0 : index
    %c0_60 = arith.constant 0 : index
    %55 = vector.load %arg6[%c2_58, %c0_59, %c0_60] : memref<4x1x8xf32, #tpu.memory_space<vmem>>, vector<1x1x8xf32>
    %56 = vector.shape_cast %55 : vector<1x1x8xf32> to vector<1x8xf32>
    %57 = vector.broadcast %56 : vector<1x8xf32> to vector<128x8xf32>
    %58 = arith.addf %54, %57 : vector<128x8xf32>
    %c0_61 = arith.constant 0 : index
    %c2_62 = arith.constant 2 : index
    %c0_63 = arith.constant 0 : index
    %c0_64 = arith.constant 0 : index
    %59 = vector.load %arg8[%c0_61, %c2_62, %c0_63, %c0_64] : memref<1x4x128x8xf32, #tpu.memory_space<vmem>>, vector<1x1x128x8xf32>
    %60 = vector.shape_cast %59 : vector<1x1x128x8xf32> to vector<128x8xf32>
    %61 = vector.shape_cast %58 : vector<128x8xf32> to vector<1x1x128x8xf32>
    tpu.vector_store %arg8[%c0_61, %c2_62, %c0_63, %c0_64], %61 {strides = array<i32>} : memref<1x4x128x8xf32, #tpu.memory_space<vmem>>, vector<1x1x128x8xf32>,
    %c3 = arith.constant 3 : index
    %c0_65 = arith.constant 0 : index
    %c0_66 = arith.constant 0 : index
    %62 = vector.load %arg3[%c3, %c0_65, %c0_66] : memref<4x32x8xf32, #tpu.memory_space<vmem>>, vector<1x32x8xf32>
    %63 = vector.shape_cast %62 : vector<1x32x8xf32> to vector<32x8xf32>
    %cst_67 = arith.constant dense<0.000000e+00> : vector<128x8xf32>
    %64 = tpu.matmul %1, %63, %cst_67 {dimension_numbers = #tpu.dot_dimension_numbers<[1], [0], [0], [1], [0, 0, 1, 1], [], []>} : vector<128x32xf32>, vector<32x8xf32>, vector<128x8xf32> -> vector<128x8xf32>
    %c3_68 = arith.constant 3 : index
    %c0_69 = arith.constant 0 : index
    %c0_70 = arith.constant 0 : index
    %65 = vector.load %arg4[%c3_68, %c0_69, %c0_70] : memref<4x1x8xf32, #tpu.memory_space<vmem>>, vector<1x1x8xf32>
    %66 = vector.shape_cast %65 : vector<1x1x8xf32> to vector<1x8xf32>
    %67 = vector.broadcast %66 : vector<1x8xf32> to vector<128x8xf32>
    %68 = arith.addf %64, %67 : vector<128x8xf32>
    %c0_71 = arith.constant 0 : index
    %c3_72 = arith.constant 3 : index
    %c0_73 = arith.constant 0 : index
    %c0_74 = arith.constant 0 : index
    %69 = vector.load %arg7[%c0_71, %c3_72, %c0_73, %c0_74] : memref<1x4x128x8xf32, #tpu.memory_space<vmem>>, vector<1x1x128x8xf32>
    %70 = vector.shape_cast %69 : vector<1x1x128x8xf32> to vector<128x8xf32>
    %71 = vector.shape_cast %68 : vector<128x8xf32> to vector<1x1x128x8xf32>
    tpu.vector_store %arg7[%c0_71, %c3_72, %c0_73, %c0_74], %71 {strides = array<i32>} : memref<1x4x128x8xf32, #tpu.memory_space<vmem>>, vector<1x1x128x8xf32>,
    %c3_75 = arith.constant 3 : index
    %c0_76 = arith.constant 0 : index
    %c0_77 = arith.constant 0 : index
    %72 = vector.load %arg5[%c3_75, %c0_76, %c0_77] : memref<4x32x8xf32, #tpu.memory_space<vmem>>, vector<1x32x8xf32>
    %73 = vector.shape_cast %72 : vector<1x32x8xf32> to vector<32x8xf32>
    %cst_78 = arith.constant dense<0.000000e+00> : vector<128x8xf32>
    %74 = tpu.matmul %1, %73, %cst_78 {dimension_numbers = #tpu.dot_dimension_numbers<[1], [0], [0], [1], [0, 0, 1, 1], [], []>} : vector<128x32xf32>, vector<32x8xf32>, vector<128x8xf32> -> vector<128x8xf32>
    %c3_79 = arith.constant 3 : index
    %c0_80 = arith.constant 0 : index
    %c0_81 = arith.constant 0 : index
    %75 = vector.load %arg6[%c3_79, %c0_80, %c0_81] : memref<4x1x8xf32, #tpu.memory_space<vmem>>, vector<1x1x8xf32>
    %76 = vector.shape_cast %75 : vector<1x1x8xf32> to vector<1x8xf32>
    %77 = vector.broadcast %76 : vector<1x8xf32> to vector<128x8xf32>
    %78 = arith.addf %74, %77 : vector<128x8xf32>
    %c0_82 = arith.constant 0 : index
    %c3_83 = arith.constant 3 : index
    %c0_84 = arith.constant 0 : index
    %c0_85 = arith.constant 0 : index
    %79 = vector.load %arg8[%c0_82, %c3_83, %c0_84, %c0_85] : memref<1x4x128x8xf32, #tpu.memory_space<vmem>>, vector<1x1x128x8xf32>
    %80 = vector.shape_cast %79 : vector<1x1x128x8xf32> to vector<128x8xf32>
    %81 = vector.shape_cast %78 : vector<128x8xf32> to vector<1x1x128x8xf32>
    tpu.vector_store %arg8[%c0_82, %c3_83, %c0_84, %c0_85], %81 {strides = array<i32>} : memref<1x4x128x8xf32, #tpu.memory_space<vmem>>, vector<1x1x128x8xf32>,
    return
  }
  func.func @transform_0(%arg0: i32, %arg1: i32) -> (i32, i32, i32) {
    %c0_i32 = arith.constant 0 : i32
    %c0_i32_0 = arith.constant 0 : i32
    return %arg0, %arg1, %c0_i32 : i32, i32, i32
  }
  func.func @transform_1(%arg0: i32, %arg1: i32) -> (i32, i32, i32) {
    %c0_i32 = arith.constant 0 : i32
    %c0_i32_0 = arith.constant 0 : i32
    %c0_i32_1 = arith.constant 0 : i32
    %c0_i32_2 = arith.constant 0 : i32
    return %c0_i32, %c0_i32_0, %c0_i32_1 : i32, i32, i32
  }
  func.func @transform_2(%arg0: i32, %arg1: i32) -> (i32, i32, i32) {
    %c0_i32 = arith.constant 0 : i32
    %c0_i32_0 = arith.constant 0 : i32
    %c0_i32_1 = arith.constant 0 : i32
    %c0_i32_2 = arith.constant 0 : i32
    return %c0_i32, %c0_i32_0, %c0_i32_1 : i32, i32, i32
  }
  func.func @transform_3(%arg0: i32, %arg1: i32) -> (i32, i32, i32) {
    %c0_i32 = arith.constant 0 : i32
    %c0_i32_0 = arith.constant 0 : i32
    %c0_i32_1 = arith.constant 0 : i32
    %c0_i32_2 = arith.constant 0 : i32
    return %c0_i32, %c0_i32_0, %c0_i32_1 : i32, i32, i32
  }
  func.func @transform_4(%arg0: i32, %arg1: i32) -> (i32, i32, i32) {
    %c0_i32 = arith.constant 0 : i32
    %c0_i32_0 = arith.constant 0 : i32
    %c0_i32_1 = arith.constant 0 : i32
    %c0_i32_2 = arith.constant 0 : i32
    return %c0_i32, %c0_i32_0, %c0_i32_1 : i32, i32, i32
  }
  func.func @transform_5(%arg0: i32, %arg1: i32) -> (i32, i32, i32, i32) {
    %c0_i32 = arith.constant 0 : i32
    %c0_i32_0 = arith.constant 0 : i32
    %c0_i32_1 = arith.constant 0 : i32
    return %arg0, %c0_i32, %arg1, %c0_i32_0 : i32, i32, i32, i32
  }
  func.func @transform_6(%arg0: i32, %arg1: i32) -> (i32, i32, i32, i32) {
    %c0_i32 = arith.constant 0 : i32
    %c0_i32_0 = arith.constant 0 : i32
    %c0_i32_1 = arith.constant 0 : i32
    return %arg0, %c0_i32, %arg1, %c0_i32_0 : i32, i32, i32, i32
  }
}

</mosaic_0001>

<bundles_post_ra>
// kernel: tpu_custom_call.1
= control target key start
LH: loop header
LB: loop body
LE: loop exit
PB: predicated region body
PF: predicated region fallthrough
CT: control target
= control target key end

     0   :  { %s2689_s21 = smov 0   ;;  %s2691_s22 = smov 0   ;;  %s3559_s0 = inlined_call_operand.vmem [shape: f32[2,128,32], index: 0, kind: input, shape index: {}]   ;;  %s3560_s1 = inlined_call_operand.vmem [shape: f32[4,32,8], index: 1, kind: input, shape index: {}]   ;;  %s3561_s2 = inlined_call_operand.vmem [shape: f32[4,1,8], index: 2, kind: input, shape index: {}]   ;;  %s3562_s3 = inlined_call_operand.vmem [shape: f32[4,32,8], index: 3, kind: input, shape index: {}]   ;;  %s3563_s4 = inlined_call_operand.vmem [shape: f32[4,1,8], index: 4, kind: input, shape index: {}]   ;;  %s3564_s5 = inlined_call_operand.vmem [shape: f32[2,4,128,8], index: 5, kind: output, shape index: {0}]   ;;  %s3565_s6 = inlined_call_operand.vmem [shape: f32[2,4,128,8], index: 6, kind: output, shape index: {1}]  }
   0x1   :  { %s2693_s23 = smov 0  }
   0x2 LB: > { %s29_s24 = sadd.s32 1, %s2648_s22  ;;  %p1916_p0 = scmp.ge.s32.totalorder %s2652_s23, 1  ;;  %s2652_s23 = sphi %s2693_s23, %s17_s23   ;;  %s2648_s22 = sphi %s2691_s22, %s3567_s22   ;;  %s2644_s21 = sphi %s2689_s21, %s3566_s21  }
   0x3   : > { %p31_p1 = scmp.ge.s32.totalorder %s29_s24, 2  ;;  %p238_p2 = scmp.lt.s32.totalorder %s2652_s23, 3 }
   0x5   : > { %s3569_s24 = smov (%p31_p1, %s29_s24), 0  ;;  %p239_p3 = pnand %p1916_p0, %p238_p2 }
   0x6   : > { %p286_p4 = scmp.lt.s32.totalorder (!%p239_p3), %s2644_s21, 1 }
   0x7   : > { %242 = sbr.rel (%p239_p3) target bundleno = 345 (0x159), region = 40 }
   0xc   : > { %v334_v0 = vld [vmem:[%s3560_s1 + $0x18] sm:$0xff]  ;;  %v333_v2 = vld [vmem:[%s3560_s1 + $0x10] sm:$0xff]  ;;  %v332_v4 = vld [vmem:[%s3560_s1 + $0x8] sm:$0xff]  ;;  %s3571_s21 = smov (!%p286_p4, %s2644_s21), 1  ;;  %vm342_vm0 = vcmask 261120   ;;  %vm536_vm1 = vcmask 64512  }
   0xd   : > { %v556_v1 = vld [vmem:[%s3562_s3 + $0x18] sm:$0xff]  ;;  %2350 = vmatprep.subr.mxu0 %v334_v0  ;;  %v555_v3 = vld [vmem:[%s3562_s3 + $0x10] sm:$0xff]  ;;  %v554_v5 = vld [vmem:[%s3562_s3 + $0x8] sm:$0xff]  ;;  %s2187_s17 = sshll.u32 %s3571_s21, 7  ;;  %s2188_s9 = sshll.u32 %s3571_s21, 9 }
   0xe   : > { %2382 = vmatprep.subr.mxu1 %v556_v1  ;;  %2351 = vmatpush3.msra.mxu0 %v334_v0  ;;  %v331_v6 = vld [vmem:[%s3560_s1] sm:$0xff]  ;;  %s2737_s20 = scalar_lea.vmem %s3559_s0, %s2187_s17  ;;  %v1960_v10 = vld [vmem:[%s3560_s1 + $0x38] sm:$0xff]  ;;  %v1959_v15 = vld [vmem:[%s3560_s1 + $0x30] sm:$0xff]  ;;  %s3129_s16 = scalar_lea.vmem %s3564_s5, %s2188_s9 }
   0xf   : > { %2383 = vmatpush3.msra.mxu1 %v556_v1  ;;  %2352 = vmatprep.subr.mxu0 %v333_v2  ;;  %v553_v7 = vld [vmem:[%s3562_s3] sm:$0xff]  ;;  %v2743_v9 = vld [vmem:[%s2737_s20 + $0x8] sm:$0xff]  ;;  %v1998_v11 = vld [vmem:[%s3562_s3 + $0x38] sm:$0xff]  ;;  %s3134_s18 = scalar_lea.vmem %s3565_s6, %s2188_s9 }
  0x10   : > { %2384 = vmatprep.subr.mxu1 %v555_v3  ;;  %2353 = vmatpush3.msra.mxu0 %v333_v2  ;;  %v2740_v8 = vld [vmem:[%s2737_s20] sm:$0xff]  ;;  %v2760_v12 = vld [vmem:[%s2737_s20 + $0x10] sm:$0xff]  ;;  %v2763_v13 = vld [vmem:[%s2737_s20 + $0x18] sm:$0xff] }
  0x11   : > { %2385 = vmatpush3.msra.mxu1 %v555_v3  ;;  %2354 = vmatprep.subr.mxu0 %v332_v4  ;;  %v2766_v14 = vld [vmem:[%s2737_s20 + $0x20] sm:$0xff]  ;;  %v1997_v16 = vld [vmem:[%s3562_s3 + $0x30] sm:$0xff]  ;;  %v2787_v17 = vld [vmem:[%s2737_s20 + $0x28] sm:$0xff] }
  0x12   : > { %2386 = vmatprep.subr.mxu1 %v554_v5  ;;  %2355 = vmatpush3.msra.mxu0 %v332_v4  ;;  %v2790_v18 = vld [vmem:[%s2737_s20 + $0x30] sm:$0xff]  ;;  %v1958_v19 = vld [vmem:[%s3560_s1 + $0x28] sm:$0xff]  ;;  %v2807_v21 = vld [vmem:[%s2737_s20 + $0x38] sm:$0xff] }
  0x13   : > { %2387 = vmatpush3.msra.mxu1 %v554_v5  ;;  %2356 = vmatprep.subr.mxu0 %v331_v6  ;;  %v1996_v20 = vld [vmem:[%s3562_s3 + $0x28] sm:$0xff]  ;;  %v2810_v22 = vld [vmem:[%s2737_s20 + $0x40] sm:$0xff]  ;;  %v2830_v26 = vld [vmem:[%s2737_s20 + $0x50] sm:$0xff] }
  0x14   : > { %2388 = vmatprep.subr.mxu1 %v553_v7  ;;  %2357 = vmatpush3.msra.mxu0 %v331_v6  ;;  %v1957_v23 = vld [vmem:[%s3560_s1 + $0x20] sm:$0xff]  ;;  %v2827_v25 = vld [vmem:[%s2737_s20 + $0x48] sm:$0xff]  ;;  %v2036_v27 = vld [vmem:[%s3560_s1 + $0x58] sm:$0xff] }
  0x15   : > { %2358 = vmatprep.mubr.msk.f32.mxu0 %vm342_vm0, %v2740_v8  ;;  %2389 = vmatpush3.msra.mxu1 %v553_v7  ;;  %v1995_v24 = vld [vmem:[%s3562_s3 + $0x20] sm:$0xff]  ;;  %v2074_v28 = vld [vmem:[%s3562_s3 + $0x58] sm:$0xff]  ;;  %v2861_v31 = vld [vmem:[%s2737_s20 + $0x68] sm:$0xff] }
  0x16   : > { %2390 = vmatprep.mubr.msk.f32.mxu1 %vm342_vm0, %v2740_v8  ;;  %2359 = vmatmul.mubr.msk.f32.vlgmr.msra.gmra.mxu0 %vm342_vm0, %v2743_v9  ;;  %v2847_v29 = vld [vmem:[%s2737_s20 + $0x58] sm:$0xff]  ;;  %v2850_v30 = vld [vmem:[%s2737_s20 + $0x60] sm:$0xff]  ;;  %v2864_v32 = vld [vmem:[%s2737_s20 + $0x70] sm:$0xff] }
  0x17   : > { %2391 = vmatmul.mubr.msk.f32.vlgmr.msra.gmra.mxu1 %vm342_vm0, %v2743_v9  ;;  %2414 = vmatprep.subr.mxu0 %v1960_v10  ;;  %v2875_v33 = vld [vmem:[%s2737_s20 + $0x78] sm:$0xff]  ;;  %v2035_v34 = vld [vmem:[%s3560_s1 + $0x50] sm:$0xff]  ;;  %v2034_v36 = vld [vmem:[%s3560_s1 + $0x48] sm:$0xff] }
  0x18   : > { %2446 = vmatprep.subr.mxu1 %v1998_v11  ;;  %2415 = vmatpush3.msra.mxu0 %v1960_v10  ;;  %v2073_v35 = vld [vmem:[%s3562_s3 + $0x50] sm:$0xff]  ;;  %v2072_v37 = vld [vmem:[%s3562_s3 + $0x48] sm:$0xff]  ;;  %v2033_v38 = vld [vmem:[%s3560_s1 + $0x40] sm:$0xff] }
  0x19   : > { %2447 = vmatpush3.msra.mxu1 %v1998_v11  ;;  %2361 = vmatprep.mubr.msk.f32.mxu0 %vm342_vm0, %v2760_v12  ;;  %v2071_v39 = vld [vmem:[%s3562_s3 + $0x40] sm:$0xff]  ;;  %v2112_v40 = vld [vmem:[%s3560_s1 + $0x78] sm:$0xff]  ;;  %v2111_v42 = vld [vmem:[%s3560_s1 + $0x70] sm:$0xff] }
  0x1a   : > { %2393 = vmatprep.mubr.msk.f32.mxu1 %vm342_vm0, %v2760_v12  ;;  %2362 = vmatmul.mubr.msk.f32.gmra.mxu0 %vm342_vm0, %v2763_v13  ;;  %v2150_v41 = vld [vmem:[%s3562_s3 + $0x78] sm:$0xff]  ;;  %v2149_v43 = vld [vmem:[%s3562_s3 + $0x70] sm:$0xff]  ;;  %v2110_v44 = vld [vmem:[%s3560_s1 + $0x68] sm:$0xff] }
  0x1b   : > { %2394 = vmatmul.mubr.msk.f32.gmra.mxu1 %vm342_vm0, %v2763_v13  ;;  %2364 = vmatprep.mubr.msk.f32.mxu0 %vm342_vm0, %v2766_v14  ;;  %v2148_v45 = vld [vmem:[%s3562_s3 + $0x68] sm:$0xff]  ;;  %v2109_v46 = vld [vmem:[%s3560_s1 + $0x60] sm:$0xff] }
  0x1c   : > { %2396 = vmatprep.mubr.msk.f32.mxu1 %vm342_vm0, %v2766_v14  ;;  %2416 = vmatprep.subr.mxu0 %v1959_v15  ;;  %v2147_v47 = vld [vmem:[%s3562_s3 + $0x60] sm:$0xff] }
  0x1d   : > { %2448 = vmatprep.subr.mxu1 %v1997_v16  ;;  %2417 = vmatpush3.msra.mxu0 %v1959_v15  ;;  %v3119_v48 = vld [vmem:[%s3561_s2] ss:$0 sm:$0xff] }
  0x1e   : > { %2449 = vmatpush3.msra.mxu1 %v1997_v16  ;;  %2365 = vmatmul.mubr.msk.f32.gmra.mxu0 %vm342_vm0, %v2787_v17  ;;  %v3124_v49 = vld [vmem:[%s3563_s4] ss:$0 sm:$0xff] }
  0x1f   : > { %2397 = vmatmul.mubr.msk.f32.gmra.mxu1 %vm342_vm0, %v2787_v17  ;;  %2367 = vmatprep.mubr.msk.f32.mxu0 %vm342_vm0, %v2790_v18 }
  0x20   : > { %2399 = vmatprep.mubr.msk.f32.mxu1 %vm342_vm0, %v2790_v18  ;;  %2418 = vmatprep.subr.mxu0 %v1958_v19 }
  0x21   : > { %2450 = vmatprep.subr.mxu1 %v1996_v20  ;;  %2419 = vmatpush3.msra.mxu0 %v1958_v19 }
  0x22   : > { %2451 = vmatpush3.msra.mxu1 %v1996_v20  ;;  %2368 = vmatmul.mubr.msk.f32.gmra.mxu0 %vm342_vm0, %v2807_v21 }
  0x23   : > { %2400 = vmatmul.mubr.msk.f32.gmra.mxu1 %vm342_vm0, %v2807_v21  ;;  %2370 = vmatprep.mubr.msk.f32.mxu0 %vm342_vm0, %v2810_v22 }
  0x24   : > { %2402 = vmatprep.mubr.msk.f32.mxu1 %vm342_vm0, %v2810_v22  ;;  %2420 = vmatprep.subr.mxu0 %v1957_v23 }
  0x25   : > { %2452 = vmatprep.subr.mxu1 %v1995_v24  ;;  %2421 = vmatpush3.msra.mxu0 %v1957_v23 }
  0x26   : > { %2453 = vmatpush3.msra.mxu1 %v1995_v24  ;;  %2371 = vmatmul.mubr.msk.f32.gmra.mxu0 %vm342_vm0, %v2827_v25 }
  0x27   : > { %2403 = vmatmul.mubr.msk.f32.gmra.mxu1 %vm342_vm0, %v2827_v25  ;;  %2373 = vmatprep.mubr.msk.f32.mxu0 %vm342_vm0, %v2830_v26 }
  0x28   : > { %2405 = vmatprep.mubr.msk.f32.mxu1 %vm342_vm0, %v2830_v26  ;;  %2478 = vmatprep.subr.mxu0 %v2036_v27 }
  0x29   : > { %2510 = vmatprep.subr.mxu1 %v2074_v28 }
  0x2a   : > { %2374 = vmatmul.mubr.msk.f32.gmra.mxu0 %vm342_vm0, %v2847_v29 }
  0x2b   : > { %2406 = vmatmul.mubr.msk.f32.gmra.mxu1 %vm342_vm0, %v2847_v29  ;;  %2376 = vmatprep.mubr.msk.f32.mxu0 %vm342_vm0, %v2850_v30 }
  0x2c   : > { %2408 = vmatprep.mubr.msk.f32.mxu1 %vm342_vm0, %v2850_v30 }
  0x2e   : > { %2377 = vmatmul.mubr.msk.f32.gmra.mxu0 %vm342_vm0, %v2861_v31 }
  0x2f   : > { %2409 = vmatmul.mubr.msk.f32.gmra.mxu1 %vm342_vm0, %v2861_v31  ;;  %2379 = vmatprep.mubr.msk.f32.mxu0 %vm342_vm0, %v2864_v32 }
  0x30   : > { %2411 = vmatprep.mubr.msk.f32.mxu1 %vm342_vm0, %v2864_v32 }
  0x32   : > { %2380 = vmatmul.mubr.msk.f32.gmra.mxu0 %vm342_vm0, %v2875_v33 }
  0x33   : > { %2412 = vmatmul.mubr.msk.f32.gmra.mxu1 %vm342_vm0, %v2875_v33  ;;  %2422 = vmatprep.mubr.msk.f32.mxu0 %vm342_vm0, %v2740_v8 }
  0x34   : > { %2454 = vmatprep.mubr.msk.f32.mxu1 %vm342_vm0, %v2740_v8 }
  0x36   : > { %2423 = vmatmul.mubr.msk.f32.vlgmr.msra.gmra.mxu0 %vm342_vm0, %v2743_v9 }
  0x37   : > { %2455 = vmatmul.mubr.msk.f32.vlgmr.msra.gmra.mxu1 %vm342_vm0, %v2743_v9  ;;  %2479 = vmatpush3.msra.mxu0 %v2036_v27 }
  0x38   : > { %2511 = vmatpush3.msra.mxu1 %v2074_v28  ;;  %2425 = vmatprep.mubr.msk.f32.mxu0 %vm342_vm0, %v2760_v12 }
  0x39   : > { %2457 = vmatprep.mubr.msk.f32.mxu1 %vm342_vm0, %v2760_v12  ;;  %2480 = vmatprep.subr.mxu0 %v2035_v34 }
  0x3a   : > { %2512 = vmatprep.subr.mxu1 %v2073_v35  ;;  %2426 = vmatmul.mubr.msk.f32.gmra.mxu0 %vm342_vm0, %v2763_v13 }
  0x3b   : > { %2458 = vmatmul.mubr.msk.f32.gmra.mxu1 %vm342_vm0, %v2763_v13  ;;  %2428 = vmatprep.mubr.msk.f32.mxu0 %vm342_vm0, %v2766_v14 }
  0x3c   : > { %2460 = vmatprep.mubr.msk.f32.mxu1 %vm342_vm0, %v2766_v14  ;;  %2481 = vmatpush3.msra.mxu0 %v2035_v34 }
  0x3d   : > { %2513 = vmatpush3.msra.mxu1 %v2073_v35  ;;  %2482 = vmatprep.subr.mxu0 %v2034_v36 }
  0x3e   : > { %2514 = vmatprep.subr.mxu1 %v2072_v37  ;;  %2429 = vmatmul.mubr.msk.f32.gmra.mxu0 %vm342_vm0, %v2787_v17 }
  0x3f   : > { %2461 = vmatmul.mubr.msk.f32.gmra.mxu1 %vm342_vm0, %v2787_v17  ;;  %2431 = vmatprep.mubr.msk.f32.mxu0 %vm342_vm0, %v2790_v18 }
  0x40   : > { %2463 = vmatprep.mubr.msk.f32.mxu1 %vm342_vm0, %v2790_v18  ;;  %2483 = vmatpush3.msra.mxu0 %v2034_v36 }
  0x41   : > { %2515 = vmatpush3.msra.mxu1 %v2072_v37  ;;  %2484 = vmatprep.subr.mxu0 %v2033_v38 }
  0x42   : > { %2516 = vmatprep.subr.mxu1 %v2071_v39  ;;  %2432 = vmatmul.mubr.msk.f32.gmra.mxu0 %vm342_vm0, %v2807_v21 }
  0x43   : > { %2464 = vmatmul.mubr.msk.f32.gmra.mxu1 %vm342_vm0, %v2807_v21  ;;  %2434 = vmatprep.mubr.msk.f32.mxu0 %vm342_vm0, %v2810_v22 }
  0x44   : > { %2466 = vmatprep.mubr.msk.f32.mxu1 %vm342_vm0, %v2810_v22  ;;  %2485 = vmatpush3.msra.mxu0 %v2033_v38 }
  0x45   : > { %2517 = vmatpush3.msra.mxu1 %v2071_v39  ;;  %2542 = vmatprep.subr.mxu0 %v2112_v40 }
  0x46   : > { %2574 = vmatprep.subr.mxu1 %v2150_v41  ;;  %2435 = vmatmul.mubr.msk.f32.gmra.mxu0 %vm342_vm0, %v2827_v25 }
  0x47   : > { %2467 = vmatmul.mubr.msk.f32.gmra.mxu1 %vm342_vm0, %v2827_v25  ;;  %2437 = vmatprep.mubr.msk.f32.mxu0 %vm342_vm0, %v2830_v26 }
  0x48   : > { %2469 = vmatprep.mubr.msk.f32.mxu1 %vm342_vm0, %v2830_v26 }
  0x4a   : > { %2438 = vmatmul.mubr.msk.f32.gmra.mxu0 %vm342_vm0, %v2847_v29 }
  0x4b   : > { %2470 = vmatmul.mubr.msk.f32.gmra.mxu1 %vm342_vm0, %v2847_v29  ;;  %2440 = vmatprep.mubr.msk.f32.mxu0 %vm342_vm0, %v2850_v30 }
  0x4c   : > { %2472 = vmatprep.mubr.msk.f32.mxu1 %vm342_vm0, %v2850_v30 }
  0x4e   : > { %2441 = vmatmul.mubr.msk.f32.gmra.mxu0 %vm342_vm0, %v2861_v31 }
  0x4f   : > { %2473 = vmatmul.mubr.msk.f32.gmra.mxu1 %vm342_vm0, %v2861_v31  ;;  %2443 = vmatprep.mubr.msk.f32.mxu0 %vm342_vm0, %v2864_v32 }
  0x50   : > { %2475 = vmatprep.mubr.msk.f32.mxu1 %vm342_vm0, %v2864_v32 }
  0x52   : > { %2444 = vmatmul.mubr.msk.f32.gmra.mxu0 %vm342_vm0, %v2875_v33 }
  0x53   : > { %2476 = vmatmul.mubr.msk.f32.gmra.mxu1 %vm342_vm0, %v2875_v33  ;;  %2486 = vmatprep.mubr.msk.f32.mxu0 %vm342_vm0, %v2740_v8 }
  0x54   : > { %2518 = vmatprep.mubr.msk.f32.mxu1 %vm342_vm0, %v2740_v8 }
  0x56   : > { %2487 = vmatmul.mubr.msk.f32.vlgmr.msra.gmra.mxu0 %vm342_vm0, %v2743_v9 }
  0x57   : > { %2519 = vmatmul.mubr.msk.f32.vlgmr.msra.gmra.mxu1 %vm342_vm0, %v2743_v9  ;;  %2543 = vmatpush3.msra.mxu0 %v2112_v40 }
  0x58   : > { %2575 = vmatpush3.msra.mxu1 %v2150_v41  ;;  %2489 = vmatprep.mubr.msk.f32.mxu0 %vm342_vm0, %v2760_v12 }
  0x59   : > { %2521 = vmatprep.mubr.msk.f32.mxu1 %vm342_vm0, %v2760_v12  ;;  %2544 = vmatprep.subr.mxu0 %v2111_v42 }
  0x5a   : > { %2576 = vmatprep.subr.mxu1 %v2149_v43  ;;  %2490 = vmatmul.mubr.msk.f32.gmra.mxu0 %vm342_vm0, %v2763_v13 }
  0x5b   : > { %2522 = vmatmul.mubr.msk.f32.gmra.mxu1 %vm342_vm0, %v2763_v13  ;;  %2492 = vmatprep.mubr.msk.f32.mxu0 %vm342_vm0, %v2766_v14 }
  0x5c   : > { %2524 = vmatprep.mubr.msk.f32.mxu1 %vm342_vm0, %v2766_v14  ;;  %2545 = vmatpush3.msra.mxu0 %v2111_v42 }
  0x5d   : > { %2577 = vmatpush3.msra.mxu1 %v2149_v43  ;;  %2546 = vmatprep.subr.mxu0 %v2110_v44 }
  0x5e   : > { %2578 = vmatprep.subr.mxu1 %v2148_v45  ;;  %2493 = vmatmul.mubr.msk.f32.gmra.mxu0 %vm342_vm0, %v2787_v17 }
  0x5f   : > { %2525 = vmatmul.mubr.msk.f32.gmra.mxu1 %vm342_vm0, %v2787_v17  ;;  %2495 = vmatprep.mubr.msk.f32.mxu0 %vm342_vm0, %v2790_v18 }
  0x60   : > { %2527 = vmatprep.mubr.msk.f32.mxu1 %vm342_vm0, %v2790_v18  ;;  %2547 = vmatpush3.msra.mxu0 %v2110_v44 }
  0x61   : > { %2579 = vmatpush3.msra.mxu1 %v2148_v45  ;;  %2548 = vmatprep.subr.mxu0 %v2109_v46 }
  0x62   : > { %2580 = vmatprep.subr.mxu1 %v2147_v47  ;;  %2496 = vmatmul.mubr.msk.f32.gmra.mxu0 %vm342_vm0, %v2807_v21 }
  0x63   : > { %2528 = vmatmul.mubr.msk.f32.gmra.mxu1 %vm342_vm0, %v2807_v21  ;;  %2498 = vmatprep.mubr.msk.f32.mxu0 %vm342_vm0, %v2810_v22 }
  0x64   : > { %2530 = vmatprep.mubr.msk.f32.mxu1 %vm342_vm0, %v2810_v22  ;;  %2549 = vmatpush3.msra.mxu0 %v2109_v46 }
  0x65   : > { %2581 = vmatpush3.msra.mxu1 %v2147_v47 }
  0x66   : > { %2499 = vmatmul.mubr.msk.f32.gmra.mxu0 %vm342_vm0, %v2827_v25 }
  0x67   : > { %2531 = vmatmul.mubr.msk.f32.gmra.mxu1 %vm342_vm0, %v2827_v25  ;;  %2501 = vmatprep.mubr.msk.f32.mxu0 %vm342_vm0, %v2830_v26 }
  0x68   : > { %2533 = vmatprep.mubr.msk.f32.mxu1 %vm342_vm0, %v2830_v26 }
  0x6a   : > { %2502 = vmatmul.mubr.msk.f32.gmra.mxu0 %vm342_vm0, %v2847_v29 }
  0x6b   : > { %2534 = vmatmul.mubr.msk.f32.gmra.mxu1 %vm342_vm0, %v2847_v29  ;;  %2504 = vmatprep.mubr.msk.f32.mxu0 %vm342_vm0, %v2850_v30 }
  0x6c   : > { %2536 = vmatprep.mubr.msk.f32.mxu1 %vm342_vm0, %v2850_v30 }
  0x6e   : > { %2505 = vmatmul.mubr.msk.f32.gmra.mxu0 %vm342_vm0, %v2861_v31 }
  0x6f   : > { %2537 = vmatmul.mubr.msk.f32.gmra.mxu1 %vm342_vm0, %v2861_v31  ;;  %2507 = vmatprep.mubr.msk.f32.mxu0 %vm342_vm0, %v2864_v32 }
  0x70   : > { %2539 = vmatprep.mubr.msk.f32.mxu1 %vm342_vm0, %v2864_v32 }
  0x72   : > { %2508 = vmatmul.mubr.msk.f32.gmra.mxu0 %vm342_vm0, %v2875_v33 }
  0x73   : > { %2540 = vmatmul.mubr.msk.f32.gmra.mxu1 %vm342_vm0, %v2875_v33  ;;  %2550 = vmatprep.mubr.msk.f32.mxu0 %vm342_vm0, %v2740_v8 }
  0x74   : > { %2582 = vmatprep.mubr.msk.f32.mxu1 %vm342_vm0, %v2740_v8 }
  0x76   : > { %2551 = vmatmul.mubr.msk.f32.vlgmr.msra.gmra.mxu0 %vm342_vm0, %v2743_v9 }
  0x77   : > { %2583 = vmatmul.mubr.msk.f32.vlgmr.msra.gmra.mxu1 %vm342_vm0, %v2743_v9  ;;  %2553 = vmatprep.mubr.msk.f32.mxu0 %vm342_vm0, %v2760_v12 }
  0x78   : > { %2585 = vmatprep.mubr.msk.f32.mxu1 %vm342_vm0, %v2760_v12 }
  0x7a   : > { %2554 = vmatmul.mubr.msk.f32.gmra.mxu0 %vm342_vm0, %v2763_v13 }
  0x7b   : > { %2586 = vmatmul.mubr.msk.f32.gmra.mxu1 %vm342_vm0, %v2763_v13  ;;  %2556 = vmatprep.mubr.msk.f32.mxu0 %vm342_vm0, %v2766_v14 }
  0x7c   : > { %2588 = vmatprep.mubr.msk.f32.mxu1 %vm342_vm0, %v2766_v14 }
  0x7e   : > { %2557 = vmatmul.mubr.msk.f32.gmra.mxu0 %vm342_vm0, %v2787_v17 }
  0x7f   : > { %2589 = vmatmul.mubr.msk.f32.gmra.mxu1 %vm342_vm0, %v2787_v17  ;;  %2559 = vmatprep.mubr.msk.f32.mxu0 %vm342_vm0, %v2790_v18 }
  0x80   : > { %2591 = vmatprep.mubr.msk.f32.mxu1 %vm342_vm0, %v2790_v18 }
  0x82   : > { %2560 = vmatmul.mubr.msk.f32.gmra.mxu0 %vm342_vm0, %v2807_v21 }
  0x83   : > { %2592 = vmatmul.mubr.msk.f32.gmra.mxu1 %vm342_vm0, %v2807_v21  ;;  %2562 = vmatprep.mubr.msk.f32.mxu0 %vm342_vm0, %v2810_v22 }
  0x84   : > { %2594 = vmatprep.mubr.msk.f32.mxu1 %vm342_vm0, %v2810_v22 }
  0x86   : > { %2563 = vmatmul.mubr.msk.f32.gmra.mxu0 %vm342_vm0, %v2827_v25 }
  0x87   : > { %2595 = vmatmul.mubr.msk.f32.gmra.mxu1 %vm342_vm0, %v2827_v25  ;;  %2565 = vmatprep.mubr.msk.f32.mxu0 %vm342_vm0, %v2830_v26 }
  0x88   : > { %2597 = vmatprep.mubr.msk.f32.mxu1 %vm342_vm0, %v2830_v26 }
  0x8a   : > { %2566 = vmatmul.mubr.msk.f32.gmra.mxu0 %vm342_vm0, %v2847_v29 }
  0x8b   : > { %2598 = vmatmul.mubr.msk.f32.gmra.mxu1 %vm342_vm0, %v2847_v29  ;;  %2568 = vmatprep.mubr.msk.f32.mxu0 %vm342_vm0, %v2850_v30 }
  0x8c   : > { %2600 = vmatprep.mubr.msk.f32.mxu1 %vm342_vm0, %v2850_v30 }
  0x8e   : > { %2569 = vmatmul.mubr.msk.f32.gmra.mxu0 %vm342_vm0, %v2861_v31 }
  0x8f   : > { %2601 = vmatmul.mubr.msk.f32.gmra.mxu1 %vm342_vm0, %v2861_v31  ;;  %2571 = vmatprep.mubr.msk.f32.mxu0 %vm342_vm0, %v2864_v32 }
  0x90   : > { %2603 = vmatprep.mubr.msk.f32.mxu1 %vm342_vm0, %v2864_v32 }
  0x92   : > { %2572 = vmatmul.mubr.msk.f32.gmra.mxu0 %vm342_vm0, %v2875_v33 }
  0x93   : > { %2604 = vmatmul.mubr.msk.f32.gmra.mxu1 %vm342_vm0, %v2875_v33 }
  0xd6   : > { %v2360_v50 = vpop.f32.mrf.mxu0 }
  0xd7   : > { %v2392_v51 = vpop.f32.mrf.mxu1  ;;  %v463_v52 = vadd.f32 %v2360_v50, %v3119_v48  ;;  %v3225_v50 = vld [vmem:[%s3561_s2 + $0x1] ss:$0 sm:$0xff] }
  0xd8   : > { %v636_v53 = vadd.f32 %v2392_v51, %v3124_v49  ;;  %v457_v54 = vpop.f32.mrf.mxu0  ;;  %v3230_v51 = vld [vmem:[%s3563_s4 + $0x1] ss:$0 sm:$0xff] }
  0xd9   : > { %v630_v55 = vpop.f32.mrf.mxu1  ;;  %538 = vst.msk [vmem:[%s3129_s16 + $0x8] sm:$0xff] %vm536_vm1, %v463_v52  ;;  %v458_v56 = vadd.f32 %v3119_v48, %v457_v54 }
  0xda   : > { %710 = vst.msk [vmem:[%s3134_s18 + $0x8] sm:$0xff] %vm536_vm1, %v636_v53  ;;  %v631_v57 = vadd.f32 %v3124_v49, %v630_v55  ;;  %v2363_v58 = vpop.f32.mrf.mxu0 }
  0xdb   : > { %v2395_v59 = vpop.f32.mrf.mxu1  ;;  %537 = vst.msk [vmem:[%s3129_s16] sm:$0xff] %vm536_vm1, %v458_v56  ;;  %v473_v60 = vadd.f32 %v2363_v58, %v3119_v48 }
  0xdc   : > { %709 = vst.msk [vmem:[%s3134_s18] sm:$0xff] %vm536_vm1, %v631_v57  ;;  %v646_v61 = vadd.f32 %v2395_v59, %v3124_v49  ;;  %v467_v62 = vpop.f32.mrf.mxu0 }
  0xdd   : > { %v640_v63 = vpop.f32.mrf.mxu1  ;;  %540 = vst.msk [vmem:[%s3129_s16 + $0x18] sm:$0xff] %vm536_vm1, %v473_v60  ;;  %v468_v0 = vadd.f32 %v3119_v48, %v467_v62 }
  0xde   : > { %712 = vst.msk [vmem:[%s3134_s18 + $0x18] sm:$0xff] %vm536_vm1, %v646_v61  ;;  %v641_v1 = vadd.f32 %v3124_v49, %v640_v63  ;;  %v2366_v2 = vpop.f32.mrf.mxu0 }
  0xdf   : > { %v2398_v3 = vpop.f32.mrf.mxu1  ;;  %539 = vst.msk [vmem:[%s3129_s16 + $0x10] sm:$0xff] %vm536_vm1, %v468_v0  ;;  %v483_v4 = vadd.f32 %v2366_v2, %v3119_v48 }
  0xe0   : > { %711 = vst.msk [vmem:[%s3134_s18 + $0x10] sm:$0xff] %vm536_vm1, %v641_v1  ;;  %v656_v5 = vadd.f32 %v2398_v3, %v3124_v49  ;;  %v477_v6 = vpop.f32.mrf.mxu0 }
  0xe1   : > { %v650_v7 = vpop.f32.mrf.mxu1  ;;  %542 = vst.msk [vmem:[%s3129_s16 + $0x28] sm:$0xff] %vm536_vm1, %v483_v4  ;;  %v478_v8 = vadd.f32 %v3119_v48, %v477_v6 }
  0xe2   : > { %714 = vst.msk [vmem:[%s3134_s18 + $0x28] sm:$0xff] %vm536_vm1, %v656_v5  ;;  %v651_v9 = vadd.f32 %v3124_v49, %v650_v7  ;;  %v2369_v10 = vpop.f32.mrf.mxu0 }
  0xe3   : > { %v2401_v11 = vpop.f32.mrf.mxu1  ;;  %541 = vst.msk [vmem:[%s3129_s16 + $0x20] sm:$0xff] %vm536_vm1, %v478_v8  ;;  %v493_v12 = vadd.f32 %v2369_v10, %v3119_v48 }
  0xe4   : > { %713 = vst.msk [vmem:[%s3134_s18 + $0x20] sm:$0xff] %vm536_vm1, %v651_v9  ;;  %v666_v13 = vadd.f32 %v2401_v11, %v3124_v49  ;;  %v487_v14 = vpop.f32.mrf.mxu0 }
  0xe5   : > { %v660_v15 = vpop.f32.mrf.mxu1  ;;  %544 = vst.msk [vmem:[%s3129_s16 + $0x38] sm:$0xff] %vm536_vm1, %v493_v12  ;;  %v488_v16 = vadd.f32 %v3119_v48, %v487_v14 }
  0xe6   : > { %716 = vst.msk [vmem:[%s3134_s18 + $0x38] sm:$0xff] %vm536_vm1, %v666_v13  ;;  %v661_v17 = vadd.f32 %v3124_v49, %v660_v15  ;;  %v2372_v18 = vpop.f32.mrf.mxu0 }
  0xe7   : > { %v2404_v19 = vpop.f32.mrf.mxu1  ;;  %543 = vst.msk [vmem:[%s3129_s16 + $0x30] sm:$0xff] %vm536_vm1, %v488_v16  ;;  %v503_v20 = vadd.f32 %v2372_v18, %v3119_v48 }
  0xe8   : > { %715 = vst.msk [vmem:[%s3134_s18 + $0x30] sm:$0xff] %vm536_vm1, %v661_v17  ;;  %v676_v21 = vadd.f32 %v2404_v19, %v3124_v49  ;;  %v497_v22 = vpop.f32.mrf.mxu0 }
  0xe9   : > { %v670_v23 = vpop.f32.mrf.mxu1  ;;  %546 = vst.msk [vmem:[%s3129_s16 + $0x48] sm:$0xff] %vm536_vm1, %v503_v20  ;;  %v498_v24 = vadd.f32 %v3119_v48, %v497_v22 }
  0xea   : > { %718 = vst.msk [vmem:[%s3134_s18 + $0x48] sm:$0xff] %vm536_vm1, %v676_v21  ;;  %v671_v25 = vadd.f32 %v3124_v49, %v670_v23  ;;  %v2375_v26 = vpop.f32.mrf.mxu0 }
  0xeb   : > { %v2407_v27 = vpop.f32.mrf.mxu1  ;;  %545 = vst.msk [vmem:[%s3129_s16 + $0x40] sm:$0xff] %vm536_vm1, %v498_v24  ;;  %v513_v28 = vadd.f32 %v2375_v26, %v3119_v48 }
  0xec   : > { %717 = vst.msk [vmem:[%s3134_s18 + $0x40] sm:$0xff] %vm536_vm1, %v671_v25  ;;  %v686_v29 = vadd.f32 %v2407_v27, %v3124_v49  ;;  %v507_v30 = vpop.f32.mrf.mxu0 }
  0xed   : > { %v680_v31 = vpop.f32.mrf.mxu1  ;;  %548 = vst.msk [vmem:[%s3129_s16 + $0x58] sm:$0xff] %vm536_vm1, %v513_v28  ;;  %v508_v32 = vadd.f32 %v3119_v48, %v507_v30 }
  0xee   : > { %720 = vst.msk [vmem:[%s3134_s18 + $0x58] sm:$0xff] %vm536_vm1, %v686_v29  ;;  %v681_v33 = vadd.f32 %v3124_v49, %v680_v31  ;;  %v2378_v34 = vpop.f32.mrf.mxu0 }
  0xef   : > { %v2410_v35 = vpop.f32.mrf.mxu1  ;;  %547 = vst.msk [vmem:[%s3129_s16 + $0x50] sm:$0xff] %vm536_vm1, %v508_v32  ;;  %v523_v36 = vadd.f32 %v2378_v34, %v3119_v48 }
  0xf0   : > { %719 = vst.msk [vmem:[%s3134_s18 + $0x50] sm:$0xff] %vm536_vm1, %v681_v33  ;;  %v696_v37 = vadd.f32 %v2410_v35, %v3124_v49  ;;  %v517_v38 = vpop.f32.mrf.mxu0 }
  0xf1   : > { %v690_v39 = vpop.f32.mrf.mxu1  ;;  %550 = vst.msk [vmem:[%s3129_s16 + $0x68] sm:$0xff] %vm536_vm1, %v523_v36  ;;  %v518_v40 = vadd.f32 %v3119_v48, %v517_v38 }
  0xf2   : > { %722 = vst.msk [vmem:[%s3134_s18 + $0x68] sm:$0xff] %vm536_vm1, %v696_v37  ;;  %v691_v41 = vadd.f32 %v3124_v49, %v690_v39  ;;  %v2381_v42 = vpop.f32.mrf.mxu0 }
  0xf3   : > { %v2413_v43 = vpop.f32.mrf.mxu1  ;;  %549 = vst.msk [vmem:[%s3129_s16 + $0x60] sm:$0xff] %vm536_vm1, %v518_v40  ;;  %v533_v44 = vadd.f32 %v2381_v42, %v3119_v48 }
  0xf4   : > { %721 = vst.msk [vmem:[%s3134_s18 + $0x60] sm:$0xff] %vm536_vm1, %v691_v41  ;;  %v706_v45 = vadd.f32 %v2413_v43, %v3124_v49  ;;  %v527_v46 = vpop.f32.mrf.mxu0 }
  0xf5   : > { %v700_v47 = vpop.f32.mrf.mxu1  ;;  %552 = vst.msk [vmem:[%s3129_s16 + $0x78] sm:$0xff] %vm536_vm1, %v533_v44  ;;  %v528_v52 = vadd.f32 %v3119_v48, %v527_v46 }
  0xf6   : > { %724 = vst.msk [vmem:[%s3134_s18 + $0x78] sm:$0xff] %vm536_vm1, %v706_v45  ;;  %v701_v53 = vadd.f32 %v3124_v49, %v700_v47  ;;  %v2424_v54 = vpop.f32.mrf.mxu0 }
  0xf7   : > { %v2456_v55 = vpop.f32.mrf.mxu1  ;;  %551 = vst.msk [vmem:[%s3129_s16 + $0x70] sm:$0xff] %vm536_vm1, %v528_v52  ;;  %v810_v56 = vadd.f32 %v2424_v54, %v3225_v50  ;;  %v3331_v54 = vld [vmem:[%s3561_s2 + $0x2] ss:$0 sm:$0xff] }
  0xf8   : > { %723 = vst.msk [vmem:[%s3134_s18 + $0x70] sm:$0xff] %vm536_vm1, %v701_v53  ;;  %v985_v57 = vadd.f32 %v2456_v55, %v3230_v51  ;;  %v804_v58 = vpop.f32.mrf.mxu0  ;;  %v3336_v55 = vld [vmem:[%s3563_s4 + $0x2] ss:$0 sm:$0xff] }
  0xf9   : > { %v979_v59 = vpop.f32.mrf.mxu1  ;;  %1980 = vst.msk [vmem:[%s3129_s16 + $0x88] sm:$0xff] %vm536_vm1, %v810_v56  ;;  %v805_v48 = vadd.f32 %v3225_v50, %v804_v58 }
  0xfa   : > { %2018 = vst.msk [vmem:[%s3134_s18 + $0x88] sm:$0xff] %vm536_vm1, %v985_v57  ;;  %v980_v49 = vadd.f32 %v3230_v51, %v979_v59  ;;  %v2427_v60 = vpop.f32.mrf.mxu0 }
  0xfb   : > { %v2459_v61 = vpop.f32.mrf.mxu1  ;;  %1979 = vst.msk [vmem:[%s3129_s16 + $0x80] sm:$0xff] %vm536_vm1, %v805_v48  ;;  %v820_v62 = vadd.f32 %v2427_v60, %v3225_v50 }
  0xfc   : > { %2017 = vst.msk [vmem:[%s3134_s18 + $0x80] sm:$0xff] %vm536_vm1, %v980_v49  ;;  %v995_v63 = vadd.f32 %v2459_v61, %v3230_v51  ;;  %v814_v0 = vpop.f32.mrf.mxu0 }
  0xfd   : > { %v989_v1 = vpop.f32.mrf.mxu1  ;;  %1982 = vst.msk [vmem:[%s3129_s16 + $0x98] sm:$0xff] %vm536_vm1, %v820_v62  ;;  %v815_v2 = vadd.f32 %v3225_v50, %v814_v0 }
  0xfe   : > { %2020 = vst.msk [vmem:[%s3134_s18 + $0x98] sm:$0xff] %vm536_vm1, %v995_v63  ;;  %v990_v3 = vadd.f32 %v3230_v51, %v989_v1  ;;  %v2430_v4 = vpop.f32.mrf.mxu0 }
  0xff   : > { %v2462_v5 = vpop.f32.mrf.mxu1  ;;  %1981 = vst.msk [vmem:[%s3129_s16 + $0x90] sm:$0xff] %vm536_vm1, %v815_v2  ;;  %v830_v6 = vadd.f32 %v2430_v4, %v3225_v50 }
 0x100   : > { %2019 = vst.msk [vmem:[%s3134_s18 + $0x90] sm:$0xff] %vm536_vm1, %v990_v3  ;;  %v1005_v7 = vadd.f32 %v2462_v5, %v3230_v51  ;;  %v824_v8 = vpop.f32.mrf.mxu0 }
 0x101   : > { %v999_v9 = vpop.f32.mrf.mxu1  ;;  %1984 = vst.msk [vmem:[%s3129_s16 + $0xa8] sm:$0xff] %vm536_vm1, %v830_v6  ;;  %v825_v10 = vadd.f32 %v3225_v50, %v824_v8 }
 0x102   : > { %2022 = vst.msk [vmem:[%s3134_s18 + $0xa8] sm:$0xff] %vm536_vm1, %v1005_v7  ;;  %v1000_v11 = vadd.f32 %v3230_v51, %v999_v9  ;;  %v2433_v12 = vpop.f32.mrf.mxu0 }
 0x103   : > { %v2465_v13 = vpop.f32.mrf.mxu1  ;;  %1983 = vst.msk [vmem:[%s3129_s16 + $0xa0] sm:$0xff] %vm536_vm1, %v825_v10  ;;  %v840_v14 = vadd.f32 %v2433_v12, %v3225_v50 }
 0x104   : > { %2021 = vst.msk [vmem:[%s3134_s18 + $0xa0] sm:$0xff] %vm536_vm1, %v1000_v11  ;;  %v1015_v15 = vadd.f32 %v2465_v13, %v3230_v51  ;;  %v834_v16 = vpop.f32.mrf.mxu0 }
 0x105   : > { %v1009_v17 = vpop.f32.mrf.mxu1  ;;  %1986 = vst.msk [vmem:[%s3129_s16 + $0xb8] sm:$0xff] %vm536_vm1, %v840_v14  ;;  %v835_v18 = vadd.f32 %v3225_v50, %v834_v16 }
 0x106   : > { %2024 = vst.msk [vmem:[%s3134_s18 + $0xb8] sm:$0xff] %vm536_vm1, %v1015_v15  ;;  %v1010_v19 = vadd.f32 %v3230_v51, %v1009_v17  ;;  %v2436_v20 = vpop.f32.mrf.mxu0 }
 0x107   : > { %v2468_v21 = vpop.f32.mrf.mxu1  ;;  %1985 = vst.msk [vmem:[%s3129_s16 + $0xb0] sm:$0xff] %vm536_vm1, %v835_v18  ;;  %v850_v22 = vadd.f32 %v2436_v20, %v3225_v50 }
 0x108   : > { %2023 = vst.msk [vmem:[%s3134_s18 + $0xb0] sm:$0xff] %vm536_vm1, %v1010_v19  ;;  %v1025_v23 = vadd.f32 %v2468_v21, %v3230_v51  ;;  %v844_v24 = vpop.f32.mrf.mxu0 }
 0x109   : > { %v1019_v25 = vpop.f32.mrf.mxu1  ;;  %1988 = vst.msk [vmem:[%s3129_s16 + $0xc8] sm:$0xff] %vm536_vm1, %v850_v22  ;;  %v845_v26 = vadd.f32 %v3225_v50, %v844_v24 }
 0x10a   : > { %2026 = vst.msk [vmem:[%s3134_s18 + $0xc8] sm:$0xff] %vm536_vm1, %v1025_v23  ;;  %v1020_v27 = vadd.f32 %v3230_v51, %v1019_v25  ;;  %v2439_v28 = vpop.f32.mrf.mxu0 }
 0x10b   : > { %v2471_v29 = vpop.f32.mrf.mxu1  ;;  %1987 = vst.msk [vmem:[%s3129_s16 + $0xc0] sm:$0xff] %vm536_vm1, %v845_v26  ;;  %v860_v30 = vadd.f32 %v2439_v28, %v3225_v50 }
 0x10c   : > { %2025 = vst.msk [vmem:[%s3134_s18 + $0xc0] sm:$0xff] %vm536_vm1, %v1020_v27  ;;  %v1035_v31 = vadd.f32 %v2471_v29, %v3230_v51  ;;  %v854_v32 = vpop.f32.mrf.mxu0 }
 0x10d   : > { %v1029_v33 = vpop.f32.mrf.mxu1  ;;  %1990 = vst.msk [vmem:[%s3129_s16 + $0xd8] sm:$0xff] %vm536_vm1, %v860_v30  ;;  %v855_v34 = vadd.f32 %v3225_v50, %v854_v32 }
 0x10e   : > { %2028 = vst.msk [vmem:[%s3134_s18 + $0xd8] sm:$0xff] %vm536_vm1, %v1035_v31  ;;  %v1030_v35 = vadd.f32 %v3230_v51, %v1029_v33  ;;  %v2442_v36 = vpop.f32.mrf.mxu0 }
 0x10f   : > { %v2474_v37 = vpop.f32.mrf.mxu1  ;;  %1989 = vst.msk [vmem:[%s3129_s16 + $0xd0] sm:$0xff] %vm536_vm1, %v855_v34  ;;  %v870_v38 = vadd.f32 %v2442_v36, %v3225_v50 }
 0x110   : > { %2027 = vst.msk [vmem:[%s3134_s18 + $0xd0] sm:$0xff] %vm536_vm1, %v1030_v35  ;;  %v1045_v39 = vadd.f32 %v2474_v37, %v3230_v51  ;;  %v864_v40 = vpop.f32.mrf.mxu0 }
 0x111   : > { %v1039_v41 = vpop.f32.mrf.mxu1  ;;  %1992 = vst.msk [vmem:[%s3129_s16 + $0xe8] sm:$0xff] %vm536_vm1, %v870_v38  ;;  %v865_v42 = vadd.f32 %v3225_v50, %v864_v40 }
 0x112   : > { %2030 = vst.msk [vmem:[%s3134_s18 + $0xe8] sm:$0xff] %vm536_vm1, %v1045_v39  ;;  %v1040_v43 = vadd.f32 %v3230_v51, %v1039_v41  ;;  %v2445_v44 = vpop.f32.mrf.mxu0 }
 0x113   : > { %v2477_v45 = vpop.f32.mrf.mxu1  ;;  %1991 = vst.msk [vmem:[%s3129_s16 + $0xe0] sm:$0xff] %vm536_vm1, %v865_v42  ;;  %v880_v46 = vadd.f32 %v2445_v44, %v3225_v50 }
 0x114   : > { %2029 = vst.msk [vmem:[%s3134_s18 + $0xe0] sm:$0xff] %vm536_vm1, %v1040_v43  ;;  %v1055_v47 = vadd.f32 %v2477_v45, %v3230_v51  ;;  %v874_v52 = vpop.f32.mrf.mxu0 }
 0x115   : > { %v1049_v53 = vpop.f32.mrf.mxu1  ;;  %1994 = vst.msk [vmem:[%s3129_s16 + $0xf8] sm:$0xff] %vm536_vm1, %v880_v46  ;;  %v875_v56 = vadd.f32 %v3225_v50, %v874_v52 }
 0x116   : > { %2032 = vst.msk [vmem:[%s3134_s18 + $0xf8] sm:$0xff] %vm536_vm1, %v1055_v47  ;;  %v1050_v57 = vadd.f32 %v3230_v51, %v1049_v53  ;;  %v2488_v58 = vpop.f32.mrf.mxu0 }
 0x117   : > { %v2520_v59 = vpop.f32.mrf.mxu1  ;;  %1993 = vst.msk [vmem:[%s3129_s16 + $0xf0] sm:$0xff] %vm536_vm1, %v875_v56  ;;  %v1160_v48 = vadd.f32 %v2488_v58, %v3331_v54  ;;  %v3437_v58 = vld [vmem:[%s3561_s2 + $0x3] ss:$0 sm:$0xff] }
 0x118   : > { %2031 = vst.msk [vmem:[%s3134_s18 + $0xf0] sm:$0xff] %vm536_vm1, %v1050_v57  ;;  %v1335_v49 = vadd.f32 %v2520_v59, %v3336_v55  ;;  %v1154_v60 = vpop.f32.mrf.mxu0  ;;  %v3442_v59 = vld [vmem:[%s3563_s4 + $0x3] ss:$0 sm:$0xff] }
 0x119   : > { %v1329_v61 = vpop.f32.mrf.mxu1  ;;  %2056 = vst.msk [vmem:[%s3129_s16 + $0x108] sm:$0xff] %vm536_vm1, %v1160_v48  ;;  %v1155_v50 = vadd.f32 %v3331_v54, %v1154_v60 }
 0x11a   : > { %2094 = vst.msk [vmem:[%s3134_s18 + $0x108] sm:$0xff] %vm536_vm1, %v1335_v49  ;;  %v1330_v51 = vadd.f32 %v3336_v55, %v1329_v61  ;;  %v2491_v62 = vpop.f32.mrf.mxu0 }
 0x11b   : > { %v2523_v63 = vpop.f32.mrf.mxu1  ;;  %2055 = vst.msk [vmem:[%s3129_s16 + $0x100] sm:$0xff] %vm536_vm1, %v1155_v50  ;;  %v1170_v0 = vadd.f32 %v2491_v62, %v3331_v54 }
 0x11c   : > { %2093 = vst.msk [vmem:[%s3134_s18 + $0x100] sm:$0xff] %vm536_vm1, %v1330_v51  ;;  %v1345_v1 = vadd.f32 %v2523_v63, %v3336_v55  ;;  %v1164_v2 = vpop.f32.mrf.mxu0 }
 0x11d   : > { %v1339_v3 = vpop.f32.mrf.mxu1  ;;  %2058 = vst.msk [vmem:[%s3129_s16 + $0x118] sm:$0xff] %vm536_vm1, %v1170_v0  ;;  %v1165_v4 = vadd.f32 %v3331_v54, %v1164_v2 }
 0x11e   : > { %2096 = vst.msk [vmem:[%s3134_s18 + $0x118] sm:$0xff] %vm536_vm1, %v1345_v1  ;;  %v1340_v5 = vadd.f32 %v3336_v55, %v1339_v3  ;;  %v2494_v6 = vpop.f32.mrf.mxu0 }
 0x11f   : > { %v2526_v7 = vpop.f32.mrf.mxu1  ;;  %2057 = vst.msk [vmem:[%s3129_s16 + $0x110] sm:$0xff] %vm536_vm1, %v1165_v4  ;;  %v1180_v8 = vadd.f32 %v2494_v6, %v3331_v54 }
 0x120   : > { %2095 = vst.msk [vmem:[%s3134_s18 + $0x110] sm:$0xff] %vm536_vm1, %v1340_v5  ;;  %v1355_v9 = vadd.f32 %v2526_v7, %v3336_v55  ;;  %v1174_v10 = vpop.f32.mrf.mxu0 }
 0x121   : > { %v1349_v11 = vpop.f32.mrf.mxu1  ;;  %2060 = vst.msk [vmem:[%s3129_s16 + $0x128] sm:$0xff] %vm536_vm1, %v1180_v8  ;;  %v1175_v12 = vadd.f32 %v3331_v54, %v1174_v10 }
 0x122   : > { %2098 = vst.msk [vmem:[%s3134_s18 + $0x128] sm:$0xff] %vm536_vm1, %v1355_v9  ;;  %v1350_v13 = vadd.f32 %v3336_v55, %v1349_v11  ;;  %v2497_v14 = vpop.f32.mrf.mxu0 }
 0x123   : > { %v2529_v15 = vpop.f32.mrf.mxu1  ;;  %2059 = vst.msk [vmem:[%s3129_s16 + $0x120] sm:$0xff] %vm536_vm1, %v1175_v12  ;;  %v1190_v16 = vadd.f32 %v2497_v14, %v3331_v54 }
 0x124   : > { %2097 = vst.msk [vmem:[%s3134_s18 + $0x120] sm:$0xff] %vm536_vm1, %v1350_v13  ;;  %v1365_v17 = vadd.f32 %v2529_v15, %v3336_v55  ;;  %v1184_v18 = vpop.f32.mrf.mxu0 }
 0x125   : > { %v1359_v19 = vpop.f32.mrf.mxu1  ;;  %2062 = vst.msk [vmem:[%s3129_s16 + $0x138] sm:$0xff] %vm536_vm1, %v1190_v16  ;;  %v1185_v20 = vadd.f32 %v3331_v54, %v1184_v18 }
 0x126   : > { %2100 = vst.msk [vmem:[%s3134_s18 + $0x138] sm:$0xff] %vm536_vm1, %v1365_v17  ;;  %v1360_v21 = vadd.f32 %v3336_v55, %v1359_v19  ;;  %v2500_v22 = vpop.f32.mrf.mxu0 }
 0x127   : > { %v2532_v23 = vpop.f32.mrf.mxu1  ;;  %2061 = vst.msk [vmem:[%s3129_s16 + $0x130] sm:$0xff] %vm536_vm1, %v1185_v20  ;;  %v1200_v24 = vadd.f32 %v2500_v22, %v3331_v54 }
 0x128   : > { %2099 = vst.msk [vmem:[%s3134_s18 + $0x130] sm:$0xff] %vm536_vm1, %v1360_v21  ;;  %v1375_v25 = vadd.f32 %v2532_v23, %v3336_v55  ;;  %v1194_v26 = vpop.f32.mrf.mxu0 }
 0x129   : > { %v1369_v27 = vpop.f32.mrf.mxu1  ;;  %2064 = vst.msk [vmem:[%s3129_s16 + $0x148] sm:$0xff] %vm536_vm1, %v1200_v24  ;;  %v1195_v28 = vadd.f32 %v3331_v54, %v1194_v26 }
 0x12a   : > { %2102 = vst.msk [vmem:[%s3134_s18 + $0x148] sm:$0xff] %vm536_vm1, %v1375_v25  ;;  %v1370_v29 = vadd.f32 %v3336_v55, %v1369_v27  ;;  %v2503_v30 = vpop.f32.mrf.mxu0 }
 0x12b   : > { %v2535_v31 = vpop.f32.mrf.mxu1  ;;  %2063 = vst.msk [vmem:[%s3129_s16 + $0x140] sm:$0xff] %vm536_vm1, %v1195_v28  ;;  %v1210_v32 = vadd.f32 %v2503_v30, %v3331_v54 }
 0x12c   : > { %2101 = vst.msk [vmem:[%s3134_s18 + $0x140] sm:$0xff] %vm536_vm1, %v1370_v29  ;;  %v1385_v33 = vadd.f32 %v2535_v31, %v3336_v55  ;;  %v1204_v34 = vpop.f32.mrf.mxu0 }
 0x12d   : > { %v1379_v35 = vpop.f32.mrf.mxu1  ;;  %2066 = vst.msk [vmem:[%s3129_s16 + $0x158] sm:$0xff] %vm536_vm1, %v1210_v32  ;;  %v1205_v36 = vadd.f32 %v3331_v54, %v1204_v34 }
 0x12e   : > { %2104 = vst.msk [vmem:[%s3134_s18 + $0x158] sm:$0xff] %vm536_vm1, %v1385_v33  ;;  %v1380_v37 = vadd.f32 %v3336_v55, %v1379_v35  ;;  %v2506_v38 = vpop.f32.mrf.mxu0 }
 0x12f   : > { %v2538_v39 = vpop.f32.mrf.mxu1  ;;  %2065 = vst.msk [vmem:[%s3129_s16 + $0x150] sm:$0xff] %vm536_vm1, %v1205_v36  ;;  %v1220_v40 = vadd.f32 %v2506_v38, %v3331_v54 }
 0x130   : > { %2103 = vst.msk [vmem:[%s3134_s18 + $0x150] sm:$0xff] %vm536_vm1, %v1380_v37  ;;  %v1395_v41 = vadd.f32 %v2538_v39, %v3336_v55  ;;  %v1214_v42 = vpop.f32.mrf.mxu0 }
 0x131   : > { %v1389_v43 = vpop.f32.mrf.mxu1  ;;  %2068 = vst.msk [vmem:[%s3129_s16 + $0x168] sm:$0xff] %vm536_vm1, %v1220_v40  ;;  %v1215_v44 = vadd.f32 %v3331_v54, %v1214_v42 }
 0x132   : > { %2106 = vst.msk [vmem:[%s3134_s18 + $0x168] sm:$0xff] %vm536_vm1, %v1395_v41  ;;  %v1390_v45 = vadd.f32 %v3336_v55, %v1389_v43  ;;  %v2509_v46 = vpop.f32.mrf.mxu0 }
 0x133   : > { %v2541_v47 = vpop.f32.mrf.mxu1  ;;  %2067 = vst.msk [vmem:[%s3129_s16 + $0x160] sm:$0xff] %vm536_vm1, %v1215_v44  ;;  %v1230_v52 = vadd.f32 %v2509_v46, %v3331_v54 }
 0x134   : > { %2105 = vst.msk [vmem:[%s3134_s18 + $0x160] sm:$0xff] %vm536_vm1, %v1390_v45  ;;  %v1405_v53 = vadd.f32 %v2541_v47, %v3336_v55  ;;  %v1224_v56 = vpop.f32.mrf.mxu0 }
 0x135   : > { %v1399_v57 = vpop.f32.mrf.mxu1  ;;  %2070 = vst.msk [vmem:[%s3129_s16 + $0x178] sm:$0xff] %vm536_vm1, %v1230_v52  ;;  %v1225_v48 = vadd.f32 %v3331_v54, %v1224_v56 }
 0x136   : > { %2108 = vst.msk [vmem:[%s3134_s18 + $0x178] sm:$0xff] %vm536_vm1, %v1405_v53  ;;  %v1400_v49 = vadd.f32 %v3336_v55, %v1399_v57  ;;  %v2552_v60 = vpop.f32.mrf.mxu0 }
 0x137   : > { %v2584_v61 = vpop.f32.mrf.mxu1  ;;  %2069 = vst.msk [vmem:[%s3129_s16 + $0x170] sm:$0xff] %vm536_vm1, %v1225_v48  ;;  %v1510_v50 = vadd.f32 %v2552_v60, %v3437_v58 }
 0x138   : > { %2107 = vst.msk [vmem:[%s3134_s18 + $0x170] sm:$0xff] %vm536_vm1, %v1400_v49  ;;  %v1685_v51 = vadd.f32 %v2584_v61, %v3442_v59  ;;  %v1504_v62 = vpop.f32.mrf.mxu0 }
 0x139   : > { %v1679_v63 = vpop.f32.mrf.mxu1  ;;  %2132 = vst.msk [vmem:[%s3129_s16 + $0x188] sm:$0xff] %vm536_vm1, %v1510_v50  ;;  %v1505_v54 = vadd.f32 %v3437_v58, %v1504_v62 }
 0x13a   : > { %2170 = vst.msk [vmem:[%s3134_s18 + $0x188] sm:$0xff] %vm536_vm1, %v1685_v51  ;;  %v1680_v55 = vadd.f32 %v3442_v59, %v1679_v63  ;;  %v2555_v0 = vpop.f32.mrf.mxu0 }
 0x13b   : > { %v2587_v1 = vpop.f32.mrf.mxu1  ;;  %2131 = vst.msk [vmem:[%s3129_s16 + $0x180] sm:$0xff] %vm536_vm1, %v1505_v54  ;;  %v1520_v2 = vadd.f32 %v2555_v0, %v3437_v58 }
 0x13c   : > { %2169 = vst.msk [vmem:[%s3134_s18 + $0x180] sm:$0xff] %vm536_vm1, %v1680_v55  ;;  %v1695_v3 = vadd.f32 %v2587_v1, %v3442_v59  ;;  %v1514_v4 = vpop.f32.mrf.mxu0 }
 0x13d   : > { %v1689_v5 = vpop.f32.mrf.mxu1  ;;  %2134 = vst.msk [vmem:[%s3129_s16 + $0x198] sm:$0xff] %vm536_vm1, %v1520_v2  ;;  %v1515_v6 = vadd.f32 %v3437_v58, %v1514_v4 }
 0x13e   : > { %2172 = vst.msk [vmem:[%s3134_s18 + $0x198] sm:$0xff] %vm536_vm1, %v1695_v3  ;;  %v1690_v7 = vadd.f32 %v3442_v59, %v1689_v5  ;;  %v2558_v8 = vpop.f32.mrf.mxu0 }
 0x13f   : > { %v2590_v9 = vpop.f32.mrf.mxu1  ;;  %2133 = vst.msk [vmem:[%s3129_s16 + $0x190] sm:$0xff] %vm536_vm1, %v1515_v6  ;;  %v1530_v10 = vadd.f32 %v2558_v8, %v3437_v58 }
 0x140   : > { %2171 = vst.msk [vmem:[%s3134_s18 + $0x190] sm:$0xff] %vm536_vm1, %v1690_v7  ;;  %v1705_v11 = vadd.f32 %v2590_v9, %v3442_v59  ;;  %v1524_v12 = vpop.f32.mrf.mxu0 }
 0x141   : > { %v1699_v13 = vpop.f32.mrf.mxu1  ;;  %2136 = vst.msk [vmem:[%s3129_s16 + $0x1a8] sm:$0xff] %vm536_vm1, %v1530_v10  ;;  %v1525_v14 = vadd.f32 %v3437_v58, %v1524_v12 }
 0x142   : > { %2174 = vst.msk [vmem:[%s3134_s18 + $0x1a8] sm:$0xff] %vm536_vm1, %v1705_v11  ;;  %v1700_v15 = vadd.f32 %v3442_v59, %v1699_v13  ;;  %v2561_v16 = vpop.f32.mrf.mxu0 }
 0x143   : > { %v2593_v17 = vpop.f32.mrf.mxu1  ;;  %2135 = vst.msk [vmem:[%s3129_s16 + $0x1a0] sm:$0xff] %vm536_vm1, %v1525_v14  ;;  %v1540_v18 = vadd.f32 %v2561_v16, %v3437_v58 }
 0x144   : > { %2173 = vst.msk [vmem:[%s3134_s18 + $0x1a0] sm:$0xff] %vm536_vm1, %v1700_v15  ;;  %v1715_v19 = vadd.f32 %v2593_v17, %v3442_v59  ;;  %v1534_v20 = vpop.f32.mrf.mxu0 }
 0x145   : > { %v1709_v21 = vpop.f32.mrf.mxu1  ;;  %2138 = vst.msk [vmem:[%s3129_s16 + $0x1b8] sm:$0xff] %vm536_vm1, %v1540_v18  ;;  %v1535_v22 = vadd.f32 %v3437_v58, %v1534_v20 }
 0x146   : > { %2176 = vst.msk [vmem:[%s3134_s18 + $0x1b8] sm:$0xff] %vm536_vm1, %v1715_v19  ;;  %v1710_v23 = vadd.f32 %v3442_v59, %v1709_v21  ;;  %v2564_v24 = vpop.f32.mrf.mxu0 }
 0x147   : > { %v2596_v25 = vpop.f32.mrf.mxu1  ;;  %2137 = vst.msk [vmem:[%s3129_s16 + $0x1b0] sm:$0xff] %vm536_vm1, %v1535_v22  ;;  %v1550_v26 = vadd.f32 %v2564_v24, %v3437_v58 }
 0x148   : > { %2175 = vst.msk [vmem:[%s3134_s18 + $0x1b0] sm:$0xff] %vm536_vm1, %v1710_v23  ;;  %v1725_v27 = vadd.f32 %v2596_v25, %v3442_v59  ;;  %v1544_v28 = vpop.f32.mrf.mxu0 }
 0x149   : > { %v1719_v29 = vpop.f32.mrf.mxu1  ;;  %2140 = vst.msk [vmem:[%s3129_s16 + $0x1c8] sm:$0xff] %vm536_vm1, %v1550_v26  ;;  %v1545_v30 = vadd.f32 %v3437_v58, %v1544_v28 }
 0x14a   : > { %2178 = vst.msk [vmem:[%s3134_s18 + $0x1c8] sm:$0xff] %vm536_vm1, %v1725_v27  ;;  %v1720_v31 = vadd.f32 %v3442_v59, %v1719_v29  ;;  %v2567_v32 = vpop.f32.mrf.mxu0 }
 0x14b   : > { %v2599_v33 = vpop.f32.mrf.mxu1  ;;  %2139 = vst.msk [vmem:[%s3129_s16 + $0x1c0] sm:$0xff] %vm536_vm1, %v1545_v30  ;;  %v1560_v34 = vadd.f32 %v2567_v32, %v3437_v58 }
 0x14c   : > { %2177 = vst.msk [vmem:[%s3134_s18 + $0x1c0] sm:$0xff] %vm536_vm1, %v1720_v31  ;;  %v1735_v35 = vadd.f32 %v2599_v33, %v3442_v59  ;;  %v1554_v36 = vpop.f32.mrf.mxu0 }
 0x14d   : > { %v1729_v37 = vpop.f32.mrf.mxu1  ;;  %2142 = vst.msk [vmem:[%s3129_s16 + $0x1d8] sm:$0xff] %vm536_vm1, %v1560_v34  ;;  %v1555_v38 = vadd.f32 %v3437_v58, %v1554_v36 }
 0x14e   : > { %2180 = vst.msk [vmem:[%s3134_s18 + $0x1d8] sm:$0xff] %vm536_vm1, %v1735_v35  ;;  %v1730_v39 = vadd.f32 %v3442_v59, %v1729_v37  ;;  %v2570_v40 = vpop.f32.mrf.mxu0 }
 0x14f   : > { %v2602_v41 = vpop.f32.mrf.mxu1  ;;  %2141 = vst.msk [vmem:[%s3129_s16 + $0x1d0] sm:$0xff] %vm536_vm1, %v1555_v38  ;;  %v1570_v42 = vadd.f32 %v2570_v40, %v3437_v58 }
 0x150   : > { %2179 = vst.msk [vmem:[%s3134_s18 + $0x1d0] sm:$0xff] %vm536_vm1, %v1730_v39  ;;  %v1745_v43 = vadd.f32 %v2602_v41, %v3442_v59  ;;  %v1564_v44 = vpop.f32.mrf.mxu0 }
 0x151   : > { %v1739_v45 = vpop.f32.mrf.mxu1  ;;  %2144 = vst.msk [vmem:[%s3129_s16 + $0x1e8] sm:$0xff] %vm536_vm1, %v1570_v42  ;;  %v1565_v46 = vadd.f32 %v3437_v58, %v1564_v44 }
 0x152   : > { %2182 = vst.msk [vmem:[%s3134_s18 + $0x1e8] sm:$0xff] %vm536_vm1, %v1745_v43  ;;  %v1740_v47 = vadd.f32 %v3442_v59, %v1739_v45  ;;  %v2573_v52 = vpop.f32.mrf.mxu0 }
 0x153   : > { %v2605_v53 = vpop.f32.mrf.mxu1  ;;  %2143 = vst.msk [vmem:[%s3129_s16 + $0x1e0] sm:$0xff] %vm536_vm1, %v1565_v46  ;;  %v1580_v56 = vadd.f32 %v2573_v52, %v3437_v58 }
 0x154   : > { %2181 = vst.msk [vmem:[%s3134_s18 + $0x1e0] sm:$0xff] %vm536_vm1, %v1740_v47  ;;  %v1755_v57 = vadd.f32 %v2605_v53, %v3442_v59  ;;  %v1574_v48 = vpop.f32.mrf.mxu0 }
 0x155   : > { %v1749_v49 = vpop.f32.mrf.mxu1  ;;  %2146 = vst.msk [vmem:[%s3129_s16 + $0x1f8] sm:$0xff] %vm536_vm1, %v1580_v56  ;;  %v1575_v60 = vadd.f32 %v3437_v58, %v1574_v48 }
 0x156   : > { %2184 = vst.msk [vmem:[%s3134_s18 + $0x1f8] sm:$0xff] %vm536_vm1, %v1755_v57  ;;  %v1750_v61 = vadd.f32 %v3442_v59, %v1749_v49 }
 0x157   : > { %2145 = vst.msk [vmem:[%s3129_s16 + $0x1f0] sm:$0xff] %vm536_vm1, %v1575_v60 }
 0x158   : > { %2183 = vst.msk [vmem:[%s3134_s18 + $0x1f0] sm:$0xff] %vm536_vm1, %v1750_v61 }
 0x159 PF: > { %s17_s23 = sadd.s32 1, %s2652_s23   ;;  %s3566_s21 = smov %s2648_s22 }
 0x15a   : > { %p14_p5 = scmp.ge.s32.totalorder %s17_s23, 4   ;;  %s3567_s22 = smov %s3569_s24 }
 0x15c   :  { %16 = sbr.rel (!%p14_p5) target bundleno = 2 (0x2), region = 100 }

// kernel: tpu_custom_call.1
= control target key start
LH: loop header
LB: loop body
LE: loop exit
PB: predicated region body
PF: predicated region fallthrough
CT: control target
= control target key end

     0   :  { %s2689_s21 = smov 0   ;;  %s2691_s22 = smov 0   ;;  %s3559_s0 = inlined_call_operand.vmem [shape: f32[2,128,32], index: 0, kind: input, shape index: {}]   ;;  %s3560_s1 = inlined_call_operand.vmem [shape: f32[4,32,8], index: 1, kind: input, shape index: {}]   ;;  %s3561_s2 = inlined_call_operand.vmem [shape: f32[4,1,8], index: 2, kind: input, shape index: {}]   ;;  %s3562_s3 = inlined_call_operand.vmem [shape: f32[4,32,8], index: 3, kind: input, shape index: {}]   ;;  %s3563_s4 = inlined_call_operand.vmem [shape: f32[4,1,8], index: 4, kind: input, shape index: {}]   ;;  %s3564_s5 = inlined_call_operand.vmem [shape: f32[2,4,128,8], index: 5, kind: output, shape index: {0}]   ;;  %s3565_s6 = inlined_call_operand.vmem [shape: f32[2,4,128,8], index: 6, kind: output, shape index: {1}]  }
   0x1   :  { %s2693_s23 = smov 0  }
   0x2 LB: > { %s29_s24 = sadd.s32 1, %s2648_s22  ;;  %p1916_p0 = scmp.ge.s32.totalorder %s2652_s23, 1  ;;  %s2652_s23 = sphi %s2693_s23, %s17_s23   ;;  %s2648_s22 = sphi %s2691_s22, %s3567_s22   ;;  %s2644_s21 = sphi %s2689_s21, %s3566_s21  }
   0x3   : > { %p31_p1 = scmp.ge.s32.totalorder %s29_s24, 2  ;;  %p238_p2 = scmp.lt.s32.totalorder %s2652_s23, 3 }
   0x5   : > { %s3569_s24 = smov (%p31_p1, %s29_s24), 0  ;;  %p239_p3 = pnand %p1916_p0, %p238_p2 }
   0x6   : > { %p286_p4 = scmp.lt.s32.totalorder (!%p239_p3), %s2644_s21, 1 }
   0x7   : > { %242 = sbr.rel (%p239_p3) target bundleno = 345 (0x159), region = 40 }
   0xc   : > { %v334_v0 = vld [vmem:[%s3560_s1 + $0x18] sm:$0xff]  ;;  %v333_v2 = vld [vmem:[%s3560_s1 + $0x10] sm:$0xff]  ;;  %v332_v4 = vld [vmem:[%s3560_s1 + $0x8] sm:$0xff]  ;;  %s3571_s21 = smov (!%p286_p4, %s2644_s21), 1  ;;  %vm342_vm0 = vcmask 261120   ;;  %vm536_vm1 = vcmask 64512  }
   0xd   : > { %v556_v1 = vld [vmem:[%s3562_s3 + $0x18] sm:$0xff]  ;;  %2350 = vmatprep.subr.mxu0 %v334_v0  ;;  %v555_v3 = vld [vmem:[%s3562_s3 + $0x10] sm:$0xff]  ;;  %v554_v5 = vld [vmem:[%s3562_s3 + $0x8] sm:$0xff]  ;;  %s2187_s17 = sshll.u32 %s3571_s21, 7  ;;  %s2188_s9 = sshll.u32 %s3571_s21, 9 }
   0xe   : > { %2382 = vmatprep.subr.mxu1 %v556_v1  ;;  %2351 = vmatpush3.msra.mxu0 %v334_v0  ;;  %v331_v6 = vld [vmem:[%s3560_s1] sm:$0xff]  ;;  %s2737_s20 = scalar_lea.vmem %s3559_s0, %s2187_s17  ;;  %v1960_v10 = vld [vmem:[%s3560_s1 + $0x38] sm:$0xff]  ;;  %v1959_v15 = vld [vmem:[%s3560_s1 + $0x30] sm:$0xff]  ;;  %s3129_s16 = scalar_lea.vmem %s3564_s5, %s2188_s9 }
   0xf   : > { %2383 = vmatpush3.msra.mxu1 %v556_v1  ;;  %2352 = vmatprep.subr.mxu0 %v333_v2  ;;  %v553_v7 = vld [vmem:[%s3562_s3] sm:$0xff]  ;;  %v2743_v9 = vld [vmem:[%s2737_s20 + $0x8] sm:$0xff]  ;;  %v1998_v11 = vld [vmem:[%s3562_s3 + $0x38] sm:$0xff]  ;;  %s3134_s18 = scalar_lea.vmem %s3565_s6, %s2188_s9 }
  0x10   : > { %2384 = vmatprep.subr.mxu1 %v555_v3  ;;  %2353 = vmatpush3.msra.mxu0 %v333_v2  ;;  %v2740_v8 = vld [vmem:[%s2737_s20] sm:$0xff]  ;;  %v2760_v12 = vld [vmem:[%s2737_s20 + $0x10] sm:$0xff]  ;;  %v2763_v13 = vld [vmem:[%s2737_s20 + $0x18] sm:$0xff] }
  0x11   : > { %2385 = vmatpush3.msra.mxu1 %v555_v3  ;;  %2354 = vmatprep.subr.mxu0 %v332_v4  ;;  %v2766_v14 = vld [vmem:[%s2737_s20 + $0x20] sm:$0xff]  ;;  %v1997_v16 = vld [vmem:[%s3562_s3 + $0x30] sm:$0xff]  ;;  %v2787_v17 = vld [vmem:[%s2737_s20 + $0x28] sm:$0xff] }
  0x12   : > { %2386 = vmatprep.subr.mxu1 %v554_v5  ;;  %2355 = vmatpush3.msra.mxu0 %v332_v4  ;;  %v2790_v18 = vld [vmem:[%s2737_s20 + $0x30] sm:$0xff]  ;;  %v1958_v19 = vld [vmem:[%s3560_s1 + $0x28] sm:$0xff]  ;;  %v2807_v21 = vld [vmem:[%s2737_s20 + $0x38] sm:$0xff] }
  0x13   : > { %2387 = vmatpush3.msra.mxu1 %v554_v5  ;;  %2356 = vmatprep.subr.mxu0 %v331_v6  ;;  %v1996_v20 = vld [vmem:[%s3562_s3 + $0x28] sm:$0xff]  ;;  %v2810_v22 = vld [vmem:[%s2737_s20 + $0x40] sm:$0xff]  ;;  %v2830_v26 = vld [vmem:[%s2737_s20 + $0x50] sm:$0xff] }
  0x14   : > { %2388 = vmatprep.subr.mxu1 %v553_v7  ;;  %2357 = vmatpush3.msra.mxu0 %v331_v6  ;;  %v1957_v23 = vld [vmem:[%s3560_s1 + $0x20] sm:$0xff]  ;;  %v2827_v25 = vld [vmem:[%s2737_s20 + $0x48] sm:$0xff]  ;;  %v2036_v27 = vld [vmem:[%s3560_s1 + $0x58] sm:$0xff] }
  0x15   : > { %2358 = vmatprep.mubr.msk.f32.mxu0 %vm342_vm0, %v2740_v8  ;;  %2389 = vmatpush3.msra.mxu1 %v553_v7  ;;  %v1995_v24 = vld [vmem:[%s3562_s3 + $0x20] sm:$0xff]  ;;  %v2074_v28 = vld [vmem:[%s3562_s3 + $0x58] sm:$0xff]  ;;  %v2861_v31 = vld [vmem:[%s2737_s20 + $0x68] sm:$0xff] }
  0x16   : > { %2390 = vmatprep.mubr.msk.f32.mxu1 %vm342_vm0, %v2740_v8  ;;  %2359 = vmatmul.mubr.msk.f32.vlgmr.msra.gmra.mxu0 %vm342_vm0, %v2743_v9  ;;  %v2847_v29 = vld [vmem:[%s2737_s20 + $0x58] sm:$0xff]  ;;  %v2850_v30 = vld [vmem:[%s2737_s20 + $0x60] sm:$0xff]  ;;  %v2864_v32 = vld [vmem:[%s2737_s20 + $0x70] sm:$0xff] }
  0x17   : > { %2391 = vmatmul.mubr.msk.f32.vlgmr.msra.gmra.mxu1 %vm342_vm0, %v2743_v9  ;;  %2414 = vmatprep.subr.mxu0 %v1960_v10  ;;  %v2875_v33 = vld [vmem:[%s2737_s20 + $0x78] sm:$0xff]  ;;  %v2035_v34 = vld [vmem:[%s3560_s1 + $0x50] sm:$0xff]  ;;  %v2034_v36 = vld [vmem:[%s3560_s1 + $0x48] sm:$0xff] }
  0x18   : > { %2446 = vmatprep.subr.mxu1 %v1998_v11  ;;  %2415 = vmatpush3.msra.mxu0 %v1960_v10  ;;  %v2073_v35 = vld [vmem:[%s3562_s3 + $0x50] sm:$0xff]  ;;  %v2072_v37 = vld [vmem:[%s3562_s3 + $0x48] sm:$0xff]  ;;  %v2033_v38 = vld [vmem:[%s3560_s1 + $0x40] sm:$0xff] }
  0x19   : > { %2447 = vmatpush3.msra.mxu1 %v1998_v11  ;;  %2361 = vmatprep.mubr.msk.f32.mxu0 %vm342_vm0, %v2760_v12  ;;  %v2071_v39 = vld [vmem:[%s3562_s3 + $0x40] sm:$0xff]  ;;  %v2112_v40 = vld [vmem:[%s3560_s1 + $0x78] sm:$0xff]  ;;  %v2111_v42 = vld [vmem:[%s3560_s1 + $0x70] sm:$0xff] }
  0x1a   : > { %2393 = vmatprep.mubr.msk.f32.mxu1 %vm342_vm0, %v2760_v12  ;;  %2362 = vmatmul.mubr.msk.f32.gmra.mxu0 %vm342_vm0, %v2763_v13  ;;  %v2150_v41 = vld [vmem:[%s3562_s3 + $0x78] sm:$0xff]  ;;  %v2149_v43 = vld [vmem:[%s3562_s3 + $0x70] sm:$0xff]  ;;  %v2110_v44 = vld [vmem:[%s3560_s1 + $0x68] sm:$0xff] }
  0x1b   : > { %2394 = vmatmul.mubr.msk.f32.gmra.mxu1 %vm342_vm0, %v2763_v13  ;;  %2364 = vmatprep.mubr.msk.f32.mxu0 %vm342_vm0, %v2766_v14  ;;  %v2148_v45 = vld [vmem:[%s3562_s3 + $0x68] sm:$0xff]  ;;  %v2109_v46 = vld [vmem:[%s3560_s1 + $0x60] sm:$0xff] }
  0x1c   : > { %2396 = vmatprep.mubr.msk.f32.mxu1 %vm342_vm0, %v2766_v14  ;;  %2416 = vmatprep.subr.mxu0 %v1959_v15  ;;  %v2147_v47 = vld [vmem:[%s3562_s3 + $0x60] sm:$0xff] }
  0x1d   : > { %2448 = vmatprep.subr.mxu1 %v1997_v16  ;;  %2417 = vmatpush3.msra.mxu0 %v1959_v15  ;;  %v3119_v48 = vld [vmem:[%s3561_s2] ss:$0 sm:$0xff] }
  0x1e   : > { %2449 = vmatpush3.msra.mxu1 %v1997_v16  ;;  %2365 = vmatmul.mubr.msk.f32.gmra.mxu0 %vm342_vm0, %v2787_v17  ;;  %v3124_v49 = vld [vmem:[%s3563_s4] ss:$0 sm:$0xff] }
  0x1f   : > { %2397 = vmatmul.mubr.msk.f32.gmra.mxu1 %vm342_vm0, %v2787_v17  ;;  %2367 = vmatprep.mubr.msk.f32.mxu0 %vm342_vm0, %v2790_v18 }
  0x20   : > { %2399 = vmatprep.mubr.msk.f32.mxu1 %vm342_vm0, %v2790_v18  ;;  %2418 = vmatprep.subr.mxu0 %v1958_v19 }
  0x21   : > { %2450 = vmatprep.subr.mxu1 %v1996_v20  ;;  %2419 = vmatpush3.msra.mxu0 %v1958_v19 }
  0x22   : > { %2451 = vmatpush3.msra.mxu1 %v1996_v20  ;;  %2368 = vmatmul.mubr.msk.f32.gmra.mxu0 %vm342_vm0, %v2807_v21 }
  0x23   : > { %2400 = vmatmul.mubr.msk.f32.gmra.mxu1 %vm342_vm0, %v2807_v21  ;;  %2370 = vmatprep.mubr.msk.f32.mxu0 %vm342_vm0, %v2810_v22 }
  0x24   : > { %2402 = vmatprep.mubr.msk.f32.mxu1 %vm342_vm0, %v2810_v22  ;;  %2420 = vmatprep.subr.mxu0 %v1957_v23 }
  0x25   : > { %2452 = vmatprep.subr.mxu1 %v1995_v24  ;;  %2421 = vmatpush3.msra.mxu0 %v1957_v23 }
  0x26   : > { %2453 = vmatpush3.msra.mxu1 %v1995_v24  ;;  %2371 = vmatmul.mubr.msk.f32.gmra.mxu0 %vm342_vm0, %v2827_v25 }
  0x27   : > { %2403 = vmatmul.mubr.msk.f32.gmra.mxu1 %vm342_vm0, %v2827_v25  ;;  %2373 = vmatprep.mubr.msk.f32.mxu0 %vm342_vm0, %v2830_v26 }
  0x28   : > { %2405 = vmatprep.mubr.msk.f32.mxu1 %vm342_vm0, %v2830_v26  ;;  %2478 = vmatprep.subr.mxu0 %v2036_v27 }
  0x29   : > { %2510 = vmatprep.subr.mxu1 %v2074_v28 }
  0x2a   : > { %2374 = vmatmul.mubr.msk.f32.gmra.mxu0 %vm342_vm0, %v2847_v29 }
  0x2b   : > { %2406 = vmatmul.mubr.msk.f32.gmra.mxu1 %vm342_vm0, %v2847_v29  ;;  %2376 = vmatprep.mubr.msk.f32.mxu0 %vm342_vm0, %v2850_v30 }
  0x2c   : > { %2408 = vmatprep.mubr.msk.f32.mxu1 %vm342_vm0, %v2850_v30 }
  0x2e   : > { %2377 = vmatmul.mubr.msk.f32.gmra.mxu0 %vm342_vm0, %v2861_v31 }
  0x2f   : > { %2409 = vmatmul.mubr.msk.f32.gmra.mxu1 %vm342_vm0, %v2861_v31  ;;  %2379 = vmatprep.mubr.msk.f32.mxu0 %vm342_vm0, %v2864_v32 }
  0x30   : > { %2411 = vmatprep.mubr.msk.f32.mxu1 %vm342_vm0, %v2864_v32 }
  0x32   : > { %2380 = vmatmul.mubr.msk.f32.gmra.mxu0 %vm342_vm0, %v2875_v33 }
  0x33   : > { %2412 = vmatmul.mubr.msk.f32.gmra.mxu1 %vm342_vm0, %v2875_v33  ;;  %2422 = vmatprep.mubr.msk.f32.mxu0 %vm342_vm0, %v2740_v8 }
  0x34   : > { %2454 = vmatprep.mubr.msk.f32.mxu1 %vm342_vm0, %v2740_v8 }
  0x36   : > { %2423 = vmatmul.mubr.msk.f32.vlgmr.msra.gmra.mxu0 %vm342_vm0, %v2743_v9 }
  0x37   : > { %2455 = vmatmul.mubr.msk.f32.vlgmr.msra.gmra.mxu1 %vm342_vm0, %v2743_v9  ;;  %2479 = vmatpush3.msra.mxu0 %v2036_v27 }
  0x38   : > { %2511 = vmatpush3.msra.mxu1 %v2074_v28  ;;  %2425 = vmatprep.mubr.msk.f32.mxu0 %vm342_vm0, %v2760_v12 }
  0x39   : > { %2457 = vmatprep.mubr.msk.f32.mxu1 %vm342_vm0, %v2760_v12  ;;  %2480 = vmatprep.subr.mxu0 %v2035_v34 }
  0x3a   : > { %2512 = vmatprep.subr.mxu1 %v2073_v35  ;;  %2426 = vmatmul.mubr.msk.f32.gmra.mxu0 %vm342_vm0, %v2763_v13 }
  0x3b   : > { %2458 = vmatmul.mubr.msk.f32.gmra.mxu1 %vm342_vm0, %v2763_v13  ;;  %2428 = vmatprep.mubr.msk.f32.mxu0 %vm342_vm0, %v2766_v14 }
  0x3c   : > { %2460 = vmatprep.mubr.msk.f32.mxu1 %vm342_vm0, %v2766_v14  ;;  %2481 = vmatpush3.msra.mxu0 %v2035_v34 }
  0x3d   : > { %2513 = vmatpush3.msra.mxu1 %v2073_v35  ;;  %2482 = vmatprep.subr.mxu0 %v2034_v36 }
  0x3e   : > { %2514 = vmatprep.subr.mxu1 %v2072_v37  ;;  %2429 = vmatmul.mubr.msk.f32.gmra.mxu0 %vm342_vm0, %v2787_v17 }
  0x3f   : > { %2461 = vmatmul.mubr.msk.f32.gmra.mxu1 %vm342_vm0, %v2787_v17  ;;  %2431 = vmatprep.mubr.msk.f32.mxu0 %vm342_vm0, %v2790_v18 }
  0x40   : > { %2463 = vmatprep.mubr.msk.f32.mxu1 %vm342_vm0, %v2790_v18  ;;  %2483 = vmatpush3.msra.mxu0 %v2034_v36 }
  0x41   : > { %2515 = vmatpush3.msra.mxu1 %v2072_v37  ;;  %2484 = vmatprep.subr.mxu0 %v2033_v38 }
  0x42   : > { %2516 = vmatprep.subr.mxu1 %v2071_v39  ;;  %2432 = vmatmul.mubr.msk.f32.gmra.mxu0 %vm342_vm0, %v2807_v21 }
  0x43   : > { %2464 = vmatmul.mubr.msk.f32.gmra.mxu1 %vm342_vm0, %v2807_v21  ;;  %2434 = vmatprep.mubr.msk.f32.mxu0 %vm342_vm0, %v2810_v22 }
  0x44   : > { %2466 = vmatprep.mubr.msk.f32.mxu1 %vm342_vm0, %v2810_v22  ;;  %2485 = vmatpush3.msra.mxu0 %v2033_v38 }
  0x45   : > { %2517 = vmatpush3.msra.mxu1 %v2071_v39  ;;  %2542 = vmatprep.subr.mxu0 %v2112_v40 }
  0x46   : > { %2574 = vmatprep.subr.mxu1 %v2150_v41  ;;  %2435 = vmatmul.mubr.msk.f32.gmra.mxu0 %vm342_vm0, %v2827_v25 }
  0x47   : > { %2467 = vmatmul.mubr.msk.f32.gmra.mxu1 %vm342_vm0, %v2827_v25  ;;  %2437 = vmatprep.mubr.msk.f32.mxu0 %vm342_vm0, %v2830_v26 }
  0x48   : > { %2469 = vmatprep.mubr.msk.f32.mxu1 %vm342_vm0, %v2830_v26 }
  0x4a   : > { %2438 = vmatmul.mubr.msk.f32.gmra.mxu0 %vm342_vm0, %v2847_v29 }
  0x4b   : > { %2470 = vmatmul.mubr.msk.f32.gmra.mxu1 %vm342_vm0, %v2847_v29  ;;  %2440 = vmatprep.mubr.msk.f32.mxu0 %vm342_vm0, %v2850_v30 }
  0x4c   : > { %2472 = vmatprep.mubr.msk.f32.mxu1 %vm342_vm0, %v2850_v30 }
  0x4e   : > { %2441 = vmatmul.mubr.msk.f32.gmra.mxu0 %vm342_vm0, %v2861_v31 }
  0x4f   : > { %2473 = vmatmul.mubr.msk.f32.gmra.mxu1 %vm342_vm0, %v2861_v31  ;;  %2443 = vmatprep.mubr.msk.f32.mxu0 %vm342_vm0, %v2864_v32 }
  0x50   : > { %2475 = vmatprep.mubr.msk.f32.mxu1 %vm342_vm0, %v2864_v32 }
  0x52   : > { %2444 = vmatmul.mubr.msk.f32.gmra.mxu0 %vm342_vm0, %v2875_v33 }
  0x53   : > { %2476 = vmatmul.mubr.msk.f32.gmra.mxu1 %vm342_vm0, %v2875_v33  ;;  %2486 = vmatprep.mubr.msk.f32.mxu0 %vm342_vm0, %v2740_v8 }
  0x54   : > { %2518 = vmatprep.mubr.msk.f32.mxu1 %vm342_vm0, %v2740_v8 }
  0x56   : > { %2487 = vmatmul.mubr.msk.f32.vlgmr.msra.gmra.mxu0 %vm342_vm0, %v2743_v9 }
  0x57   : > { %2519 = vmatmul.mubr.msk.f32.vlgmr.msra.gmra.mxu1 %vm342_vm0, %v2743_v9  ;;  %2543 = vmatpush3.msra.mxu0 %v2112_v40 }
  0x58   : > { %2575 = vmatpush3.msra.mxu1 %v2150_v41  ;;  %2489 = vmatprep.mubr.msk.f32.mxu0 %vm342_vm0, %v2760_v12 }
  0x59   : > { %2521 = vmatprep.mubr.msk.f32.mxu1 %vm342_vm0, %v2760_v12  ;;  %2544 = vmatprep.subr.mxu0 %v2111_v42 }
  0x5a   : > { %2576 = vmatprep.subr.mxu1 %v2149_v43  ;;  %2490 = vmatmul.mubr.msk.f32.gmra.mxu0 %vm342_vm0, %v2763_v13 }
  0x5b   : > { %2522 = vmatmul.mubr.msk.f32.gmra.mxu1 %vm342_vm0, %v2763_v13  ;;  %2492 = vmatprep.mubr.msk.f32.mxu0 %vm342_vm0, %v2766_v14 }
  0x5c   : > { %2524 = vmatprep.mubr.msk.f32.mxu1 %vm342_vm0, %v2766_v14  ;;  %2545 = vmatpush3.msra.mxu0 %v2111_v42 }
  0x5d   : > { %2577 = vmatpush3.msra.mxu1 %v2149_v43  ;;  %2546 = vmatprep.subr.mxu0 %v2110_v44 }
  0x5e   : > { %2578 = vmatprep.subr.mxu1 %v2148_v45  ;;  %2493 = vmatmul.mubr.msk.f32.gmra.mxu0 %vm342_vm0, %v2787_v17 }
  0x5f   : > { %2525 = vmatmul.mubr.msk.f32.gmra.mxu1 %vm342_vm0, %v2787_v17  ;;  %2495 = vmatprep.mubr.msk.f32.mxu0 %vm342_vm0, %v2790_v18 }
  0x60   : > { %2527 = vmatprep.mubr.msk.f32.mxu1 %vm342_vm0, %v2790_v18  ;;  %2547 = vmatpush3.msra.mxu0 %v2110_v44 }
  0x61   : > { %2579 = vmatpush3.msra.mxu1 %v2148_v45  ;;  %2548 = vmatprep.subr.mxu0 %v2109_v46 }
  0x62   : > { %2580 = vmatprep.subr.mxu1 %v2147_v47  ;;  %2496 = vmatmul.mubr.msk.f32.gmra.mxu0 %vm342_vm0, %v2807_v21 }
  0x63   : > { %2528 = vmatmul.mubr.msk.f32.gmra.mxu1 %vm342_vm0, %v2807_v21  ;;  %2498 = vmatprep.mubr.msk.f32.mxu0 %vm342_vm0, %v2810_v22 }
  0x64   : > { %2530 = vmatprep.mubr.msk.f32.mxu1 %vm342_vm0, %v2810_v22  ;;  %2549 = vmatpush3.msra.mxu0 %v2109_v46 }
  0x65   : > { %2581 = vmatpush3.msra.mxu1 %v2147_v47 }
  0x66   : > { %2499 = vmatmul.mubr.msk.f32.gmra.mxu0 %vm342_vm0, %v2827_v25 }
  0x67   : > { %2531 = vmatmul.mubr.msk.f32.gmra.mxu1 %vm342_vm0, %v2827_v25  ;;  %2501 = vmatprep.mubr.msk.f32.mxu0 %vm342_vm0, %v2830_v26 }
  0x68   : > { %2533 = vmatprep.mubr.msk.f32.mxu1 %vm342_vm0, %v2830_v26 }
  0x6a   : > { %2502 = vmatmul.mubr.msk.f32.gmra.mxu0 %vm342_vm0, %v2847_v29 }
  0x6b   : > { %2534 = vmatmul.mubr.msk.f32.gmra.mxu1 %vm342_vm0, %v2847_v29  ;;  %2504 = vmatprep.mubr.msk.f32.mxu0 %vm342_vm0, %v2850_v30 }
  0x6c   : > { %2536 = vmatprep.mubr.msk.f32.mxu1 %vm342_vm0, %v2850_v30 }
  0x6e   : > { %2505 = vmatmul.mubr.msk.f32.gmra.mxu0 %vm342_vm0, %v2861_v31 }
  0x6f   : > { %2537 = vmatmul.mubr.msk.f32.gmra.mxu1 %vm342_vm0, %v2861_v31  ;;  %2507 = vmatprep.mubr.msk.f32.mxu0 %vm342_vm0, %v2864_v32 }
  0x70   : > { %2539 = vmatprep.mubr.msk.f32.mxu1 %vm342_vm0, %v2864_v32 }
  0x72   : > { %2508 = vmatmul.mubr.msk.f32.gmra.mxu0 %vm342_vm0, %v2875_v33 }
  0x73   : > { %2540 = vmatmul.mubr.msk.f32.gmra.mxu1 %vm342_vm0, %v2875_v33  ;;  %2550 = vmatprep.mubr.msk.f32.mxu0 %vm342_vm0, %v2740_v8 }
  0x74   : > { %2582 = vmatprep.mubr.msk.f32.mxu1 %vm342_vm0, %v2740_v8 }
  0x76   : > { %2551 = vmatmul.mubr.msk.f32.vlgmr.msra.gmra.mxu0 %vm342_vm0, %v2743_v9 }
  0x77   : > { %2583 = vmatmul.mubr.msk.f32.vlgmr.msra.gmra.mxu1 %vm342_vm0, %v2743_v9  ;;  %2553 = vmatprep.mubr.msk.f32.mxu0 %vm342_vm0, %v2760_v12 }
  0x78   : > { %2585 = vmatprep.mubr.msk.f32.mxu1 %vm342_vm0, %v2760_v12 }
  0x7a   : > { %2554 = vmatmul.mubr.msk.f32.gmra.mxu0 %vm342_vm0, %v2763_v13 }
  0x7b   : > { %2586 = vmatmul.mubr.msk.f32.gmra.mxu1 %vm342_vm0, %v2763_v13  ;;  %2556 = vmatprep.mubr.msk.f32.mxu0 %vm342_vm0, %v2766_v14 }
  0x7c   : > { %2588 = vmatprep.mubr.msk.f32.mxu1 %vm342_vm0, %v2766_v14 }
  0x7e   : > { %2557 = vmatmul.mubr.msk.f32.gmra.mxu0 %vm342_vm0, %v2787_v17 }
  0x7f   : > { %2589 = vmatmul.mubr.msk.f32.gmra.mxu1 %vm342_vm0, %v2787_v17  ;;  %2559 = vmatprep.mubr.msk.f32.mxu0 %vm342_vm0, %v2790_v18 }
  0x80   : > { %2591 = vmatprep.mubr.msk.f32.mxu1 %vm342_vm0, %v2790_v18 }
  0x82   : > { %2560 = vmatmul.mubr.msk.f32.gmra.mxu0 %vm342_vm0, %v2807_v21 }
  0x83   : > { %2592 = vmatmul.mubr.msk.f32.gmra.mxu1 %vm342_vm0, %v2807_v21  ;;  %2562 = vmatprep.mubr.msk.f32.mxu0 %vm342_vm0, %v2810_v22 }
  0x84   : > { %2594 = vmatprep.mubr.msk.f32.mxu1 %vm342_vm0, %v2810_v22 }
  0x86   : > { %2563 = vmatmul.mubr.msk.f32.gmra.mxu0 %vm342_vm0, %v2827_v25 }
  0x87   : > { %2595 = vmatmul.mubr.msk.f32.gmra.mxu1 %vm342_vm0, %v2827_v25  ;;  %2565 = vmatprep.mubr.msk.f32.mxu0 %vm342_vm0, %v2830_v26 }
  0x88   : > { %2597 = vmatprep.mubr.msk.f32.mxu1 %vm342_vm0, %v2830_v26 }
  0x8a   : > { %2566 = vmatmul.mubr.msk.f32.gmra.mxu0 %vm342_vm0, %v2847_v29 }
  0x8b   : > { %2598 = vmatmul.mubr.msk.f32.gmra.mxu1 %vm342_vm0, %v2847_v29  ;;  %2568 = vmatprep.mubr.msk.f32.mxu0 %vm342_vm0, %v2850_v30 }
  0x8c   : > { %2600 = vmatprep.mubr.msk.f32.mxu1 %vm342_vm0, %v2850_v30 }
  0x8e   : > { %2569 = vmatmul.mubr.msk.f32.gmra.mxu0 %vm342_vm0, %v2861_v31 }
  0x8f   : > { %2601 = vmatmul.mubr.msk.f32.gmra.mxu1 %vm342_vm0, %v2861_v31  ;;  %2571 = vmatprep.mubr.msk.f32.mxu0 %vm342_vm0, %v2864_v32 }
  0x90   : > { %2603 = vmatprep.mubr.msk.f32.mxu1 %vm342_vm0, %v2864_v32 }
  0x92   : > { %2572 = vmatmul.mubr.msk.f32.gmra.mxu0 %vm342_vm0, %v2875_v33 }
  0x93   : > { %2604 = vmatmul.mubr.msk.f32.gmra.mxu1 %vm342_vm0, %v2875_v33 }
  0xd6   : > { %v2360_v50 = vpop.f32.mrf.mxu0 }
  0xd7   : > { %v2392_v51 = vpop.f32.mrf.mxu1  ;;  %v463_v52 = vadd.f32 %v2360_v50, %v3119_v48  ;;  %v3225_v50 = vld [vmem:[%s3561_s2 + $0x1] ss:$0 sm:$0xff] }
  0xd8   : > { %v636_v53 = vadd.f32 %v2392_v51, %v3124_v49  ;;  %v457_v54 = vpop.f32.mrf.mxu0  ;;  %v3230_v51 = vld [vmem:[%s3563_s4 + $0x1] ss:$0 sm:$0xff] }
  0xd9   : > { %v630_v55 = vpop.f32.mrf.mxu1  ;;  %538 = vst.msk [vmem:[%s3129_s16 + $0x8] sm:$0xff] %vm536_vm1, %v463_v52  ;;  %v458_v56 = vadd.f32 %v3119_v48, %v457_v54 }
  0xda   : > { %710 = vst.msk [vmem:[%s3134_s18 + $0x8] sm:$0xff] %vm536_vm1, %v636_v53  ;;  %v631_v57 = vadd.f32 %v3124_v49, %v630_v55  ;;  %v2363_v58 = vpop.f32.mrf.mxu0 }
  0xdb   : > { %v2395_v59 = vpop.f32.mrf.mxu1  ;;  %537 = vst.msk [vmem:[%s3129_s16] sm:$0xff] %vm536_vm1, %v458_v56  ;;  %v473_v60 = vadd.f32 %v2363_v58, %v3119_v48 }
  0xdc   : > { %709 = vst.msk [vmem:[%s3134_s18] sm:$0xff] %vm536_vm1, %v631_v57  ;;  %v646_v61 = vadd.f32 %v2395_v59, %v3124_v49  ;;  %v467_v62 = vpop.f32.mrf.mxu0 }
  0xdd   : > { %v640_v63 = vpop.f32.mrf.mxu1  ;;  %540 = vst.msk [vmem:[%s3129_s16 + $0x18] sm:$0xff] %vm536_vm1, %v473_v60  ;;  %v468_v0 = vadd.f32 %v3119_v48, %v467_v62 }
  0xde   : > { %712 = vst.msk [vmem:[%s3134_s18 + $0x18] sm:$0xff] %vm536_vm1, %v646_v61  ;;  %v641_v1 = vadd.f32 %v3124_v49, %v640_v63  ;;  %v2366_v2 = vpop.f32.mrf.mxu0 }
  0xdf   : > { %v2398_v3 = vpop.f32.mrf.mxu1  ;;  %539 = vst.msk [vmem:[%s3129_s16 + $0x10] sm:$0xff] %vm536_vm1, %v468_v0  ;;  %v483_v4 = vadd.f32 %v2366_v2, %v3119_v48 }
  0xe0   : > { %711 = vst.msk [vmem:[%s3134_s18 + $0x10] sm:$0xff] %vm536_vm1, %v641_v1  ;;  %v656_v5 = vadd.f32 %v2398_v3, %v3124_v49  ;;  %v477_v6 = vpop.f32.mrf.mxu0 }
  0xe1   : > { %v650_v7 = vpop.f32.mrf.mxu1  ;;  %542 = vst.msk [vmem:[%s3129_s16 + $0x28] sm:$0xff] %vm536_vm1, %v483_v4  ;;  %v478_v8 = vadd.f32 %v3119_v48, %v477_v6 }
  0xe2   : > { %714 = vst.msk [vmem:[%s3134_s18 + $0x28] sm:$0xff] %vm536_vm1, %v656_v5  ;;  %v651_v9 = vadd.f32 %v3124_v49, %v650_v7  ;;  %v2369_v10 = vpop.f32.mrf.mxu0 }
  0xe3   : > { %v2401_v11 = vpop.f32.mrf.mxu1  ;;  %541 = vst.msk [vmem:[%s3129_s16 + $0x20] sm:$0xff] %vm536_vm1, %v478_v8  ;;  %v493_v12 = vadd.f32 %v2369_v10, %v3119_v48 }
  0xe4   : > { %713 = vst.msk [vmem:[%s3134_s18 + $0x20] sm:$0xff] %vm536_vm1, %v651_v9  ;;  %v666_v13 = vadd.f32 %v2401_v11, %v3124_v49  ;;  %v487_v14 = vpop.f32.mrf.mxu0 }
  0xe5   : > { %v660_v15 = vpop.f32.mrf.mxu1  ;;  %544 = vst.msk [vmem:[%s3129_s16 + $0x38] sm:$0xff] %vm536_vm1, %v493_v12  ;;  %v488_v16 = vadd.f32 %v3119_v48, %v487_v14 }
  0xe6   : > { %716 = vst.msk [vmem:[%s3134_s18 + $0x38] sm:$0xff] %vm536_vm1, %v666_v13  ;;  %v661_v17 = vadd.f32 %v3124_v49, %v660_v15  ;;  %v2372_v18 = vpop.f32.mrf.mxu0 }
  0xe7   : > { %v2404_v19 = vpop.f32.mrf.mxu1  ;;  %543 = vst.msk [vmem:[%s3129_s16 + $0x30] sm:$0xff] %vm536_vm1, %v488_v16  ;;  %v503_v20 = vadd.f32 %v2372_v18, %v3119_v48 }
  0xe8   : > { %715 = vst.msk [vmem:[%s3134_s18 + $0x30] sm:$0xff] %vm536_vm1, %v661_v17  ;;  %v676_v21 = vadd.f32 %v2404_v19, %v3124_v49  ;;  %v497_v22 = vpop.f32.mrf.mxu0 }
  0xe9   : > { %v670_v23 = vpop.f32.mrf.mxu1  ;;  %546 = vst.msk [vmem:[%s3129_s16 + $0x48] sm:$0xff] %vm536_vm1, %v503_v20  ;;  %v498_v24 = vadd.f32 %v3119_v48, %v497_v22 }
  0xea   : > { %718 = vst.msk [vmem:[%s3134_s18 + $0x48] sm:$0xff] %vm536_vm1, %v676_v21  ;;  %v671_v25 = vadd.f32 %v3124_v49, %v670_v23  ;;  %v2375_v26 = vpop.f32.mrf.mxu0 }
  0xeb   : > { %v2407_v27 = vpop.f32.mrf.mxu1  ;;  %545 = vst.msk [vmem:[%s3129_s16 + $0x40] sm:$0xff] %vm536_vm1, %v498_v24  ;;  %v513_v28 = vadd.f32 %v2375_v26, %v3119_v48 }
  0xec   : > { %717 = vst.msk [vmem:[%s3134_s18 + $0x40] sm:$0xff] %vm536_vm1, %v671_v25  ;;  %v686_v29 = vadd.f32 %v2407_v27, %v3124_v49  ;;  %v507_v30 = vpop.f32.mrf.mxu0 }
  0xed   : > { %v680_v31 = vpop.f32.mrf.mxu1  ;;  %548 = vst.msk [vmem:[%s3129_s16 + $0x58] sm:$0xff] %vm536_vm1, %v513_v28  ;;  %v508_v32 = vadd.f32 %v3119_v48, %v507_v30 }
  0xee   : > { %720 = vst.msk [vmem:[%s3134_s18 + $0x58] sm:$0xff] %vm536_vm1, %v686_v29  ;;  %v681_v33 = vadd.f32 %v3124_v49, %v680_v31  ;;  %v2378_v34 = vpop.f32.mrf.mxu0 }
  0xef   : > { %v2410_v35 = vpop.f32.mrf.mxu1  ;;  %547 = vst.msk [vmem:[%s3129_s16 + $0x50] sm:$0xff] %vm536_vm1, %v508_v32  ;;  %v523_v36 = vadd.f32 %v2378_v34, %v3119_v48 }
  0xf0   : > { %719 = vst.msk [vmem:[%s3134_s18 + $0x50] sm:$0xff] %vm536_vm1, %v681_v33  ;;  %v696_v37 = vadd.f32 %v2410_v35, %v3124_v49  ;;  %v517_v38 = vpop.f32.mrf.mxu0 }
  0xf1   : > { %v690_v39 = vpop.f32.mrf.mxu1  ;;  %550 = vst.msk [vmem:[%s3129_s16 + $0x68] sm:$0xff] %vm536_vm1, %v523_v36  ;;  %v518_v40 = vadd.f32 %v3119_v48, %v517_v38 }
  0xf2   : > { %722 = vst.msk [vmem:[%s3134_s18 + $0x68] sm:$0xff] %vm536_vm1, %v696_v37  ;;  %v691_v41 = vadd.f32 %v3124_v49, %v690_v39  ;;  %v2381_v42 = vpop.f32.mrf.mxu0 }
  0xf3   : > { %v2413_v43 = vpop.f32.mrf.mxu1  ;;  %549 = vst.msk [vmem:[%s3129_s16 + $0x60] sm:$0xff] %vm536_vm1, %v518_v40  ;;  %v533_v44 = vadd.f32 %v2381_v42, %v3119_v48 }
  0xf4   : > { %721 = vst.msk [vmem:[%s3134_s18 + $0x60] sm:$0xff] %vm536_vm1, %v691_v41  ;;  %v706_v45 = vadd.f32 %v2413_v43, %v3124_v49  ;;  %v527_v46 = vpop.f32.mrf.mxu0 }
  0xf5   : > { %v700_v47 = vpop.f32.mrf.mxu1  ;;  %552 = vst.msk [vmem:[%s3129_s16 + $0x78] sm:$0xff] %vm536_vm1, %v533_v44  ;;  %v528_v52 = vadd.f32 %v3119_v48, %v527_v46 }
  0xf6   : > { %724 = vst.msk [vmem:[%s3134_s18 + $0x78] sm:$0xff] %vm536_vm1, %v706_v45  ;;  %v701_v53 = vadd.f32 %v3124_v49, %v700_v47  ;;  %v2424_v54 = vpop.f32.mrf.mxu0 }
  0xf7   : > { %v2456_v55 = vpop.f32.mrf.mxu1  ;;  %551 = vst.msk [vmem:[%s3129_s16 + $0x70] sm:$0xff] %vm536_vm1, %v528_v52  ;;  %v810_v56 = vadd.f32 %v2424_v54, %v3225_v50  ;;  %v3331_v54 = vld [vmem:[%s3561_s2 + $0x2] ss:$0 sm:$0xff] }
  0xf8   : > { %723 = vst.msk [vmem:[%s3134_s18 + $0x70] sm:$0xff] %vm536_vm1, %v701_v53  ;;  %v985_v57 = vadd.f32 %v2456_v55, %v3230_v51  ;;  %v804_v58 = vpop.f32.mrf.mxu0  ;;  %v3336_v55 = vld [vmem:[%s3563_s4 + $0x2] ss:$0 sm:$0xff] }
  0xf9   : > { %v979_v59 = vpop.f32.mrf.mxu1  ;;  %1980 = vst.msk [vmem:[%s3129_s16 + $0x88] sm:$0xff] %vm536_vm1, %v810_v56  ;;  %v805_v48 = vadd.f32 %v3225_v50, %v804_v58 }
  0xfa   : > { %2018 = vst.msk [vmem:[%s3134_s18 + $0x88] sm:$0xff] %vm536_vm1, %v985_v57  ;;  %v980_v49 = vadd.f32 %v3230_v51, %v979_v59  ;;  %v2427_v60 = vpop.f32.mrf.mxu0 }
  0xfb   : > { %v2459_v61 = vpop.f32.mrf.mxu1  ;;  %1979 = vst.msk [vmem:[%s3129_s16 + $0x80] sm:$0xff] %vm536_vm1, %v805_v48  ;;  %v820_v62 = vadd.f32 %v2427_v60, %v3225_v50 }
  0xfc   : > { %2017 = vst.msk [vmem:[%s3134_s18 + $0x80] sm:$0xff] %vm536_vm1, %v980_v49  ;;  %v995_v63 = vadd.f32 %v2459_v61, %v3230_v51  ;;  %v814_v0 = vpop.f32.mrf.mxu0 }
  0xfd   : > { %v989_v1 = vpop.f32.mrf.mxu1  ;;  %1982 = vst.msk [vmem:[%s3129_s16 + $0x98] sm:$0xff] %vm536_vm1, %v820_v62  ;;  %v815_v2 = vadd.f32 %v3225_v50, %v814_v0 }
  0xfe   : > { %2020 = vst.msk [vmem:[%s3134_s18 + $0x98] sm:$0xff] %vm536_vm1, %v995_v63  ;;  %v990_v3 = vadd.f32 %v3230_v51, %v989_v1  ;;  %v2430_v4 = vpop.f32.mrf.mxu0 }
  0xff   : > { %v2462_v5 = vpop.f32.mrf.mxu1  ;;  %1981 = vst.msk [vmem:[%s3129_s16 + $0x90] sm:$0xff] %vm536_vm1, %v815_v2  ;;  %v830_v6 = vadd.f32 %v2430_v4, %v3225_v50 }
 0x100   : > { %2019 = vst.msk [vmem:[%s3134_s18 + $0x90] sm:$0xff] %vm536_vm1, %v990_v3  ;;  %v1005_v7 = vadd.f32 %v2462_v5, %v3230_v51  ;;  %v824_v8 = vpop.f32.mrf.mxu0 }
 0x101   : > { %v999_v9 = vpop.f32.mrf.mxu1  ;;  %1984 = vst.msk [vmem:[%s3129_s16 + $0xa8] sm:$0xff] %vm536_vm1, %v830_v6  ;;  %v825_v10 = vadd.f32 %v3225_v50, %v824_v8 }
 0x102   : > { %2022 = vst.msk [vmem:[%s3134_s18 + $0xa8] sm:$0xff] %vm536_vm1, %v1005_v7  ;;  %v1000_v11 = vadd.f32 %v3230_v51, %v999_v9  ;;  %v2433_v12 = vpop.f32.mrf.mxu0 }
 0x103   : > { %v2465_v13 = vpop.f32.mrf.mxu1  ;;  %1983 = vst.msk [vmem:[%s3129_s16 + $0xa0] sm:$0xff] %vm536_vm1, %v825_v10  ;;  %v840_v14 = vadd.f32 %v2433_v12, %v3225_v50 }
 0x104   : > { %2021 = vst.msk [vmem:[%s3134_s18 + $0xa0] sm:$0xff] %vm536_vm1, %v1000_v11  ;;  %v1015_v15 = vadd.f32 %v2465_v13, %v3230_v51  ;;  %v834_v16 = vpop.f32.mrf.mxu0 }
 0x105   : > { %v1009_v17 = vpop.f32.mrf.mxu1  ;;  %1986 = vst.msk [vmem:[%s3129_s16 + $0xb8] sm:$0xff] %vm536_vm1, %v840_v14  ;;  %v835_v18 = vadd.f32 %v3225_v50, %v834_v16 }
 0x106   : > { %2024 = vst.msk [vmem:[%s3134_s18 + $0xb8] sm:$0xff] %vm536_vm1, %v1015_v15  ;;  %v1010_v19 = vadd.f32 %v3230_v51, %v1009_v17  ;;  %v2436_v20 = vpop.f32.mrf.mxu0 }
 0x107   : > { %v2468_v21 = vpop.f32.mrf.mxu1  ;;  %1985 = vst.msk [vmem:[%s3129_s16 + $0xb0] sm:$0xff] %vm536_vm1, %v835_v18  ;;  %v850_v22 = vadd.f32 %v2436_v20, %v3225_v50 }
 0x108   : > { %2023 = vst.msk [vmem:[%s3134_s18 + $0xb0] sm:$0xff] %vm536_vm1, %v1010_v19  ;;  %v1025_v23 = vadd.f32 %v2468_v21, %v3230_v51  ;;  %v844_v24 = vpop.f32.mrf.mxu0 }
 0x109   : > { %v1019_v25 = vpop.f32.mrf.mxu1  ;;  %1988 = vst.msk [vmem:[%s3129_s16 + $0xc8] sm:$0xff] %vm536_vm1, %v850_v22  ;;  %v845_v26 = vadd.f32 %v3225_v50, %v844_v24 }
 0x10a   : > { %2026 = vst.msk [vmem:[%s3134_s18 + $0xc8] sm:$0xff] %vm536_vm1, %v1025_v23  ;;  %v1020_v27 = vadd.f32 %v3230_v51, %v1019_v25  ;;  %v2439_v28 = vpop.f32.mrf.mxu0 }
 0x10b   : > { %v2471_v29 = vpop.f32.mrf.mxu1  ;;  %1987 = vst.msk [vmem:[%s3129_s16 + $0xc0] sm:$0xff] %vm536_vm1, %v845_v26  ;;  %v860_v30 = vadd.f32 %v2439_v28, %v3225_v50 }
 0x10c   : > { %2025 = vst.msk [vmem:[%s3134_s18 + $0xc0] sm:$0xff] %vm536_vm1, %v1020_v27  ;;  %v1035_v31 = vadd.f32 %v2471_v29, %v3230_v51  ;;  %v854_v32 = vpop.f32.mrf.mxu0 }
 0x10d   : > { %v1029_v33 = vpop.f32.mrf.mxu1  ;;  %1990 = vst.msk [vmem:[%s3129_s16 + $0xd8] sm:$0xff] %vm536_vm1, %v860_v30  ;;  %v855_v34 = vadd.f32 %v3225_v50, %v854_v32 }
 0x10e   : > { %2028 = vst.msk [vmem:[%s3134_s18 + $0xd8] sm:$0xff] %vm536_vm1, %v1035_v31  ;;  %v1030_v35 = vadd.f32 %v3230_v51, %v1029_v33  ;;  %v2442_v36 = vpop.f32.mrf.mxu0 }
 0x10f   : > { %v2474_v37 = vpop.f32.mrf.mxu1  ;;  %1989 = vst.msk [vmem:[%s3129_s16 + $0xd0] sm:$0xff] %vm536_vm1, %v855_v34  ;;  %v870_v38 = vadd.f32 %v2442_v36, %v3225_v50 }
 0x110   : > { %2027 = vst.msk [vmem:[%s3134_s18 + $0xd0] sm:$0xff] %vm536_vm1, %v1030_v35  ;;  %v1045_v39 = vadd.f32 %v2474_v37, %v3230_v51  ;;  %v864_v40 = vpop.f32.mrf.mxu0 }
 0x111   : > { %v1039_v41 = vpop.f32.mrf.mxu1  ;;  %1992 = vst.msk [vmem:[%s3129_s16 + $0xe8] sm:$0xff] %vm536_vm1, %v870_v38  ;;  %v865_v42 = vadd.f32 %v3225_v50, %v864_v40 }
 0x112   : > { %2030 = vst.msk [vmem:[%s3134_s18 + $0xe8] sm:$0xff] %vm536_vm1, %v1045_v39  ;;  %v1040_v43 = vadd.f32 %v3230_v51, %v1039_v41  ;;  %v2445_v44 = vpop.f32.mrf.mxu0 }
 0x113   : > { %v2477_v45 = vpop.f32.mrf.mxu1  ;;  %1991 = vst.msk [vmem:[%s3129_s16 + $0xe0] sm:$0xff] %vm536_vm1, %v865_v42  ;;  %v880_v46 = vadd.f32 %v2445_v44, %v3225_v50 }
 0x114   : > { %2029 = vst.msk [vmem:[%s3134_s18 + $0xe0] sm:$0xff] %vm536_vm1, %v1040_v43  ;;  %v1055_v47 = vadd.f32 %v2477_v45, %v3230_v51  ;;  %v874_v52 = vpop.f32.mrf.mxu0 }
 0x115   : > { %v1049_v53 = vpop.f32.mrf.mxu1  ;;  %1994 = vst.msk [vmem:[%s3129_s16 + $0xf8] sm:$0xff] %vm536_vm1, %v880_v46  ;;  %v875_v56 = vadd.f32 %v3225_v50, %v874_v52 }
 0x116   : > { %2032 = vst.msk [vmem:[%s3134_s18 + $0xf8] sm:$0xff] %vm536_vm1, %v1055_v47  ;;  %v1050_v57 = vadd.f32 %v3230_v51, %v1049_v53  ;;  %v2488_v58 = vpop.f32.mrf.mxu0 }
 0x117   : > { %v2520_v59 = vpop.f32.mrf.mxu1  ;;  %1993 = vst.msk [vmem:[%s3129_s16 + $0xf0] sm:$0xff] %vm536_vm1, %v875_v56  ;;  %v1160_v48 = vadd.f32 %v2488_v58, %v3331_v54  ;;  %v3437_v58 = vld [vmem:[%s3561_s2 + $0x3] ss:$0 sm:$0xff] }
 0x118   : > { %2031 = vst.msk [vmem:[%s3134_s18 + $0xf0] sm:$0xff] %vm536_vm1, %v1050_v57  ;;  %v1335_v49 = vadd.f32 %v2520_v59, %v3336_v55  ;;  %v1154_v60 = vpop.f32.mrf.mxu0  ;;  %v3442_v59 = vld [vmem:[%s3563_s4 + $0x3] ss:$0 sm:$0xff] }
 0x119   : > { %v1329_v61 = vpop.f32.mrf.mxu1  ;;  %2056 = vst.msk [vmem:[%s3129_s16 + $0x108] sm:$0xff] %vm536_vm1, %v1160_v48  ;;  %v1155_v50 = vadd.f32 %v3331_v54, %v1154_v60 }
 0x11a   : > { %2094 = vst.msk [vmem:[%s3134_s18 + $0x108] sm:$0xff] %vm536_vm1, %v1335_v49  ;;  %v1330_v51 = vadd.f32 %v3336_v55, %v1329_v61  ;;  %v2491_v62 = vpop.f32.mrf.mxu0 }
 0x11b   : > { %v2523_v63 = vpop.f32.mrf.mxu1  ;;  %2055 = vst.msk [vmem:[%s3129_s16 + $0x100] sm:$0xff] %vm536_vm1, %v1155_v50  ;;  %v1170_v0 = vadd.f32 %v2491_v62, %v3331_v54 }
 0x11c   : > { %2093 = vst.msk [vmem:[%s3134_s18 + $0x100] sm:$0xff] %vm536_vm1, %v1330_v51  ;;  %v1345_v1 = vadd.f32 %v2523_v63, %v3336_v55  ;;  %v1164_v2 = vpop.f32.mrf.mxu0 }
 0x11d   : > { %v1339_v3 = vpop.f32.mrf.mxu1  ;;  %2058 = vst.msk [vmem:[%s3129_s16 + $0x118] sm:$0xff] %vm536_vm1, %v1170_v0  ;;  %v1165_v4 = vadd.f32 %v3331_v54, %v1164_v2 }
 0x11e   : > { %2096 = vst.msk [vmem:[%s3134_s18 + $0x118] sm:$0xff] %vm536_vm1, %v1345_v1  ;;  %v1340_v5 = vadd.f32 %v3336_v55, %v1339_v3  ;;  %v2494_v6 = vpop.f32.mrf.mxu0 }
 0x11f   : > { %v2526_v7 = vpop.f32.mrf.mxu1  ;;  %2057 = vst.msk [vmem:[%s3129_s16 + $0x110] sm:$0xff] %vm536_vm1, %v1165_v4  ;;  %v1180_v8 = vadd.f32 %v2494_v6, %v3331_v54 }
 0x120   : > { %2095 = vst.msk [vmem:[%s3134_s18 + $0x110] sm:$0xff] %vm536_vm1, %v1340_v5  ;;  %v1355_v9 = vadd.f32 %v2526_v7, %v3336_v55  ;;  %v1174_v10 = vpop.f32.mrf.mxu0 }
 0x121   : > { %v1349_v11 = vpop.f32.mrf.mxu1  ;;  %2060 = vst.msk [vmem:[%s3129_s16 + $0x128] sm:$0xff] %vm536_vm1, %v1180_v8  ;;  %v1175_v12 = vadd.f32 %v3331_v54, %v1174_v10 }
 0x122   : > { %2098 = vst.msk [vmem:[%s3134_s18 + $0x128] sm:$0xff] %vm536_vm1, %v1355_v9  ;;  %v1350_v13 = vadd.f32 %v3336_v55, %v1349_v11  ;;  %v2497_v14 = vpop.f32.mrf.mxu0 }
 0x123   : > { %v2529_v15 = vpop.f32.mrf.mxu1  ;;  %2059 = vst.msk [vmem:[%s3129_s16 + $0x120] sm:$0xff] %vm536_vm1, %v1175_v12  ;;  %v1190_v16 = vadd.f32 %v2497_v14, %v3331_v54 }
 0x124   : > { %2097 = vst.msk [vmem:[%s3134_s18 + $0x120] sm:$0xff] %vm536_vm1, %v1350_v13  ;;  %v1365_v17 = vadd.f32 %v2529_v15, %v3336_v55  ;;  %v1184_v18 = vpop.f32.mrf.mxu0 }
 0x125   : > { %v1359_v19 = vpop.f32.mrf.mxu1  ;;  %2062 = vst.msk [vmem:[%s3129_s16 + $0x138] sm:$0xff] %vm536_vm1, %v1190_v16  ;;  %v1185_v20 = vadd.f32 %v3331_v54, %v1184_v18 }
 0x126   : > { %2100 = vst.msk [vmem:[%s3134_s18 + $0x138] sm:$0xff] %vm536_vm1, %v1365_v17  ;;  %v1360_v21 = vadd.f32 %v3336_v55, %v1359_v19  ;;  %v2500_v22 = vpop.f32.mrf.mxu0 }
 0x127   : > { %v2532_v23 = vpop.f32.mrf.mxu1  ;;  %2061 = vst.msk [vmem:[%s3129_s16 + $0x130] sm:$0xff] %vm536_vm1, %v1185_v20  ;;  %v1200_v24 = vadd.f32 %v2500_v22, %v3331_v54 }
 0x128   : > { %2099 = vst.msk [vmem:[%s3134_s18 + $0x130] sm:$0xff] %vm536_vm1, %v1360_v21  ;;  %v1375_v25 = vadd.f32 %v2532_v23, %v3336_v55  ;;  %v1194_v26 = vpop.f32.mrf.mxu0 }
 0x129   : > { %v1369_v27 = vpop.f32.mrf.mxu1  ;;  %2064 = vst.msk [vmem:[%s3129_s16 + $0x148] sm:$0xff] %vm536_vm1, %v1200_v24  ;;  %v1195_v28 = vadd.f32 %v3331_v54, %v1194_v26 }
 0x12a   : > { %2102 = vst.msk [vmem:[%s3134_s18 + $0x148] sm:$0xff] %vm536_vm1, %v1375_v25  ;;  %v1370_v29 = vadd.f32 %v3336_v55, %v1369_v27  ;;  %v2503_v30 = vpop.f32.mrf.mxu0 }
 0x12b   : > { %v2535_v31 = vpop.f32.mrf.mxu1  ;;  %2063 = vst.msk [vmem:[%s3129_s16 + $0x140] sm:$0xff] %vm536_vm1, %v1195_v28  ;;  %v1210_v32 = vadd.f32 %v2503_v30, %v3331_v54 }
 0x12c   : > { %2101 = vst.msk [vmem:[%s3134_s18 + $0x140] sm:$0xff] %vm536_vm1, %v1370_v29  ;;  %v1385_v33 = vadd.f32 %v2535_v31, %v3336_v55  ;;  %v1204_v34 = vpop.f32.mrf.mxu0 }
 0x12d   : > { %v1379_v35 = vpop.f32.mrf.mxu1  ;;  %2066 = vst.msk [vmem:[%s3129_s16 + $0x158] sm:$0xff] %vm536_vm1, %v1210_v32  ;;  %v1205_v36 = vadd.f32 %v3331_v54, %v1204_v34 }
 0x12e   : > { %2104 = vst.msk [vmem:[%s3134_s18 + $0x158] sm:$0xff] %vm536_vm1, %v1385_v33  ;;  %v1380_v37 = vadd.f32 %v3336_v55, %v1379_v35  ;;  %v2506_v38 = vpop.f32.mrf.mxu0 }
 0x12f   : > { %v2538_v39 = vpop.f32.mrf.mxu1  ;;  %2065 = vst.msk [vmem:[%s3129_s16 + $0x150] sm:$0xff] %vm536_vm1, %v1205_v36  ;;  %v1220_v40 = vadd.f32 %v2506_v38, %v3331_v54 }
 0x130   : > { %2103 = vst.msk [vmem:[%s3134_s18 + $0x150] sm:$0xff] %vm536_vm1, %v1380_v37  ;;  %v1395_v41 = vadd.f32 %v2538_v39, %v3336_v55  ;;  %v1214_v42 = vpop.f32.mrf.mxu0 }
 0x131   : > { %v1389_v43 = vpop.f32.mrf.mxu1  ;;  %2068 = vst.msk [vmem:[%s3129_s16 + $0x168] sm:$0xff] %vm536_vm1, %v1220_v40  ;;  %v1215_v44 = vadd.f32 %v3331_v54, %v1214_v42 }
 0x132   : > { %2106 = vst.msk [vmem:[%s3134_s18 + $0x168] sm:$0xff] %vm536_vm1, %v1395_v41  ;;  %v1390_v45 = vadd.f32 %v3336_v55, %v1389_v43  ;;  %v2509_v46 = vpop.f32.mrf.mxu0 }
 0x133   : > { %v2541_v47 = vpop.f32.mrf.mxu1  ;;  %2067 = vst.msk [vmem:[%s3129_s16 + $0x160] sm:$0xff] %vm536_vm1, %v1215_v44  ;;  %v1230_v52 = vadd.f32 %v2509_v46, %v3331_v54 }
 0x134   : > { %2105 = vst.msk [vmem:[%s3134_s18 + $0x160] sm:$0xff] %vm536_vm1, %v1390_v45  ;;  %v1405_v53 = vadd.f32 %v2541_v47, %v3336_v55  ;;  %v1224_v56 = vpop.f32.mrf.mxu0 }
 0x135   : > { %v1399_v57 = vpop.f32.mrf.mxu1  ;;  %2070 = vst.msk [vmem:[%s3129_s16 + $0x178] sm:$0xff] %vm536_vm1, %v1230_v52  ;;  %v1225_v48 = vadd.f32 %v3331_v54, %v1224_v56 }
 0x136   : > { %2108 = vst.msk [vmem:[%s3134_s18 + $0x178] sm:$0xff] %vm536_vm1, %v1405_v53  ;;  %v1400_v49 = vadd.f32 %v3336_v55, %v1399_v57  ;;  %v2552_v60 = vpop.f32.mrf.mxu0 }
 0x137   : > { %v2584_v61 = vpop.f32.mrf.mxu1  ;;  %2069 = vst.msk [vmem:[%s3129_s16 + $0x170] sm:$0xff] %vm536_vm1, %v1225_v48  ;;  %v1510_v50 = vadd.f32 %v2552_v60, %v3437_v58 }
 0x138   : > { %2107 = vst.msk [vmem:[%s3134_s18 + $0x170] sm:$0xff] %vm536_vm1, %v1400_v49  ;;  %v1685_v51 = vadd.f32 %v2584_v61, %v3442_v59  ;;  %v1504_v62 = vpop.f32.mrf.mxu0 }
 0x139   : > { %v1679_v63 = vpop.f32.mrf.mxu1  ;;  %2132 = vst.msk [vmem:[%s3129_s16 + $0x188] sm:$0xff] %vm536_vm1, %v1510_v50  ;;  %v1505_v54 = vadd.f32 %v3437_v58, %v1504_v62 }
 0x13a   : > { %2170 = vst.msk [vmem:[%s3134_s18 + $0x188] sm:$0xff] %vm536_vm1, %v1685_v51  ;;  %v1680_v55 = vadd.f32 %v3442_v59, %v1679_v63  ;;  %v2555_v0 = vpop.f32.mrf.mxu0 }
 0x13b   : > { %v2587_v1 = vpop.f32.mrf.mxu1  ;;  %2131 = vst.msk [vmem:[%s3129_s16 + $0x180] sm:$0xff] %vm536_vm1, %v1505_v54  ;;  %v1520_v2 = vadd.f32 %v2555_v0, %v3437_v58 }
 0x13c   : > { %2169 = vst.msk [vmem:[%s3134_s18 + $0x180] sm:$0xff] %vm536_vm1, %v1680_v55  ;;  %v1695_v3 = vadd.f32 %v2587_v1, %v3442_v59  ;;  %v1514_v4 = vpop.f32.mrf.mxu0 }
 0x13d   : > { %v1689_v5 = vpop.f32.mrf.mxu1  ;;  %2134 = vst.msk [vmem:[%s3129_s16 + $0x198] sm:$0xff] %vm536_vm1, %v1520_v2  ;;  %v1515_v6 = vadd.f32 %v3437_v58, %v1514_v4 }
 0x13e   : > { %2172 = vst.msk [vmem:[%s3134_s18 + $0x198] sm:$0xff] %vm536_vm1, %v1695_v3  ;;  %v1690_v7 = vadd.f32 %v3442_v59, %v1689_v5  ;;  %v2558_v8 = vpop.f32.mrf.mxu0 }
 0x13f   : > { %v2590_v9 = vpop.f32.mrf.mxu1  ;;  %2133 = vst.msk [vmem:[%s3129_s16 + $0x190] sm:$0xff] %vm536_vm1, %v1515_v6  ;;  %v1530_v10 = vadd.f32 %v2558_v8, %v3437_v58 }
 0x140   : > { %2171 = vst.msk [vmem:[%s3134_s18 + $0x190] sm:$0xff] %vm536_vm1, %v1690_v7  ;;  %v1705_v11 = vadd.f32 %v2590_v9, %v3442_v59  ;;  %v1524_v12 = vpop.f32.mrf.mxu0 }
 0x141   : > { %v1699_v13 = vpop.f32.mrf.mxu1  ;;  %2136 = vst.msk [vmem:[%s3129_s16 + $0x1a8] sm:$0xff] %vm536_vm1, %v1530_v10  ;;  %v1525_v14 = vadd.f32 %v3437_v58, %v1524_v12 }
 0x142   : > { %2174 = vst.msk [vmem:[%s3134_s18 + $0x1a8] sm:$0xff] %vm536_vm1, %v1705_v11  ;;  %v1700_v15 = vadd.f32 %v3442_v59, %v1699_v13  ;;  %v2561_v16 = vpop.f32.mrf.mxu0 }
 0x143   : > { %v2593_v17 = vpop.f32.mrf.mxu1  ;;  %2135 = vst.msk [vmem:[%s3129_s16 + $0x1a0] sm:$0xff] %vm536_vm1, %v1525_v14  ;;  %v1540_v18 = vadd.f32 %v2561_v16, %v3437_v58 }
 0x144   : > { %2173 = vst.msk [vmem:[%s3134_s18 + $0x1a0] sm:$0xff] %vm536_vm1, %v1700_v15  ;;  %v1715_v19 = vadd.f32 %v2593_v17, %v3442_v59  ;;  %v1534_v20 = vpop.f32.mrf.mxu0 }
 0x145   : > { %v1709_v21 = vpop.f32.mrf.mxu1  ;;  %2138 = vst.msk [vmem:[%s3129_s16 + $0x1b8] sm:$0xff] %vm536_vm1, %v1540_v18  ;;  %v1535_v22 = vadd.f32 %v3437_v58, %v1534_v20 }
 0x146   : > { %2176 = vst.msk [vmem:[%s3134_s18 + $0x1b8] sm:$0xff] %vm536_vm1, %v1715_v19  ;;  %v1710_v23 = vadd.f32 %v3442_v59, %v1709_v21  ;;  %v2564_v24 = vpop.f32.mrf.mxu0 }
 0x147   : > { %v2596_v25 = vpop.f32.mrf.mxu1  ;;  %2137 = vst.msk [vmem:[%s3129_s16 + $0x1b0] sm:$0xff] %vm536_vm1, %v1535_v22  ;;  %v1550_v26 = vadd.f32 %v2564_v24, %v3437_v58 }
 0x148   : > { %2175 = vst.msk [vmem:[%s3134_s18 + $0x1b0] sm:$0xff] %vm536_vm1, %v1710_v23  ;;  %v1725_v27 = vadd.f32 %v2596_v25, %v3442_v59  ;;  %v1544_v28 = vpop.f32.mrf.mxu0 }
 0x149   : > { %v1719_v29 = vpop.f32.mrf.mxu1  ;;  %2140 = vst.msk [vmem:[%s3129_s16 + $0x1c8] sm:$0xff] %vm536_vm1, %v1550_v26  ;;  %v1545_v30 = vadd.f32 %v3437_v58, %v1544_v28 }
 0x14a   : > { %2178 = vst.msk [vmem:[%s3134_s18 + $0x1c8] sm:$0xff] %vm536_vm1, %v1725_v27  ;;  %v1720_v31 = vadd.f32 %v3442_v59, %v1719_v29  ;;  %v2567_v32 = vpop.f32.mrf.mxu0 }
 0x14b   : > { %v2599_v33 = vpop.f32.mrf.mxu1  ;;  %2139 = vst.msk [vmem:[%s3129_s16 + $0x1c0] sm:$0xff] %vm536_vm1, %v1545_v30  ;;  %v1560_v34 = vadd.f32 %v2567_v32, %v3437_v58 }
 0x14c   : > { %2177 = vst.msk [vmem:[%s3134_s18 + $0x1c0] sm:$0xff] %vm536_vm1, %v1720_v31  ;;  %v1735_v35 = vadd.f32 %v2599_v33, %v3442_v59  ;;  %v1554_v36 = vpop.f32.mrf.mxu0 }
 0x14d   : > { %v1729_v37 = vpop.f32.mrf.mxu1  ;;  %2142 = vst.msk [vmem:[%s3129_s16 + $0x1d8] sm:$0xff] %vm536_vm1, %v1560_v34  ;;  %v1555_v38 = vadd.f32 %v3437_v58, %v1554_v36 }
 0x14e   : > { %2180 = vst.msk [vmem:[%s3134_s18 + $0x1d8] sm:$0xff] %vm536_vm1, %v1735_v35  ;;  %v1730_v39 = vadd.f32 %v3442_v59, %v1729_v37  ;;  %v2570_v40 = vpop.f32.mrf.mxu0 }
 0x14f   : > { %v2602_v41 = vpop.f32.mrf.mxu1  ;;  %2141 = vst.msk [vmem:[%s3129_s16 + $0x1d0] sm:$0xff] %vm536_vm1, %v1555_v38  ;;  %v1570_v42 = vadd.f32 %v2570_v40, %v3437_v58 }
 0x150   : > { %2179 = vst.msk [vmem:[%s3134_s18 + $0x1d0] sm:$0xff] %vm536_vm1, %v1730_v39  ;;  %v1745_v43 = vadd.f32 %v2602_v41, %v3442_v59  ;;  %v1564_v44 = vpop.f32.mrf.mxu0 }
 0x151   : > { %v1739_v45 = vpop.f32.mrf.mxu1  ;;  %2144 = vst.msk [vmem:[%s3129_s16 + $0x1e8] sm:$0xff] %vm536_vm1, %v1570_v42  ;;  %v1565_v46 = vadd.f32 %v3437_v58, %v1564_v44 }
 0x152   : > { %2182 = vst.msk [vmem:[%s3134_s18 + $0x1e8] sm:$0xff] %vm536_vm1, %v1745_v43  ;;  %v1740_v47 = vadd.f32 %v3442_v59, %v1739_v45  ;;  %v2573_v52 = vpop.f32.mrf.mxu0 }
 0x153   : > { %v2605_v53 = vpop.f32.mrf.mxu1  ;;  %2143 = vst.msk [vmem:[%s3129_s16 + $0x1e0] sm:$0xff] %vm536_vm1, %v1565_v46  ;;  %v1580_v56 = vadd.f32 %v2573_v52, %v3437_v58 }
 0x154   : > { %2181 = vst.msk [vmem:[%s3134_s18 + $0x1e0] sm:$0xff] %vm536_vm1, %v1740_v47  ;;  %v1755_v57 = vadd.f32 %v2605_v53, %v3442_v59  ;;  %v1574_v48 = vpop.f32.mrf.mxu0 }
 0x155   : > { %v1749_v49 = vpop.f32.mrf.mxu1  ;;  %2146 = vst.msk [vmem:[%s3129_s16 + $0x1f8] sm:$0xff] %vm536_vm1, %v1580_v56  ;;  %v1575_v60 = vadd.f32 %v3437_v58, %v1574_v48 }
 0x156   : > { %2184 = vst.msk [vmem:[%s3134_s18 + $0x1f8] sm:$0xff] %vm536_vm1, %v1755_v57  ;;  %v1750_v61 = vadd.f32 %v3442_v59, %v1749_v49 }
 0x157   : > { %2145 = vst.msk [vmem:[%s3129_s16 + $0x1f0] sm:$0xff] %vm536_vm1, %v1575_v60 }
 0x158   : > { %2183 = vst.msk [vmem:[%s3134_s18 + $0x1f0] sm:$0xff] %vm536_vm1, %v1750_v61 }
 0x159 PF: > { %s17_s23 = sadd.s32 1, %s2652_s23   ;;  %s3566_s21 = smov %s2648_s22 }
 0x15a   : > { %p14_p5 = scmp.ge.s32.totalorder %s17_s23, 4   ;;  %s3567_s22 = smov %s3569_s24 }
 0x15c   :  { %16 = sbr.rel (!%p14_p5) target bundleno = 2 (0x2), region = 100 }

</bundles_post_ra>
